<compile_context>
chip_gen: v5e
topology: v5e:2x2
jax: 0.10.0
libtpu: 0.0.40
codegen_flags: <defaults>
</compile_context>

<pallas_src>
import jax
import jax.numpy as jnp
from jax.experimental import pallas as pl
from jax.experimental.pallas import tpu as pltpu


# --------------------------------------------------------------------------- helpers

_HEADROOM_BYTES = 2 * 1024 * 1024          # compute temporaries / pipeline internals
_PIPELINE_SPLIT_BYTES = 4 * 1024 * 1024    # above this, split HW for DMA/compute overlap

_GEN_CFG = {
    # generation : (block VMEM budget, vmem_limit_bytes, TensorCores per chip)
    "v5e":     (48 * 2**20,  64 * 2**20, 1),
    "v5p":     (48 * 2**20,  64 * 2**20, 1),
    "v6e":     (88 * 2**20, 100 * 2**20, 1),
    "v7x":     (40 * 2**20,  48 * 2**20, 2),   # 64 MiB physical -> keep ~16 MiB headroom
    "unknown": (24 * 2**20,  32 * 2**20, 1),
}


def _tpu_generation():
    try:
        kind = jax.devices()[0].device_kind.lower()
    except Exception:
        return "unknown"
    if "v7" in kind or "7x" in kind:
        return "v7x"
    if "v6" in kind:
        return "v6e"
    if "v5" in kind:
        return "v5e" if ("lite" in kind or "5e" in kind) else "v5p"
    return "unknown"


def _rup(x, m):
    return ((x + m - 1) // m) * m


def _sublane(dtype):
    # 8 sublanes of 32-bit words; sub-32-bit dtypes pack along sublanes.
    return 8 * max(1, 4 // jnp.dtype(dtype).itemsize)


def _softplus_scale(z, inv_hw, img_w, img_h):
    """Finalize on a (B, 4) pre-activation block: avg-pool scale, softplus, W/H scale."""
    z = z * inv_hw
    sp = jnp.where(z > 20.0, z, jnp.log1p(jnp.exp(jnp.minimum(z, 20.0))))
    wh = jnp.array([img_w, img_h, img_w, img_h], jnp.float32)
    bias = jnp.array([0.0, 0.0, 0.5, 0.5], jnp.float32)
    return (sp + bias) * wh


# --------------------------------------------------------------------------- kernel

def _make_kernel(chans, inv_hw, img_w, img_h, apply_nl):
    """Kernel for a fixed tuple of per-feature channel counts."""
    offs = [0]
    for c in chans:
        offs.append(offs[-1] + c)
    n = len(chans)

    def kernel(*refs):
        # refs : x_0..x_{n-1}  VMEM (Bt, C_i, HWt) native dtype
        #        w_ref         VMEM (8, C_pad) f32, rows [fx, fy, cx, cy, 0,0,0,0]
        #        out_ref       VMEM (1, Bt, 8) f32 (resident across HW axis)
        #        acc_ref       VMEM scratch (Bt, C_pad) f32, lane-dense accumulator
        x_refs = refs[:n]
        w_ref = refs[n]
        out_ref = refs[n + 1]
        acc_ref = refs[n + 2]

        hw_i = pl.program_id(2)

        @pl.when(hw_i == 0)
        def _init():
            acc_ref[...] = jnp.zeros_like(acc_ref)

        # Streaming spatial reduce of this HW tile; accumulate per channel in f32
        # without materializing an f32 copy of the whole input block.
        for i in range(n):
            s = jnp.sum(x_refs[i][...], axis=2, dtype=jnp.float32)   # (Bt, C_i)
            acc_ref[:, offs[i]:offs[i + 1]] += s

        @pl.when(hw_i == pl.num_programs(2) - 1)
        def _finalize():
            # One fused 1x1-conv contraction for the whole tile: (Bt, C) x (8, C)^T.
            z = jax.lax.dot_general(
                acc_ref[...], w_ref[...], (((1,), (1,)), ((), ())),
                preferred_element_type=jnp.float32)                  # (Bt, 8)
            if apply_nl:
                z = z * inv_hw                                       # global average pool
                # Softplus with PyTorch threshold-20 semantics.
                sp = jnp.where(z > 20.0, z,
                               jnp.log1p(jnp.exp(jnp.minimum(z, 20.0))))
                # Columns: [fx, fy, cx, cy, pad...]; fx/cx scale by W, fy/cy by H.
                col = jax.lax.broadcasted_iota(jnp.int32, z.shape, 1)
                scale = jnp.where(col % 2 == 0, img_w, img_h)
                bias = jnp.where(col >= 2, 0.5, 0.0)                 # offsets get +0.5
                z = (sp + bias) * scale
            out_ref[0] = z

    return kernel


# --------------------------------------------------------------------------- wrapper

def intrinsics_head(bottleneck, img_width, img_height, focal_w, offsets_w):
    """JAX/Pallas equivalent of IntrinsicsHead.forward.

    bottleneck: list of lists of NCHW arrays; the last feature of each pyramid is
                (implicitly) channel-concatenated inside the kernel.
    focal_w / offsets_w: PyTorch Conv2d weights of shape (2, C_total, 1, 1), no bias.
    Returns (B, 4, 4) float32 intrinsics matrices.
    """
    img_width = float(img_width)
    img_height = float(img_height)

    last_features = [f[-1] for f in bottleneck]
    B, _, H, W_sp = last_features[0].shape
    HW = H * W_sp
    inv_hw = 1.0 / float(HW)
    chans = tuple(int(f.shape[1]) for f in last_features)
    C_total = sum(chans)
    C_pad = _rup(C_total, 128)
    # Free reshapes (NCHW is contiguous over H*W); keep native dtype.
    xs = [f.reshape(B, c, HW) for f, c in zip(last_features, chans)]
    itemsizes = [jnp.dtype(x.dtype).itemsize for x in xs]
    raw_input_bytes = sum(x.size * it for x, it in zip(xs, itemsizes))

    # Fused 1x1-conv weight, transposed + padded: rows = [fx, fy, cx, cy, 0,0,0,0].
    w4 = jnp.concatenate(
        [focal_w[:, :, 0, 0], offsets_w[:, :, 0, 0]], axis=0).astype(jnp.float32)
    w8 = jnp.zeros((8, C_pad), jnp.float32).at[:4, :C_total].set(w4)

    gen = _tpu_generation()
    budget, vmem_limit, n_cores = _GEN_CFG.get(gen, _GEN_CFG["unknown"])

    # ---- layout-aware VMEM accounting (double-buffered inputs & weight, resident
    # output block, scratch accumulator, fixed headroom) -----------------------------
    def total_vmem(bt, hwt):
        inp = 2 * sum(
            bt * _rup(c, _sublane(x.dtype)) * _rup(hwt, 128) * it
            for c, x, it in zip(chans, xs, itemsizes))
        wgt = 2 * _rup(8, 8) * _rup(C_pad, 128) * 4
        out = 2 * _rup(bt, 8) * _rup(8, 128) * 4
        scr = _rup(bt, 8) * _rup(C_pad, 128) * 4
        return inp + wgt + out + scr + _HEADROOM_BYTES

    # ---- batch tile: a divisor of B (multiple of 8 when < B) so no padded rows -----
    divs = [d for d in range(1, B + 1) if B % d == 0 and (d == B or d % 8 == 0)]
    Bt = None
    for d in sorted(divs, reverse=True):
        if total_vmem(d, HW) <= budget:
            Bt = d
            break
    if Bt is None:
        Bt = min(divs)

    # ---- HW tile: 128-lane-aligned divisor of HW -----------------------------------
    HWt = HW
    if total_vmem(Bt, HW) > budget:
        for t in sorted((t for t in range(128, HW, 128) if HW % t == 0), reverse=True):
            if total_vmem(Bt, t) <= budget:
                HWt = t
                break
        # TODO(synk): if HW has no 128-aligned divisor under budget we keep full-HW
        # blocks; vmem_limit_bytes is still set explicitly to give the compiler headroom.
    elif Bt == B and raw_input_bytes > _PIPELINE_SPLIT_BYTES:
        # Whole problem fits in one block: still split HW into a few chunks so the DMA
        # of chunk i+1 overlaps the reduce of chunk i.
        for parts in (2, 3, 4):
            t = HW // parts
            if HW % parts == 0 and t % 128 == 0 and total_vmem(Bt, t) <= budget:
                HWt = t
                break

    grid_b = B // Bt
    grid_hw = HW // HWt

    # ---- v7x: give the second TensorCore half of the HW reduction when grid_b == 1 -
    n_split = 1
    if n_cores > 1 and grid_b < n_cores and grid_hw % n_cores == 0:
        n_split = n_cores
    per_split = grid_hw // n_split
    apply_nl = (n_split == 1)   # with a split, partial sums are activated in the wrapper

    kernel = _make_kernel(chans, inv_hw, img_width, img_height, apply_nl)

    in_specs = [
        pl.BlockSpec((Bt, c, HWt), lambda s, b, h: (b, 0, s * per_split + h))
        for c in chans
    ]
    in_specs.append(pl.BlockSpec((8, C_pad), lambda s, b, h: (0, 0)))
    out_specs = pl.BlockSpec((1, Bt, 8), lambda s, b, h: (s, b, 0))

    cost = pl.CostEstimate(
        flops=int(B * C_total * HW + 2 * B * C_total * 8),
        transcendentals=int(8 * B),
        bytes_accessed=int(raw_input_bytes + w8.size * 4 + n_split * B * 8 * 4))

    res = pl.pallas_call(
        kernel,
        out_shape=jax.ShapeDtypeStruct((n_split, B, 8), jnp.float32),
        grid_spec=pltpu.PrefetchScalarGridSpec(
            num_scalar_prefetch=0,
            grid=(n_split, grid_b, per_split),
            in_specs=in_specs,
            out_specs=out_specs,
            scratch_shapes=[pltpu.VMEM((Bt, C_pad), jnp.float32)],
        ),
        compiler_params=pltpu.CompilerParams(
            dimension_semantics=("parallel", "parallel", "arbitrary"),
            vmem_limit_bytes=vmem_limit,
        ),
        cost_estimate=cost,
    )(*xs, w8)                                           # (n_split, B, 8)

    if n_split == 1:
        res4 = res[0, :, :4]                             # [fx, fy, cx, cy] per batch row
    else:
        z = jnp.sum(res, axis=0)[:, :4]                  # combine per-core partial sums
        res4 = _softplus_scale(z, inv_hw, img_width, img_height)

    # Glue: scatter into batched 4x4 identity matrices (torch.eye / diag_embed).
    mats = jnp.tile(jnp.eye(4, dtype=jnp.float32), (B, 1, 1))
    mats = mats.at[:, 0, 0].set(res4[:, 0])
    mats = mats.at[:, 1, 1].set(res4[:, 1])
    mats = mats.at[:, 0, 2].set(res4[:, 2])
    mats = mats.at[:, 1, 2].set(res4[:, 3])
    return mats


# --------------------------------------------------------------------------- reference

def _reference(bottleneck, img_width, img_height, focal_w, offsets_w):
    """Pure-JAX reference mirroring the PyTorch forward."""
    last_features = [f[-1] for f in bottleneck]
    x = jnp.concatenate(last_features, axis=1).astype(jnp.float32)   # (B, 512, H, W)
    B = x.shape[0]
    pooled = jnp.mean(x, axis=(2, 3))                                # (B, 512)
    wh = jnp.array([img_width, img_height], dtype=jnp.float32)
    foc = jax.nn.softplus(pooled @ focal_w[:, :, 0, 0].T) * wh
    off = (jax.nn.softplus(pooled @ offsets_w[:, :, 0, 0].T) + 0.5) * wh
    mats = jnp.tile(jnp.eye(4, dtype=jnp.float32), (B, 1, 1))
    mats = mats.at[:, 0, 0].set(foc[:, 0])
    mats = mats.at[:, 1, 1].set(foc[:, 1])
    mats = mats.at[:, 0, 2].set(off[:, 0])
    mats = mats.at[:, 1, 2].set(off[:, 1])
    return mats


if __name__ == "__main__":
    key = jax.random.PRNGKey(0)
    keys = jax.random.split(key, 6)

    B, Hs, Ws = 2, 8, 8
    # 4 feature pyramids whose last levels have 128 channels each -> concat = 512.
    bottleneck = []
    for i in range(4):
        feat_last = jax.random.normal(keys[i], (B, 128, Hs, Ws), dtype=jnp.float32)
        bottleneck.append([feat_last])

    # Deterministic "conv" weights (2, 512, 1, 1), no bias (per module definition).
    init_scale = 1.0 / jnp.sqrt(512.0)
    focal_w = jax.random.normal(keys[4], (2, 512, 1, 1), dtype=jnp.float32) * init_scale
    offsets_w = jax.random.normal(keys[5], (2, 512, 1, 1), dtype=jnp.float32) * init_scale

    img_width, img_height = 640.0, 192.0

    out = intrinsics_head(bottleneck, img_width, img_height, focal_w, offsets_w)
    out = jax.block_until_ready(out)

    ref = _reference(bottleneck, img_width, img_height, focal_w, offsets_w)
    ref = jax.block_until_ready(ref)

    assert out.shape == (B, 4, 4), out.shape
    assert jnp.allclose(out, ref, rtol=1e-4, atol=1e-4), (out, ref)
    print("KERNEL_OK")
</pallas_src>

<mosaic_0001>
module attributes {stable_mosaic.version = 11 : i64} {
  func.func @kernel(%arg0: i32, %arg1: i32, %arg2: i32, %arg3: memref<2x128x64xf32, #tpu.memory_space<vmem>>, %arg4: memref<2x128x64xf32, #tpu.memory_space<vmem>>, %arg5: memref<2x128x64xf32, #tpu.memory_space<vmem>>, %arg6: memref<2x128x64xf32, #tpu.memory_space<vmem>>, %arg7: memref<8x512xf32, #tpu.memory_space<vmem>>, %arg8: memref<1x2x8xf32, #tpu.memory_space<vmem>>, %arg9: memref<2x512xf32, #tpu.memory_space<vmem>>) attributes {dimension_semantics = [#tpu.dimension_semantics<parallel>, #tpu.dimension_semantics<parallel>, #tpu.dimension_semantics<arbitrary>], iteration_bounds = array<i64: 1, 1, 1>, scalar_prefetch = 0 : i64, scratch_operands = 1 : i64, tpu.core_type = #tpu.core_type<tc>, window_params = [{transform_indices = @transform_0, window_bounds = array<i64: 2, 128, 64>}, {transform_indices = @transform_1, window_bounds = array<i64: 2, 128, 64>}, {transform_indices = @transform_2, window_bounds = array<i64: 2, 128, 64>}, {transform_indices = @transform_3, window_bounds = array<i64: 2, 128, 64>}, {pipeline_mode = #tpu.pipeline_mode<synchronous>, transform_indices = @transform_4, window_bounds = array<i64: 8, 512>}, {transform_indices = @transform_5, window_bounds = array<i64: 1, 2, 8>}]} {
    %c0_i32 = arith.constant 0 : i32
    %0 = arith.cmpi eq, %arg2, %c0_i32 : i32
    %1 = arith.extui %0 : i1 to i32
    %c0_i32_0 = arith.constant 0 : i32
    %2 = arith.cmpi ne, %1, %c0_i32_0 : i32
    scf.if %2 {
      %cst_30 = arith.constant 0.000000e+00 : f32
      %26 = vector.broadcast %cst_30 : f32 to vector<2x512xf32>
      %c0_31 = arith.constant 0 : index
      %c0_32 = arith.constant 0 : index
      %27 = vector.load %arg9[%c0_31, %c0_32] : memref<2x512xf32, #tpu.memory_space<vmem>>, vector<2x512xf32>
      tpu.vector_store %arg9[%c0_31, %c0_32], %26 {strides = array<i32>} : memref<2x512xf32, #tpu.memory_space<vmem>>, vector<2x512xf32>,
    } else {
    }
    %c0 = arith.constant 0 : index
    %c0_1 = arith.constant 0 : index
    %c0_2 = arith.constant 0 : index
    %3 = vector.load %arg3[%c0, %c0_1, %c0_2] : memref<2x128x64xf32, #tpu.memory_space<vmem>>, vector<2x128x64xf32>
    %cst = arith.constant dense<0.000000e+00> : vector<2x128xf32>
    %4 = vector.multi_reduction <add>, %3, %cst [2] : vector<2x128x64xf32> to vector<2x128xf32>
    %c0_3 = arith.constant 0 : index
    %c0_4 = arith.constant 0 : index
    %5 = vector.load %arg9[%c0_3, %c0_4] : memref<2x512xf32, #tpu.memory_space<vmem>>, vector<2x128xf32>
    %6 = arith.addf %5, %4 : vector<2x128xf32>
    %c0_5 = arith.constant 0 : index
    %c0_6 = arith.constant 0 : index
    %7 = vector.load %arg9[%c0_5, %c0_6] : memref<2x512xf32, #tpu.memory_space<vmem>>, vector<2x128xf32>
    tpu.vector_store %arg9[%c0_5, %c0_6], %6 {strides = array<i32>} : memref<2x512xf32, #tpu.memory_space<vmem>>, vector<2x128xf32>,
    %c0_7 = arith.constant 0 : index
    %c0_8 = arith.constant 0 : index
    %c0_9 = arith.constant 0 : index
    %8 = vector.load %arg4[%c0_7, %c0_8, %c0_9] : memref<2x128x64xf32, #tpu.memory_space<vmem>>, vector<2x128x64xf32>
    %cst_10 = arith.constant dense<0.000000e+00> : vector<2x128xf32>
    %9 = vector.multi_reduction <add>, %8, %cst_10 [2] : vector<2x128x64xf32> to vector<2x128xf32>
    %c0_11 = arith.constant 0 : index
    %c128 = arith.constant 128 : index
    %10 = vector.load %arg9[%c0_11, %c128] : memref<2x512xf32, #tpu.memory_space<vmem>>, vector<2x128xf32>
    %11 = arith.addf %10, %9 : vector<2x128xf32>
    %c0_12 = arith.constant 0 : index
    %c128_13 = arith.constant 128 : index
    %12 = vector.load %arg9[%c0_12, %c128_13] : memref<2x512xf32, #tpu.memory_space<vmem>>, vector<2x128xf32>
    tpu.vector_store %arg9[%c0_12, %c128_13], %11 {strides = array<i32>} : memref<2x512xf32, #tpu.memory_space<vmem>>, vector<2x128xf32>,
    %c0_14 = arith.constant 0 : index
    %c0_15 = arith.constant 0 : index
    %c0_16 = arith.constant 0 : index
    %13 = vector.load %arg5[%c0_14, %c0_15, %c0_16] : memref<2x128x64xf32, #tpu.memory_space<vmem>>, vector<2x128x64xf32>
    %cst_17 = arith.constant dense<0.000000e+00> : vector<2x128xf32>
    %14 = vector.multi_reduction <add>, %13, %cst_17 [2] : vector<2x128x64xf32> to vector<2x128xf32>
    %c0_18 = arith.constant 0 : index
    %c256 = arith.constant 256 : index
    %15 = vector.load %arg9[%c0_18, %c256] : memref<2x512xf32, #tpu.memory_space<vmem>>, vector<2x128xf32>
    %16 = arith.addf %15, %14 : vector<2x128xf32>
    %c0_19 = arith.constant 0 : index
    %c256_20 = arith.constant 256 : index
    %17 = vector.load %arg9[%c0_19, %c256_20] : memref<2x512xf32, #tpu.memory_space<vmem>>, vector<2x128xf32>
    tpu.vector_store %arg9[%c0_19, %c256_20], %16 {strides = array<i32>} : memref<2x512xf32, #tpu.memory_space<vmem>>, vector<2x128xf32>,
    %c0_21 = arith.constant 0 : index
    %c0_22 = arith.constant 0 : index
    %c0_23 = arith.constant 0 : index
    %18 = vector.load %arg6[%c0_21, %c0_22, %c0_23] : memref<2x128x64xf32, #tpu.memory_space<vmem>>, vector<2x128x64xf32>
    %cst_24 = arith.constant dense<0.000000e+00> : vector<2x128xf32>
    %19 = vector.multi_reduction <add>, %18, %cst_24 [2] : vector<2x128x64xf32> to vector<2x128xf32>
    %c0_25 = arith.constant 0 : index
    %c384 = arith.constant 384 : index
    %20 = vector.load %arg9[%c0_25, %c384] : memref<2x512xf32, #tpu.memory_space<vmem>>, vector<2x128xf32>
    %21 = arith.addf %20, %19 : vector<2x128xf32>
    %c0_26 = arith.constant 0 : index
    %c384_27 = arith.constant 384 : index
    %22 = vector.load %arg9[%c0_26, %c384_27] : memref<2x512xf32, #tpu.memory_space<vmem>>, vector<2x128xf32>
    tpu.vector_store %arg9[%c0_26, %c384_27], %21 {strides = array<i32>} : memref<2x512xf32, #tpu.memory_space<vmem>>, vector<2x128xf32>,
    %c0_i32_28 = arith.constant 0 : i32
    %23 = arith.cmpi eq, %arg2, %c0_i32_28 : i32
    %24 = arith.extui %23 : i1 to i32
    %c0_i32_29 = arith.constant 0 : i32
    %25 = arith.cmpi ne, %24, %c0_i32_29 : i32
    scf.if %25 {
      %c0_30 = arith.constant 0 : index
      %c0_31 = arith.constant 0 : index
      %26 = vector.load %arg9[%c0_30, %c0_31] : memref<2x512xf32, #tpu.memory_space<vmem>>, vector<2x512xf32>
      %c0_32 = arith.constant 0 : index
      %c0_33 = arith.constant 0 : index
      %27 = vector.load %arg7[%c0_32, %c0_33] : memref<8x512xf32, #tpu.memory_space<vmem>>, vector<8x512xf32>
      %cst_34 = arith.constant dense<0.000000e+00> : vector<2x8xf32>
      %28 = tpu.matmul %26, %27, %cst_34 {dimension_numbers = #tpu.dot_dimension_numbers<[1], [1], [0], [0], [0, 0, 1, 0], [], []>} : vector<2x512xf32>, vector<8x512xf32>, vector<2x8xf32> -> vector<2x8xf32>
      %cst_35 = arith.constant 1.562500e-02 : f32
      %29 = vector.broadcast %cst_35 : f32 to vector<2x8xf32>
      %30 = arith.mulf %28, %29 : vector<2x8xf32>
      %cst_36 = arith.constant 2.000000e+01 : f32
      %31 = vector.broadcast %cst_36 : f32 to vector<2x8xf32>
      %32 = arith.cmpf ogt, %30, %31 : vector<2x8xf32>
      %cst_37 = arith.constant 2.000000e+01 : f32
      %33 = vector.broadcast %cst_37 : f32 to vector<2x8xf32>
      %34 = arith.minimumf %30, %33 : vector<2x8xf32>
      %35 = math.exp %34 : vector<2x8xf32>
      %36 = math.log1p %35 : vector<2x8xf32>
      %37 = arith.select %32, %30, %36 : vector<2x8xi1>, vector<2x8xf32>
      %38 = tpu.iota {dimensions = array<i32: 1>} : vector<2x8xi32>
      %c2_i32 = arith.constant 2 : i32
      %c0_i32_38 = arith.constant 0 : i32
      %39 = arith.cmpi eq, %c2_i32, %c0_i32_38 : i32
      %c1_i32 = arith.constant 1 : i32
      %40 = arith.select %39, %c1_i32, %c2_i32 : i32
      %41 = vector.broadcast %40 : i32 to vector<2x8xi32>
      %42 = arith.remsi %38, %41 : vector<2x8xi32>
      %c0_i32_39 = arith.constant 0 : i32
      %43 = vector.broadcast %c0_i32_39 : i32 to vector<2x8xi32>
      %44 = arith.cmpi ne, %42, %43 : vector<2x8xi32>
      %c0_i32_40 = arith.constant 0 : i32
      %45 = vector.broadcast %c0_i32_40 : i32 to vector<2x8xi32>
      %46 = arith.cmpi slt, %42, %45 : vector<2x8xi32>
      %c0_i32_41 = arith.constant 0 : i32
      %47 = arith.cmpi slt, %40, %c0_i32_41 : i32
      %48 = vector.broadcast %47 : i1 to vector<2x8xi1>
      %49 = vector.broadcast %48 : vector<2x8xi1> to vector<2x8xi1>
      %50 = arith.xori %46, %49 : vector<2x8xi1>
      %51 = arith.andi %50, %44 : vector<2x8xi1>
      %52 = vector.broadcast %40 : i32 to vector<2x8xi32>
      %53 = arith.addi %42, %52 : vector<2x8xi32>
      %54 = arith.select %51, %53, %42 : vector<2x8xi1>, vector<2x8xi32>
      %c0_i32_42 = arith.constant 0 : i32
      %55 = vector.broadcast %c0_i32_42 : i32 to vector<2x8xi32>
      %56 = arith.cmpi eq, %54, %55 : vector<2x8xi32>
      %cst_43 = arith.constant 6.400000e+02 : f32
      %cst_44 = arith.constant 1.920000e+02 : f32
      %57 = vector.broadcast %cst_43 : f32 to vector<2x8xf32>
      %58 = vector.broadcast %cst_44 : f32 to vector<2x8xf32>
      %59 = arith.select %56, %57, %58 : vector<2x8xi1>, vector<2x8xf32>
      %c2_i32_45 = arith.constant 2 : i32
      %60 = vector.broadcast %c2_i32_45 : i32 to vector<2x8xi32>
      %61 = arith.cmpi sge, %38, %60 : vector<2x8xi32>
      %cst_46 = arith.constant 5.000000e-01 : f32
      %cst_47 = arith.constant 0.000000e+00 : f32
      %62 = vector.broadcast %cst_46 : f32 to vector<2x8xf32>
      %63 = vector.broadcast %cst_47 : f32 to vector<2x8xf32>
      %64 = arith.select %61, %62, %63 : vector<2x8xi1>, vector<2x8xf32>
      %65 = arith.addf %37, %64 : vector<2x8xf32>
      %66 = arith.mulf %65, %59 : vector<2x8xf32>
      %c0_48 = arith.constant 0 : index
      %c0_49 = arith.constant 0 : index
      %c0_50 = arith.constant 0 : index
      %67 = vector.load %arg8[%c0_48, %c0_49, %c0_50] : memref<1x2x8xf32, #tpu.memory_space<vmem>>, vector<1x2x8xf32>
      %68 = vector.shape_cast %67 : vector<1x2x8xf32> to vector<2x8xf32>
      %69 = vector.shape_cast %66 : vector<2x8xf32> to vector<1x2x8xf32>
      tpu.vector_store %arg8[%c0_48, %c0_49, %c0_50], %69 {strides = array<i32>} : memref<1x2x8xf32, #tpu.memory_space<vmem>>, vector<1x2x8xf32>,
    } else {
    }
    return
  }
  func.func @transform_0(%arg0: i32, %arg1: i32, %arg2: i32) -> (i32, i32, i32) {
    %c1_i32 = arith.constant 1 : i32
    %0 = arith.muli %arg0, %c1_i32 : i32
    %1 = arith.addi %0, %arg2 : i32
    %c0_i32 = arith.constant 0 : i32
    %c0_i32_0 = arith.constant 0 : i32
    return %arg1, %c0_i32, %1 : i32, i32, i32
  }
  func.func @transform_1(%arg0: i32, %arg1: i32, %arg2: i32) -> (i32, i32, i32) {
    %c1_i32 = arith.constant 1 : i32
    %0 = arith.muli %arg0, %c1_i32 : i32
    %1 = arith.addi %0, %arg2 : i32
    %c0_i32 = arith.constant 0 : i32
    %c0_i32_0 = arith.constant 0 : i32
    return %arg1, %c0_i32, %1 : i32, i32, i32
  }
  func.func @transform_2(%arg0: i32, %arg1: i32, %arg2: i32) -> (i32, i32, i32) {
    %c1_i32 = arith.constant 1 : i32
    %0 = arith.muli %arg0, %c1_i32 : i32
    %1 = arith.addi %0, %arg2 : i32
    %c0_i32 = arith.constant 0 : i32
    %c0_i32_0 = arith.constant 0 : i32
    return %arg1, %c0_i32, %1 : i32, i32, i32
  }
  func.func @transform_3(%arg0: i32, %arg1: i32, %arg2: i32) -> (i32, i32, i32) {
    %c1_i32 = arith.constant 1 : i32
    %0 = arith.muli %arg0, %c1_i32 : i32
    %1 = arith.addi %0, %arg2 : i32
    %c0_i32 = arith.constant 0 : i32
    %c0_i32_0 = arith.constant 0 : i32
    return %arg1, %c0_i32, %1 : i32, i32, i32
  }
  func.func @transform_4(%arg0: i32, %arg1: i32, %arg2: i32) -> (i32, i32) {
    %c0_i32 = arith.constant 0 : i32
    %c0_i32_0 = arith.constant 0 : i32
    %c0_i32_1 = arith.constant 0 : i32
    return %c0_i32, %c0_i32_0 : i32, i32
  }
  func.func @transform_5(%arg0: i32, %arg1: i32, %arg2: i32) -> (i32, i32, i32) {
    %c0_i32 = arith.constant 0 : i32
    %c0_i32_0 = arith.constant 0 : i32
    return %arg0, %arg1, %c0_i32 : i32, i32, i32
  }
}

</mosaic_0001>

<bundles_post_ra>
// kernel: tpu_custom_call.1
= control target key start
LH: loop header
LB: loop body
LE: loop exit
PB: predicated region body
PF: predicated region fallthrough
CT: control target
= control target key end

     0   :  { %vm126_vm0 = vcmask 523264   ;;  %s6836_s0 = inlined_call_operand.vmem [shape: f32[2,128,64], index: 0, kind: input, shape index: {}]   ;;  %s6837_s1 = inlined_call_operand.vmem [shape: f32[2,128,64], index: 1, kind: input, shape index: {}]   ;;  %s6838_s2 = inlined_call_operand.vmem [shape: f32[2,128,64], index: 2, kind: input, shape index: {}]   ;;  %s6839_s3 = inlined_call_operand.vmem [shape: f32[2,128,64], index: 3, kind: input, shape index: {}]   ;;  %s6840_s4 = inlined_call_operand.vmem [shape: f32[8,512], index: 4, kind: input, shape index: {}]   ;;  %s6841_s5 = inlined_call_operand.hbm [shape: f32[1,2,8], index: 5, kind: output, shape index: {}]  }
   0x1   :  { %v98_v0 = vld [vmem:[%s6836_s0 + $0x20] sm:$0xff]  ;;  %v96_v1 = vld [vmem:[%s6836_s0 + $0x10] sm:$0xff]  ;;  %v99_v6 = vld [vmem:[%s6836_s0 + $0x28] sm:$0xff] }
   0x2   :  { %v94_v2 = vld [vmem:[%s6836_s0] sm:$0xff]  ;;  %v139_v3 = vsel %vm126_vm0, %v98_v0, 0.0  ;;  %v133_v4 = vsel %vm126_vm0, %v96_v1, 0.0  ;;  %v97_v7 = vld [vmem:[%s6836_s0 + $0x18] sm:$0xff]  ;;  %v95_v8 = vld [vmem:[%s6836_s0 + $0x8] sm:$0xff] }
   0x3   :  { %v127_v5 = vsel %vm126_vm0, %v94_v2, 0.0  ;;  %140 = vadd.xlane.f32.xlu2 %v139_v3  ;;  %134 = vadd.xlane.f32.xlu1 %v133_v4 }
   0x4   :  { %128 = vadd.xlane.f32.xlu0 %v127_v5 }
   0x5   :  { %10 = vsyncpa [#allocation4], 0  ;;  %v142_v9 = vsel %vm126_vm0, %v99_v6, 0.0  ;;  %v136_v10 = vsel %vm126_vm0, %v97_v7, 0.0  ;;  %v130_v11 = vsel %vm126_vm0, %v95_v8, 0.0  ;;  %v102_v12 = vld [vmem:[%s6836_s0 + $0x40] sm:$0xff] }
   0x6   :  { %v101_v13 = vld [vmem:[%s6836_s0 + $0x38] sm:$0xff]  ;;  %v100_v14 = vld [vmem:[%s6836_s0 + $0x30] sm:$0xff]  ;;  %v151_v15 = vsel %vm126_vm0, %v102_v12, 0.0  ;;  %v103_v20 = vld [vmem:[%s6836_s0 + $0x48] sm:$0xff]  ;;  %vm1036_vm1 = vcmask 130112   ;;  %vm1040_vm2 = vcmask 195712  }
   0x7   :  { %v148_v16 = vsel %vm126_vm0, %v101_v13, 0.0  ;;  %v145_v17 = vsel %vm126_vm0, %v100_v14, 0.0  ;;  %v105_v18 = vld [vmem:[%s6836_s0 + $0x58] sm:$0xff]  ;;  %v104_v19 = vld [vmem:[%s6836_s0 + $0x50] sm:$0xff]  ;;  %v154_v23 = vsel %vm126_vm0, %v103_v20, 0.0  ;;  %v107_v25 = vld [vmem:[%s6836_s0 + $0x68] sm:$0xff] }
   0x8   :  { %v160_v21 = vsel %vm126_vm0, %v105_v18, 0.0  ;;  %v157_v22 = vsel %vm126_vm0, %v104_v19, 0.0  ;;  %v108_v24 = vld [vmem:[%s6836_s0 + $0x70] sm:$0xff]  ;;  %v106_v26 = vld [vmem:[%s6836_s0 + $0x60] sm:$0xff]  ;;  %v166_v28 = vsel %vm126_vm0, %v107_v25, 0.0  ;;  %v111_v30 = vld [vmem:[%s6836_s0 + $0x88] sm:$0xff] }
   0x9   :  { %v169_v27 = vsel %vm126_vm0, %v108_v24, 0.0  ;;  %v163_v29 = vsel %vm126_vm0, %v106_v26, 0.0  ;;  %v110_v31 = vld [vmem:[%s6836_s0 + $0x80] sm:$0xff]  ;;  %v109_v32 = vld [vmem:[%s6836_s0 + $0x78] sm:$0xff]  ;;  %v178_v33 = vsel %vm126_vm0, %v111_v30, 0.0  ;;  %v112_v38 = vld [vmem:[%s6836_s0 + $0x90] sm:$0xff] }
   0xa   :  { %v175_v34 = vsel %vm126_vm0, %v110_v31, 0.0  ;;  %v172_v35 = vsel %vm126_vm0, %v109_v32, 0.0  ;;  %v114_v36 = vld [vmem:[%s6836_s0 + $0xa0] sm:$0xff]  ;;  %v113_v37 = vld [vmem:[%s6836_s0 + $0x98] sm:$0xff]  ;;  %v181_v41 = vsel %vm126_vm0, %v112_v38, 0.0  ;;  %v116_v43 = vld [vmem:[%s6836_s0 + $0xb0] sm:$0xff] }
   0xb   :  { %143 = vadd.xlane.f32.xlu2 %v142_v9  ;;  %137 = vadd.xlane.f32.xlu1 %v136_v10  ;;  %v187_v39 = vsel %vm126_vm0, %v114_v36, 0.0  ;;  %v184_v40 = vsel %vm126_vm0, %v113_v37, 0.0  ;;  %v117_v42 = vld [vmem:[%s6836_s0 + $0xb8] sm:$0xff]  ;;  %v115_v44 = vld [vmem:[%s6836_s0 + $0xa8] sm:$0xff]  ;;  %v193_v46 = vsel %vm126_vm0, %v116_v43, 0.0  ;;  %v120_v48 = vld [vmem:[%s6836_s0 + $0xd0] sm:$0xff] }
   0xc   :  { %131 = vadd.xlane.f32.xlu0 %v130_v11  ;;  %v196_v45 = vsel %vm126_vm0, %v117_v42, 0.0  ;;  %v190_v47 = vsel %vm126_vm0, %v115_v44, 0.0  ;;  %v119_v49 = vld [vmem:[%s6836_s0 + $0xc8] sm:$0xff]  ;;  %v118_v50 = vld [vmem:[%s6836_s0 + $0xc0] sm:$0xff]  ;;  %v205_v51 = vsel %vm126_vm0, %v120_v48, 0.0  ;;  %v121_v56 = vld [vmem:[%s6836_s0 + $0xd8] sm:$0xff] }
   0xd   :  { %v202_v52 = vsel %vm126_vm0, %v119_v49, 0.0  ;;  %v199_v53 = vsel %vm126_vm0, %v118_v50, 0.0  ;;  %v123_v54 = vld [vmem:[%s6836_s0 + $0xe8] sm:$0xff]  ;;  %v122_v55 = vld [vmem:[%s6836_s0 + $0xe0] sm:$0xff]  ;;  %v208_v59 = vsel %vm126_vm0, %v121_v56, 0.0  ;;  %v125_v61 = vld [vmem:[%s6836_s0 + $0xf8] sm:$0xff] }
   0xe   :  { %v214_v57 = vsel %vm126_vm0, %v123_v54, 0.0  ;;  %v211_v58 = vsel %vm126_vm0, %v122_v55, 0.0  ;;  %v1131_v60 = vld [vmem:[%s6837_s1 + $0x8] sm:$0xff]  ;;  %v124_v62 = vld [vmem:[%s6836_s0 + $0xf0] sm:$0xff]  ;;  %v220_v0 = vsel %vm126_vm0, %v125_v61, 0.0  ;;  %v1133_v2 = vld [vmem:[%s6837_s1 + $0x18] sm:$0xff] }
   0xf   :  { %v1165_v63 = vsel %vm126_vm0, %v1131_v60, 0.0  ;;  %v217_v1 = vsel %vm126_vm0, %v124_v62, 0.0  ;;  %v1132_v3 = vld [vmem:[%s6837_s1 + $0x10] sm:$0xff]  ;;  %v1130_v4 = vld [vmem:[%s6837_s1] sm:$0xff]  ;;  %v1171_v5 = vsel %vm126_vm0, %v1133_v2, 0.0  ;;  %v1135_v9 = vld [vmem:[%s6837_s1 + $0x28] sm:$0xff] }
  0x10   :  { %v1168_v6 = vsel %vm126_vm0, %v1132_v3, 0.0  ;;  %v1162_v7 = vsel %vm126_vm0, %v1130_v4, 0.0  ;;  %v1136_v8 = vld [vmem:[%s6837_s1 + $0x30] sm:$0xff]  ;;  %v1134_v10 = vld [vmem:[%s6837_s1 + $0x20] sm:$0xff]  ;;  %v1177_v12 = vsel %vm126_vm0, %v1135_v9, 0.0  ;;  %v1139_v14 = vld [vmem:[%s6837_s1 + $0x48] sm:$0xff] }
  0x11   :  { %v1180_v11 = vsel %vm126_vm0, %v1136_v8, 0.0  ;;  %v1174_v13 = vsel %vm126_vm0, %v1134_v10, 0.0  ;;  %v1142_v20 = vld [vmem:[%s6837_s1 + $0x60] sm:$0xff]  ;;  %v4350_v26 = vmov 269488144   ;;  %v1145_v37 = vld [vmem:[%s6837_s1 + $0x78] sm:$0xff] }
  0x12   :  { %v4352_v30 = vmov 1414812756   ;;  %v4353_v32 = vmov 1987475062   ;;  %v1144_v38 = vld [vmem:[%s6837_s1 + $0x70] sm:$0xff]  ;;  %v1207_v42 = vsel %vm126_vm0, %v1145_v37, 0.0 }
  0x13   :  { %152 = vadd.xlane.f32.xlu2 %v151_v15  ;;  %149 = vadd.xlane.f32.xlu1 %v148_v16  ;;  %v1138_v15 = vld [vmem:[%s6837_s1 + $0x40] sm:$0xff]  ;;  %v1137_v16 = vld [vmem:[%s6837_s1 + $0x38] sm:$0xff]  ;;  %v265_v31 = vunpack.c.l.s4 %v4352_v30  ;;  %v1204_v43 = vsel %vm126_vm0, %v1144_v38, 0.0  ;;  %v1148_v49 = vld [vmem:[%s6837_s1 + $0x90] sm:$0xff]  ;;  %vm1044_vm3 = vcmask 261312   ;;  %vm1048_vm4 = vcmask 326912  }
  0x14   :  { %146 = vadd.xlane.f32.xlu0 %v145_v17  ;;  %v1189_v17 = vsel %vm126_vm0, %v1139_v14, 0.0  ;;  %v1186_v18 = vsel %vm126_vm0, %v1138_v15, 0.0  ;;  %v1183_v19 = vsel %vm126_vm0, %v1137_v16, 0.0  ;;  %v1147_v50 = vld [vmem:[%s6837_s1 + $0x88] sm:$0xff]  ;;  %v1149_v3 = vld [vmem:[%s6837_s1 + $0x98] sm:$0xff]  ;;  %v1154_v10 = vld [vmem:[%s6837_s1 + $0xc0] sm:$0xff] }
  0x15   :  { %v4572_v36 = vunpack.c.0.s8 %v265_v31  ;;  %v1213_v54 = vsel %vm126_vm0, %v1147_v50, 0.0  ;;  %v1151_v61 = vld [vmem:[%s6837_s1 + $0xa8] sm:$0xff]  ;;  %vm1052_vm5 = vcmask 392512   ;;  %vm1056_vm6 = vcmask 458112   ;;  %s4276_s18 = sshll.u32 %s6841_s5, 4  ;;  %s4277_s18 = int_to_ptr.hbm [resolvable:$true] %s4276_s18 }
  0x16   :  { %v1159_v50 = vld [vmem:[%s6837_s1 + $0xe8] sm:$0xff]  ;;  %vm1060_vm7 = vcmask 523712   ;;  %vm1064_vm8 = vcmask 589312   ;;  %vm1068_vm9 = vcmask 654912   ;;  %vm1072_vm10 = vcmask 720512  }
  0x17   :  { %vm1076_vm11 = vcmask 786112   ;;  %vm1080_vm12 = vcmask 851712   ;;  %vm1084_vm13 = vcmask 917312   ;;  %vm1088_vm14 = vcmask 982912  }
  0x18   :  { %vm1092_vm15 = vcmask 1048512  }
  0x1b   :  { %161 = vadd.xlane.f32.xlu2 %v160_v21  ;;  %158 = vadd.xlane.f32.xlu1 %v157_v22  ;;  %v1141_v21 = vld [vmem:[%s6837_s1 + $0x58] sm:$0xff]  ;;  %v1140_v22 = vld [vmem:[%s6837_s1 + $0x50] sm:$0xff] }
  0x1c   :  { %155 = vadd.xlane.f32.xlu0 %v154_v23  ;;  %v1198_v23 = vsel %vm126_vm0, %v1142_v20, 0.0  ;;  %v1195_v24 = vsel %vm126_vm0, %v1141_v21, 0.0  ;;  %v1192_v25 = vsel %vm126_vm0, %v1140_v22, 0.0 }
  0x23   :  { %170 = vadd.xlane.f32.xlu2 %v169_v27  ;;  %167 = vadd.xlane.f32.xlu1 %v166_v28  ;;  %v257_v27 = vunpack.c.l.s4 %v4350_v26  ;;  %v4351_v28 = vmov 842150450  }
  0x24   :  { %164 = vadd.xlane.f32.xlu0 %v163_v29  ;;  %v261_v29 = vunpack.c.l.s4 %v4351_v28  ;;  %v1156_v28 = vld [vmem:[%s6837_s1 + $0xd0] sm:$0xff] }
  0x2b   :  { %179 = vadd.xlane.f32.xlu2 %v178_v33  ;;  %176 = vadd.xlane.f32.xlu1 %v175_v34  ;;  %v269_v33 = vunpack.c.l.s4 %v4353_v32  ;;  %v4568_v34 = vunpack.c.0.s8 %v257_v27  ;;  %v1157_v27 = vld [vmem:[%s6837_s1 + $0xd8] sm:$0xff]  ;;  %v1240_v32 = vsel %vm126_vm0, %v1156_v28, 0.0 }
  0x2c   :  { %173 = vadd.xlane.f32.xlu0 %v172_v35  ;;  %v4570_v35 = vunpack.c.0.s8 %v261_v29  ;;  %v1155_v29 = vld [vmem:[%s6837_s1 + $0xc8] sm:$0xff]  ;;  %v1243_v31 = vsel %vm126_vm0, %v1157_v27, 0.0 }
  0x33   :  { %188 = vadd.xlane.f32.xlu2 %v187_v39  ;;  %185 = vadd.xlane.f32.xlu1 %v184_v40  ;;  %v4580_v39 = vunpack.c.0.s8 %v269_v33  ;;  %v1143_v40 = vld [vmem:[%s6837_s1 + $0x68] sm:$0xff]  ;;  %v1237_v33 = vsel %vm126_vm0, %v1155_v29, 0.0 }
  0x34   :  { %182 = vadd.xlane.f32.xlu0 %v181_v41 }
  0x3b   :  { %197 = vadd.xlane.f32.xlu2 %v196_v45  ;;  %194 = vadd.xlane.f32.xlu1 %v193_v46 }
  0x3c   :  { %191 = vadd.xlane.f32.xlu0 %v190_v47  ;;  %v1201_v47 = vsel %vm126_vm0, %v1143_v40, 0.0 }
  0x43   :  { %206 = vadd.xlane.f32.xlu2 %v205_v51  ;;  %203 = vadd.xlane.f32.xlu1 %v202_v52  ;;  %v1146_v51 = vld [vmem:[%s6837_s1 + $0x80] sm:$0xff] }
  0x44   :  { %200 = vadd.xlane.f32.xlu0 %v199_v53  ;;  %v1216_v53 = vsel %vm126_vm0, %v1148_v49, 0.0 }
  0x4b   :  { %215 = vadd.xlane.f32.xlu2 %v214_v57  ;;  %212 = vadd.xlane.f32.xlu1 %v211_v58 }
  0x4c   :  { %209 = vadd.xlane.f32.xlu0 %v208_v59  ;;  %v1210_v59 = vsel %vm126_vm0, %v1146_v51, 0.0  ;;  %v1158_v51 = vld [vmem:[%s6837_s1 + $0xe0] sm:$0xff] }
  0x53   :  { %1166 = vadd.xlane.f32.xlu2 %v1165_v63  ;;  %221 = vadd.xlane.f32.xlu1 %v220_v0  ;;  %v1150_v0 = vld [vmem:[%s6837_s1 + $0xa0] sm:$0xff] }
  0x54   :  { %218 = vadd.xlane.f32.xlu0 %v217_v1 }
  0x5b   :  { %1172 = vadd.xlane.f32.xlu2 %v1171_v5  ;;  %1169 = vadd.xlane.f32.xlu1 %v1168_v6  ;;  %v1225_v5 = vsel %vm126_vm0, %v1151_v61, 0.0  ;;  %v1222_v6 = vsel %vm126_vm0, %v1150_v0, 0.0 }
  0x5c   :  { %1163 = vadd.xlane.f32.xlu0 %v1162_v7  ;;  %v1219_v7 = vsel %vm126_vm0, %v1149_v3, 0.0 }
  0x63   :  { %1181 = vadd.xlane.f32.xlu2 %v1180_v11  ;;  %1178 = vadd.xlane.f32.xlu1 %v1177_v12  ;;  %v1153_v11 = vld [vmem:[%s6837_s1 + $0xb8] sm:$0xff] }
  0x64   :  { %1175 = vadd.xlane.f32.xlu0 %v1174_v13  ;;  %v1152_v13 = vld [vmem:[%s6837_s1 + $0xb0] sm:$0xff] }
  0x65   :  { %v1228_v20 = vsel %vm126_vm0, %v1152_v13, 0.0 }
  0x6b   :  { %1190 = vadd.xlane.f32.xlu2 %v1189_v17  ;;  %1187 = vadd.xlane.f32.xlu1 %v1186_v18  ;;  %v1234_v18 = vsel %vm126_vm0, %v1154_v10, 0.0 }
  0x6c   :  { %1184 = vadd.xlane.f32.xlu0 %v1183_v19  ;;  %v1231_v19 = vsel %vm126_vm0, %v1153_v11, 0.0 }
  0x73   :  { %1199 = vadd.xlane.f32.xlu2 %v1198_v23  ;;  %1196 = vadd.xlane.f32.xlu1 %v1195_v24 }
  0x74   :  { %1193 = vadd.xlane.f32.xlu0 %v1192_v25 }
  0x76   :  { %v135_v55 = vpop.xlane.xlu1 %134  ;;  %v141_v8 = vpop.xlane.xlu2 %140 }
  0x77   :  { %v129_v41 = vpop.xlane.xlu0 %128  ;;  %v291_v60 = vperm.slane %v135_v55, %v4568_v34  ;;  %v295_v62 = vperm.slane %v135_v55, %v4570_v35  ;;  %v299_v1 = vperm.slane %v135_v55, %v4572_v36  ;;  %v303_v4 = vperm.slane %v135_v55, %v4580_v39 }
  0x78   :  { %v259_v44 = vperm.slane %v129_v41, %v4568_v34  ;;  %v263_v45 = vperm.slane %v129_v41, %v4570_v35  ;;  %v267_v46 = vperm.slane %v129_v41, %v4572_v36  ;;  %v271_v48 = vperm.slane %v129_v41, %v4580_v39 }
  0x79   :  { %v323_v9 = vperm.slane %v141_v8, %v4568_v34  ;;  %v327_v12 = vperm.slane %v141_v8, %v4570_v35  ;;  %v331_v14 = vperm.slane %v141_v8, %v4572_v36  ;;  %v335_v15 = vperm.slane %v141_v8, %v4580_v39  ;;  %v1161_v8 = vld [vmem:[%s6837_s1 + $0xf8] sm:$0xff] }
  0x7a   :  { %768 = vst [vmem:[#allocation1] ss:$4 sm:$0xff] %v259_v44  ;;  %v1255_v13 = vsel %vm126_vm0, %v1161_v8, 0.0  ;;  %v2142_v8 = vld [vmem:[%s6838_s2 + $0x50] sm:$0xff] }
  0x7b   :  { %1208 = vadd.xlane.f32.xlu2 %v1207_v42  ;;  %1205 = vadd.xlane.f32.xlu1 %v1204_v43  ;;  %770 = vst [vmem:[#allocation1 + $0x1] ss:$4 sm:$0xff] %v263_v45 }
  0x7c   :  { %1202 = vadd.xlane.f32.xlu0 %v1201_v47  ;;  %772 = vst [vmem:[#allocation1 + $0x2] ss:$4 sm:$0xff] %v267_v46 }
  0x7d   :  { %774 = vst [vmem:[#allocation1 + $0x3] ss:$4 sm:$0xff] %v271_v48  ;;  %v1160_v48 = vld [vmem:[%s6837_s1 + $0xf0] sm:$0xff] }
  0x7e   :  { %v138_v17 = vpop.xlane.xlu1 %137  ;;  %v144_v30 = vpop.xlane.xlu2 %143  ;;  %v1252_v49 = vsel %vm126_vm0, %v1160_v48, 0.0 }
  0x7f   :  { %v132_v52 = vpop.xlane.xlu0 %131  ;;  %v307_v22 = vperm.slane %v138_v17, %v4568_v34  ;;  %v311_v23 = vperm.slane %v138_v17, %v4570_v35  ;;  %v315_v24 = vperm.slane %v138_v17, %v4572_v36  ;;  %v319_v25 = vperm.slane %v138_v17, %v4580_v39 }
  0x80   :  { %v275_v56 = vperm.slane %v132_v52, %v4568_v34  ;;  %v279_v57 = vperm.slane %v132_v52, %v4570_v35  ;;  %v283_v58 = vperm.slane %v132_v52, %v4572_v36  ;;  %v287_v2 = vperm.slane %v132_v52, %v4580_v39 }
  0x81   :  { %v339_v41 = vperm.slane %v144_v30, %v4568_v34  ;;  %v343_v43 = vperm.slane %v144_v30, %v4570_v35  ;;  %v347_v45 = vperm.slane %v144_v30, %v4572_v36  ;;  %v351_v46 = vperm.slane %v144_v30, %v4580_v39 }
  0x82   :  { %776 = vst [vmem:[#allocation1 + $0x20] ss:$4 sm:$0xff] %v275_v56  ;;  %v1249_v52 = vsel %vm126_vm0, %v1159_v50, 0.0 }
  0x83   :  { %1217 = vadd.xlane.f32.xlu2 %v1216_v53  ;;  %1214 = vadd.xlane.f32.xlu1 %v1213_v54  ;;  %778 = vst [vmem:[#allocation1 + $0x21] ss:$4 sm:$0xff] %v279_v57  ;;  %v1246_v53 = vsel %vm126_vm0, %v1158_v51, 0.0 }
  0x84   :  { %1211 = vadd.xlane.f32.xlu0 %v1210_v59  ;;  %v4612_v63 = vld.sshfl [vmem:[#allocation1] sm:$0xff pattern:$0x73625140]  ;;  %780 = vst [vmem:[#allocation1 + $0x22] ss:$4 sm:$0xff] %v283_v58 }
  0x85   :  { %785 = vst [vmem:[#allocation1] ss:$4 sm:$0xff] %v291_v60 }
  0x86   :  { %786 = vst [vmem:[#allocation1 + $0x1] ss:$4 sm:$0xff] %v295_v62  ;;  %v153_v54 = vpop.xlane.xlu2 %152  ;;  %v150_v56 = vpop.xlane.xlu1 %149 }
  0x87   :  { %787 = vst [vmem:[#allocation1 + $0x2] ss:$4 sm:$0xff] %v299_v1  ;;  %v147_v26 = vpop.xlane.xlu0 %146  ;;  %v387_v55 = vperm.slane %v153_v54, %v4568_v34  ;;  %v391_v57 = vperm.slane %v153_v54, %v4570_v35  ;;  %v395_v58 = vperm.slane %v153_v54, %v4572_v36  ;;  %v399_v59 = vperm.slane %v153_v54, %v4580_v39  ;;  %v2138_v54 = vld [vmem:[%s6838_s2 + $0x30] sm:$0xff] }
  0x88   :  { %788 = vst [vmem:[#allocation1 + $0x3] ss:$4 sm:$0xff] %v303_v4  ;;  %v355_v37 = vperm.slane %v147_v26, %v4568_v34  ;;  %v359_v40 = vperm.slane %v147_v26, %v4570_v35  ;;  %v363_v42 = vperm.slane %v147_v26, %v4572_v36  ;;  %v367_v44 = vperm.slane %v147_v26, %v4580_v39  ;;  %v2134_v26 = vld [vmem:[%s6838_s2 + $0x10] sm:$0xff] }
  0x89   :  { %782 = vst [vmem:[#allocation1 + $0x23] ss:$4 sm:$0xff] %v287_v2  ;;  %v371_v61 = vperm.slane %v150_v56, %v4568_v34  ;;  %v375_v0 = vperm.slane %v150_v56, %v4570_v35  ;;  %v379_v1 = vperm.slane %v150_v56, %v4572_v36  ;;  %v383_v2 = vperm.slane %v150_v56, %v4580_v39  ;;  %v2137_v56 = vld [vmem:[%s6838_s2 + $0x28] sm:$0xff] }
  0x8a   :  { %v2170_v30 = vsel %vm126_vm0, %v2134_v26, 0.0 }
  0x8b   :  { %1226 = vadd.xlane.f32.xlu2 %v1225_v5  ;;  %1223 = vadd.xlane.f32.xlu1 %v1222_v6  ;;  %v2132_v6 = vld [vmem:[%s6838_s2] sm:$0xff] }
  0x8c   :  { %1220 = vadd.xlane.f32.xlu0 %v1219_v7  ;;  %v2133_v7 = vld [vmem:[%s6838_s2 + $0x8] sm:$0xff]  ;;  %v2164_v11 = vsel %vm126_vm0, %v2132_v6, 0.0 }
  0x8e   :  { %v159_v3 = vpop.xlane.xlu1 %158  ;;  %v162_v27 = vpop.xlane.xlu2 %161 }
  0x8f   :  { %v4639_v16 = vld.sshfl [vmem:[#allocation1] sm:$0xff pattern:$0x73625140]  ;;  %v156_v4 = vpop.xlane.xlu0 %155  ;;  %v419_v5 = vperm.slane %v159_v3, %v4568_v34  ;;  %v423_v10 = vperm.slane %v159_v3, %v4570_v35 }
  0x90   :  { %795 = vst [vmem:[#allocation1] ss:$4 sm:$0xff] %v323_v9  ;;  %v4644_v21 = vld.sshfl [vmem:[#allocation1 + $0x20] sm:$0xff pattern:$0x73625140]  ;;  %v403_v17 = vperm.slane %v156_v4, %v4568_v34 }
  0x91   :  { %796 = vst [vmem:[#allocation1 + $0x1] ss:$4 sm:$0xff] %v327_v12  ;;  %v2167_v12 = vsel %vm126_vm0, %v2133_v7, 0.0  ;;  %v2141_v7 = vld [vmem:[%s6838_s2 + $0x48] sm:$0xff] }
  0x92   :  { %797 = vst [vmem:[#allocation1 + $0x2] ss:$4 sm:$0xff] %v331_v14  ;;  %v427_v14 = vperm.slane %v159_v3, %v4572_v36 }
  0x93   :  { %1235 = vadd.xlane.f32.xlu2 %v1234_v18  ;;  %1232 = vadd.xlane.f32.xlu1 %v1231_v19  ;;  %798 = vst [vmem:[#allocation1 + $0x3] ss:$4 sm:$0xff] %v335_v15  ;;  %v431_v15 = vperm.slane %v159_v3, %v4580_v39  ;;  %v407_v19 = vperm.slane %v156_v4, %v4570_v35 }
  0x94   :  { %1229 = vadd.xlane.f32.xlu0 %v1228_v20  ;;  %789 = vst [vmem:[#allocation1 + $0x20] ss:$4 sm:$0xff] %v307_v22  ;;  %v411_v20 = vperm.slane %v156_v4, %v4572_v36  ;;  %v415_v22 = vperm.slane %v156_v4, %v4580_v39 }
  0x95   :  { %790 = vst [vmem:[#allocation1 + $0x21] ss:$4 sm:$0xff] %v311_v23 }
  0x96   :  { %791 = vst [vmem:[#allocation1 + $0x22] ss:$4 sm:$0xff] %v315_v24  ;;  %v2135_v24 = vld [vmem:[%s6838_s2 + $0x18] sm:$0xff] }
  0x97   :  { %792 = vst [vmem:[#allocation1 + $0x23] ss:$4 sm:$0xff] %v319_v25  ;;  %v165_v23 = vpop.xlane.xlu0 %164  ;;  %v2136_v25 = vld [vmem:[%s6838_s2 + $0x20] sm:$0xff]  ;;  %v2173_v28 = vsel %vm126_vm0, %v2135_v24, 0.0 }
  0x98   :  { %v2176_v29 = vsel %vm126_vm0, %v2136_v25, 0.0 }
  0x9a   :  { %v4663_v38 = vld.sshfl [vmem:[#allocation1] sm:$0xff pattern:$0x73625140] }
  0x9b   :  { %1244 = vadd.xlane.f32.xlu2 %v1243_v31  ;;  %1241 = vadd.xlane.f32.xlu1 %v1240_v32  ;;  %805 = vst [vmem:[#allocation1] ss:$4 sm:$0xff] %v355_v37  ;;  %v451_v31 = vperm.slane %v165_v23, %v4568_v34  ;;  %v435_v37 = vperm.slane %v162_v27, %v4568_v34 }
  0x9c   :  { %1238 = vadd.xlane.f32.xlu0 %v1237_v33  ;;  %806 = vst [vmem:[#allocation1 + $0x1] ss:$4 sm:$0xff] %v359_v40  ;;  %v455_v33 = vperm.slane %v165_v23, %v4570_v35  ;;  %v459_v40 = vperm.slane %v165_v23, %v4572_v36 }
  0x9d   :  { %807 = vst [vmem:[#allocation1 + $0x2] ss:$4 sm:$0xff] %v363_v42  ;;  %v463_v42 = vperm.slane %v165_v23, %v4580_v39 }
  0x9e   :  { %v4672_v47 = vld.sshfl [vmem:[#allocation1 + $0x20] sm:$0xff pattern:$0x73625140]  ;;  %808 = vst [vmem:[#allocation1 + $0x3] ss:$4 sm:$0xff] %v367_v44  ;;  %v447_v44 = vperm.slane %v162_v27, %v4580_v39 }
  0x9f   :  { %799 = vst [vmem:[#allocation1 + $0x20] ss:$4 sm:$0xff] %v339_v41  ;;  %v439_v41 = vperm.slane %v162_v27, %v4570_v35 }
  0xa0   :  { %800 = vst [vmem:[#allocation1 + $0x21] ss:$4 sm:$0xff] %v343_v43  ;;  %v443_v43 = vperm.slane %v162_v27, %v4572_v36 }
  0xa1   :  { %801 = vst [vmem:[#allocation1 + $0x22] ss:$4 sm:$0xff] %v347_v45 }
  0xa2   :  { %802 = vst [vmem:[#allocation1 + $0x23] ss:$4 sm:$0xff] %v351_v46  ;;  %v171_v46 = vpop.xlane.xlu2 %170 }
  0xa3   :  { %1253 = vadd.xlane.f32.xlu2 %v1252_v49  ;;  %1250 = vadd.xlane.f32.xlu1 %v1249_v52  ;;  %v483_v48 = vperm.slane %v171_v46, %v4568_v34  ;;  %v168_v49 = vpop.xlane.xlu1 %167  ;;  %v487_v50 = vperm.slane %v171_v46, %v4570_v35  ;;  %v491_v51 = vperm.slane %v171_v46, %v4572_v36 }
  0xa4   :  { %1247 = vadd.xlane.f32.xlu0 %v1246_v53  ;;  %v495_v52 = vperm.slane %v171_v46, %v4580_v39  ;;  %v479_v3 = vperm.slane %v168_v49, %v4580_v39 }
  0xa5   :  { %v4690_v60 = vld.sshfl [vmem:[#allocation1] sm:$0xff pattern:$0x73625140] }
  0xa6   :  { %815 = vst [vmem:[#allocation1] ss:$4 sm:$0xff] %v387_v55  ;;  %v2139_v55 = vld [vmem:[%s6838_s2 + $0x38] sm:$0xff] }
  0xa7   :  { %816 = vst [vmem:[#allocation1 + $0x1] ss:$4 sm:$0xff] %v391_v57  ;;  %v467_v57 = vperm.slane %v168_v49, %v4568_v34 }
  0xa8   :  { %817 = vst [vmem:[#allocation1 + $0x2] ss:$4 sm:$0xff] %v395_v58  ;;  %v2182_v58 = vsel %vm126_vm0, %v2138_v54, 0.0 }
  0xa9   :  { %v4693_v62 = vld.sshfl [vmem:[#allocation1 + $0x20] sm:$0xff pattern:$0x73625140]  ;;  %818 = vst [vmem:[#allocation1 + $0x3] ss:$4 sm:$0xff] %v399_v59  ;;  %v2185_v59 = vsel %vm126_vm0, %v2139_v55, 0.0 }
  0xaa   :  { %809 = vst [vmem:[#allocation1 + $0x20] ss:$4 sm:$0xff] %v371_v61  ;;  %v2179_v61 = vsel %vm126_vm0, %v2137_v56, 0.0  ;;  %v180_v27 = vpop.xlane.xlu2 %179 }
  0xab   :  { %810 = vst [vmem:[#allocation1 + $0x21] ss:$4 sm:$0xff] %v375_v0  ;;  %2165 = vadd.xlane.f32.xlu2 %v2164_v11  ;;  %2168 = vadd.xlane.f32.xlu1 %v2167_v12  ;;  %v177_v4 = vpop.xlane.xlu1 %176 }
  0xac   :  { %811 = vst [vmem:[#allocation1 + $0x22] ss:$4 sm:$0xff] %v379_v1  ;;  %1256 = vadd.xlane.f32.xlu0 %v1255_v13  ;;  %v471_v1 = vperm.slane %v168_v49, %v4570_v35  ;;  %v515_v6 = vperm.slane %v177_v4, %v4568_v34  ;;  %v519_v12 = vperm.slane %v177_v4, %v4570_v35  ;;  %v2191_v13 = vsel %vm126_vm0, %v2141_v7, 0.0  ;;  %v2147_v7 = vld [vmem:[%s6838_s2 + $0x78] sm:$0xff] }
  0xad   :  { %812 = vst [vmem:[#allocation1 + $0x23] ss:$4 sm:$0xff] %v383_v2  ;;  %v475_v2 = vperm.slane %v168_v49, %v4572_v36  ;;  %v2144_v49 = vld [vmem:[%s6838_s2 + $0x60] sm:$0xff] }
  0xae   :  { %v2200_v54 = vsel %vm126_vm0, %v2144_v49, 0.0 }
  0xb0   :  { %v4708_v9 = vld.sshfl [vmem:[#allocation1] sm:$0xff pattern:$0x73625140] }
  0xb1   :  { %825 = vst [vmem:[#allocation1] ss:$4 sm:$0xff] %v419_v5  ;;  %v174_v5 = vpop.xlane.xlu0 %173 }
  0xb2   :  { %826 = vst [vmem:[#allocation1 + $0x1] ss:$4 sm:$0xff] %v423_v10  ;;  %v2140_v10 = vld [vmem:[%s6838_s2 + $0x40] sm:$0xff]  ;;  %v503_v23 = vperm.slane %v174_v5, %v4570_v35  ;;  %v507_v24 = vperm.slane %v174_v5, %v4572_v36  ;;  %v511_v25 = vperm.slane %v174_v5, %v4580_v39 }
  0xb3   :  { %827 = vst [vmem:[#allocation1 + $0x2] ss:$4 sm:$0xff] %v427_v14  ;;  %2174 = vadd.xlane.f32.xlu2 %v2173_v28  ;;  %2177 = vadd.xlane.f32.xlu1 %v2176_v29  ;;  %v2194_v14 = vsel %vm126_vm0, %v2142_v8, 0.0  ;;  %v2148_v8 = vld [vmem:[%s6838_s2 + $0x80] sm:$0xff] }
  0xb4   :  { %v4717_v18 = vld.sshfl [vmem:[#allocation1 + $0x20] sm:$0xff pattern:$0x73625140]  ;;  %828 = vst [vmem:[#allocation1 + $0x3] ss:$4 sm:$0xff] %v431_v15  ;;  %2171 = vadd.xlane.f32.xlu0 %v2170_v30  ;;  %v2188_v15 = vsel %vm126_vm0, %v2140_v10, 0.0 }
  0xb5   :  { %819 = vst [vmem:[#allocation1 + $0x20] ss:$4 sm:$0xff] %v403_v17  ;;  %v523_v17 = vperm.slane %v177_v4, %v4572_v36  ;;  %v2146_v10 = vld [vmem:[%s6838_s2 + $0x70] sm:$0xff] }
  0xb6   :  { %820 = vst [vmem:[#allocation1 + $0x21] ss:$4 sm:$0xff] %v407_v19  ;;  %v527_v19 = vperm.slane %v177_v4, %v4580_v39 }
  0xb7   :  { %821 = vst [vmem:[#allocation1 + $0x22] ss:$4 sm:$0xff] %v411_v20  ;;  %v499_v20 = vperm.slane %v174_v5, %v4568_v34 }
  0xb8   :  { %822 = vst [vmem:[#allocation1 + $0x23] ss:$4 sm:$0xff] %v415_v22 }
  0xb9   :  { %v183_v26 = vpop.xlane.xlu0 %182 }
  0xba   :  { %v547_v28 = vperm.slane %v183_v26, %v4568_v34  ;;  %v551_v30 = vperm.slane %v183_v26, %v4570_v35 }
  0xbb   :  { %v4735_v32 = vld.sshfl [vmem:[#allocation1] sm:$0xff pattern:$0x73625140]  ;;  %2183 = vadd.xlane.f32.xlu2 %v2182_v58  ;;  %2186 = vadd.xlane.f32.xlu1 %v2185_v59 }
  0xbc   :  { %835 = vst [vmem:[#allocation1] ss:$4 sm:$0xff] %v451_v31  ;;  %2180 = vadd.xlane.f32.xlu0 %v2179_v61  ;;  %v531_v31 = vperm.slane %v180_v27, %v4568_v34 }
  0xbd   :  { %836 = vst [vmem:[#allocation1 + $0x1] ss:$4 sm:$0xff] %v455_v33  ;;  %v555_v33 = vperm.slane %v183_v26, %v4572_v36 }
  0xbe   :  { %837 = vst [vmem:[#allocation1 + $0x2] ss:$4 sm:$0xff] %v459_v40  ;;  %v559_v40 = vperm.slane %v183_v26, %v4580_v39 }
  0xbf   :  { %v4744_v45 = vld.sshfl [vmem:[#allocation1 + $0x20] sm:$0xff pattern:$0x73625140]  ;;  %838 = vst [vmem:[#allocation1 + $0x3] ss:$4 sm:$0xff] %v463_v42  ;;  %v543_v42 = vperm.slane %v180_v27, %v4580_v39 }
  0xc0   :  { %829 = vst [vmem:[#allocation1 + $0x20] ss:$4 sm:$0xff] %v435_v37  ;;  %v535_v37 = vperm.slane %v180_v27, %v4570_v35 }
  0xc1   :  { %830 = vst [vmem:[#allocation1 + $0x21] ss:$4 sm:$0xff] %v439_v41  ;;  %v539_v41 = vperm.slane %v180_v27, %v4572_v36 }
  0xc2   :  { %831 = vst [vmem:[#allocation1 + $0x22] ss:$4 sm:$0xff] %v443_v43 }
  0xc3   :  { %832 = vst [vmem:[#allocation1 + $0x23] ss:$4 sm:$0xff] %v447_v44  ;;  %2192 = vadd.xlane.f32.xlu2 %v2191_v13  ;;  %2195 = vadd.xlane.f32.xlu1 %v2194_v14  ;;  %v189_v44 = vpop.xlane.xlu2 %188  ;;  %v2212_v13 = vsel %vm126_vm0, %v2148_v8, 0.0  ;;  %v2206_v14 = vsel %vm126_vm0, %v2146_v10, 0.0 }
  0xc4   :  { %2189 = vadd.xlane.f32.xlu0 %v2188_v15  ;;  %v579_v46 = vperm.slane %v189_v44, %v4568_v34  ;;  %v591_v58 = vperm.slane %v189_v44, %v4580_v39 }
  0xc6   :  { %v4750_v53 = vld.sshfl [vmem:[#allocation1] sm:$0xff pattern:$0x73625140] }
  0xc7   :  { %845 = vst [vmem:[#allocation1] ss:$4 sm:$0xff] %v483_v48  ;;  %v186_v48 = vpop.xlane.xlu1 %185 }
  0xc8   :  { %846 = vst [vmem:[#allocation1 + $0x1] ss:$4 sm:$0xff] %v487_v50  ;;  %v2145_v50 = vld [vmem:[%s6838_s2 + $0x68] sm:$0xff]  ;;  %v563_v61 = vperm.slane %v186_v48, %v4568_v34  ;;  %v575_v4 = vperm.slane %v186_v48, %v4580_v39 }
  0xc9   :  { %847 = vst [vmem:[#allocation1 + $0x2] ss:$4 sm:$0xff] %v491_v51  ;;  %v2143_v51 = vld [vmem:[%s6838_s2 + $0x58] sm:$0xff]  ;;  %v2203_v55 = vsel %vm126_vm0, %v2145_v50, 0.0 }
  0xca   :  { %v4765_v0 = vld.sshfl [vmem:[#allocation1 + $0x20] sm:$0xff pattern:$0x73625140]  ;;  %848 = vst [vmem:[#allocation1 + $0x3] ss:$4 sm:$0xff] %v495_v52  ;;  %v583_v52 = vperm.slane %v189_v44, %v4570_v35  ;;  %v2197_v56 = vsel %vm126_vm0, %v2143_v51, 0.0 }
  0xcb   :  { %839 = vst [vmem:[#allocation1 + $0x20] ss:$4 sm:$0xff] %v467_v57  ;;  %v587_v57 = vperm.slane %v189_v44, %v4572_v36  ;;  %2201 = vadd.xlane.f32.xlu2 %v2200_v54  ;;  %2204 = vadd.xlane.f32.xlu1 %v2203_v55 }
  0xcc   :  { %840 = vst [vmem:[#allocation1 + $0x21] ss:$4 sm:$0xff] %v471_v1  ;;  %2198 = vadd.xlane.f32.xlu0 %v2197_v56 }
  0xcd   :  { %841 = vst [vmem:[#allocation1 + $0x22] ss:$4 sm:$0xff] %v475_v2  ;;  %v567_v2 = vperm.slane %v186_v48, %v4570_v35 }
  0xce   :  { %842 = vst [vmem:[#allocation1 + $0x23] ss:$4 sm:$0xff] %v479_v3  ;;  %v571_v3 = vperm.slane %v186_v48, %v4572_v36 }
  0xcf   :  { %v195_v5 = vpop.xlane.xlu1 %194 }
  0xd0   :  { %v611_v15 = vperm.slane %v195_v5, %v4568_v34 }
  0xd1   :  { %v4780_v11 = vld.sshfl [vmem:[#allocation1] sm:$0xff pattern:$0x73625140] }
  0xd2   :  { %855 = vst [vmem:[#allocation1] ss:$4 sm:$0xff] %v515_v6  ;;  %v192_v6 = vpop.xlane.xlu0 %191 }
  0xd3   :  { %856 = vst [vmem:[#allocation1 + $0x1] ss:$4 sm:$0xff] %v519_v12  ;;  %v2209_v12 = vsel %vm126_vm0, %v2147_v7, 0.0  ;;  %2213 = vadd.xlane.f32.xlu1 %v2212_v13  ;;  %v599_v27 = vperm.slane %v192_v6, %v4570_v35 }
  0xd4   :  { %857 = vst [vmem:[#allocation1 + $0x2] ss:$4 sm:$0xff] %v523_v17  ;;  %2210 = vadd.xlane.f32.xlu2 %v2209_v12  ;;  %2207 = vadd.xlane.f32.xlu0 %v2206_v14 }
  0xd5   :  { %v4789_v22 = vld.sshfl [vmem:[#allocation1 + $0x20] sm:$0xff pattern:$0x73625140]  ;;  %858 = vst [vmem:[#allocation1 + $0x3] ss:$4 sm:$0xff] %v527_v19  ;;  %v615_v19 = vperm.slane %v195_v5, %v4570_v35 }
  0xd6   :  { %849 = vst [vmem:[#allocation1 + $0x20] ss:$4 sm:$0xff] %v499_v20  ;;  %v619_v20 = vperm.slane %v195_v5, %v4572_v36 }
  0xd7   :  { %850 = vst [vmem:[#allocation1 + $0x21] ss:$4 sm:$0xff] %v503_v23  ;;  %v198_v23 = vpop.xlane.xlu2 %197 }
  0xd8   :  { %851 = vst [vmem:[#allocation1 + $0x22] ss:$4 sm:$0xff] %v507_v24  ;;  %v623_v24 = vperm.slane %v195_v5, %v4580_v39  ;;  %v627_v50 = vperm.slane %v198_v23, %v4568_v34  ;;  %v631_v55 = vperm.slane %v198_v23, %v4570_v35 }
  0xd9   :  { %852 = vst [vmem:[#allocation1 + $0x23] ss:$4 sm:$0xff] %v511_v25  ;;  %v595_v25 = vperm.slane %v192_v6, %v4568_v34 }
  0xdc   :  { %v4795_v29 = vld.sshfl [vmem:[#allocation1] sm:$0xff pattern:$0x73625140] }
  0xdd   :  { %865 = vst [vmem:[#allocation1] ss:$4 sm:$0xff] %v547_v28  ;;  %v603_v28 = vperm.slane %v192_v6, %v4572_v36 }
  0xde   :  { %866 = vst [vmem:[#allocation1 + $0x1] ss:$4 sm:$0xff] %v551_v30  ;;  %v607_v30 = vperm.slane %v192_v6, %v4580_v39 }
  0xdf   :  { %867 = vst [vmem:[#allocation1 + $0x2] ss:$4 sm:$0xff] %v555_v33  ;;  %v2150_v33 = vld [vmem:[%s6838_s2 + $0x90] sm:$0xff]  ;;  %v207_v51 = vpop.xlane.xlu2 %206 }
  0xe0   :  { %v4804_v43 = vld.sshfl [vmem:[#allocation1 + $0x20] sm:$0xff pattern:$0x73625140]  ;;  %868 = vst [vmem:[#allocation1 + $0x3] ss:$4 sm:$0xff] %v559_v40  ;;  %v2149_v40 = vld [vmem:[%s6838_s2 + $0x88] sm:$0xff]  ;;  %v675_v8 = vperm.slane %v207_v51, %v4568_v34  ;;  %v679_v10 = vperm.slane %v207_v51, %v4570_v35  ;;  %v683_v12 = vperm.slane %v207_v51, %v4572_v36  ;;  %v687_v13 = vperm.slane %v207_v51, %v4580_v39 }
  0xe1   :  { %859 = vst [vmem:[#allocation1 + $0x20] ss:$4 sm:$0xff] %v531_v31  ;;  %v201_v31 = vpop.xlane.xlu0 %200  ;;  %v2215_v44 = vsel %vm126_vm0, %v2149_v40, 0.0 }
  0xe2   :  { %860 = vst [vmem:[#allocation1 + $0x21] ss:$4 sm:$0xff] %v535_v37  ;;  %v2151_v37 = vld [vmem:[%s6838_s2 + $0x98] sm:$0xff]  ;;  %v647_v49 = vperm.slane %v201_v31, %v4570_v35  ;;  %2216 = vadd.xlane.f32.xlu0 %v2215_v44  ;;  %v651_v54 = vperm.slane %v201_v31, %v4572_v36  ;;  %v655_v56 = vperm.slane %v201_v31, %v4580_v39 }
  0xe3   :  { %861 = vst [vmem:[#allocation1 + $0x22] ss:$4 sm:$0xff] %v539_v41  ;;  %v2218_v41 = vsel %vm126_vm0, %v2150_v33, 0.0 }
  0xe4   :  { %862 = vst [vmem:[#allocation1 + $0x23] ss:$4 sm:$0xff] %v543_v42  ;;  %v2221_v42 = vsel %vm126_vm0, %v2151_v37, 0.0  ;;  %2219 = vadd.xlane.f32.xlu2 %v2218_v41  ;;  %v2156_v41 = vld [vmem:[%s6838_s2 + $0xc0] sm:$0xff] }
  0xe5   :  { %2222 = vadd.xlane.f32.xlu1 %v2221_v42  ;;  %v2157_v42 = vld [vmem:[%s6838_s2 + $0xc8] sm:$0xff] }
  0xe7   :  { %v4822_v59 = vld.sshfl [vmem:[#allocation1] sm:$0xff pattern:$0x73625140] }
  0xe8   :  { %875 = vst [vmem:[#allocation1] ss:$4 sm:$0xff] %v579_v46  ;;  %v643_v46 = vperm.slane %v201_v31, %v4568_v34 }
  0xe9   :  { %876 = vst [vmem:[#allocation1 + $0x1] ss:$4 sm:$0xff] %v583_v52  ;;  %v204_v52 = vpop.xlane.xlu1 %203 }
  0xea   :  { %877 = vst [vmem:[#allocation1 + $0x2] ss:$4 sm:$0xff] %v587_v57  ;;  %v635_v57 = vperm.slane %v198_v23, %v4572_v36 }
  0xeb   :  { %v4825_v1 = vld.sshfl [vmem:[#allocation1 + $0x20] sm:$0xff pattern:$0x73625140]  ;;  %878 = vst [vmem:[#allocation1 + $0x3] ss:$4 sm:$0xff] %v591_v58  ;;  %v639_v58 = vperm.slane %v198_v23, %v4580_v39 }
  0xec   :  { %869 = vst [vmem:[#allocation1 + $0x20] ss:$4 sm:$0xff] %v563_v61 }
  0xed   :  { %870 = vst [vmem:[#allocation1 + $0x21] ss:$4 sm:$0xff] %v567_v2  ;;  %v2153_v2 = vld [vmem:[%s6838_s2 + $0xa8] sm:$0xff] }
  0xee   :  { %871 = vst [vmem:[#allocation1 + $0x22] ss:$4 sm:$0xff] %v571_v3  ;;  %v2154_v3 = vld [vmem:[%s6838_s2 + $0xb0] sm:$0xff]  ;;  %v2227_v5 = vsel %vm126_vm0, %v2153_v2, 0.0 }
  0xef   :  { %872 = vst [vmem:[#allocation1 + $0x23] ss:$4 sm:$0xff] %v575_v4  ;;  %v2152_v4 = vld [vmem:[%s6838_s2 + $0xa0] sm:$0xff]  ;;  %v2230_v6 = vsel %vm126_vm0, %v2154_v3, 0.0  ;;  %2228 = vadd.xlane.f32.xlu2 %v2227_v5  ;;  %v2159_v3 = vld [vmem:[%s6838_s2 + $0xd8] sm:$0xff]  ;;  %v2158_v5 = vld [vmem:[%s6838_s2 + $0xd0] sm:$0xff] }
  0xf0   :  { %v2224_v7 = vsel %vm126_vm0, %v2152_v4, 0.0  ;;  %2231 = vadd.xlane.f32.xlu1 %v2230_v6  ;;  %v2160_v4 = vld [vmem:[%s6838_s2 + $0xe0] sm:$0xff] }
  0xf1   :  { %2225 = vadd.xlane.f32.xlu0 %v2224_v7 }
  0xf2   :  { %v4843_v17 = vld.sshfl [vmem:[#allocation1] sm:$0xff pattern:$0x73625140] }
  0xf3   :  { %885 = vst [vmem:[#allocation1] ss:$4 sm:$0xff] %v611_v15  ;;  %v4896_v15 = vpop.xlane.xlu2 %215 }
  0xf4   :  { %886 = vst [vmem:[#allocation1 + $0x1] ss:$4 sm:$0xff] %v615_v19  ;;  %v213_v19 = vpop.xlane.xlu1 %212 }
  0xf5   :  { %887 = vst [vmem:[#allocation1 + $0x2] ss:$4 sm:$0xff] %v619_v20  ;;  %v659_v20 = vperm.slane %v204_v52, %v4568_v34  ;;  %v711_v40 = vperm.slane %v213_v19, %v4570_v35  ;;  %v715_v44 = vperm.slane %v213_v19, %v4572_v36  ;;  %v719_v51 = vperm.slane %v213_v19, %v4580_v39 }
  0xf6   :  { %v4849_v26 = vld.sshfl [vmem:[#allocation1 + $0x20] sm:$0xff pattern:$0x73625140]  ;;  %888 = vst [vmem:[#allocation1 + $0x3] ss:$4 sm:$0xff] %v623_v24  ;;  %v663_v24 = vperm.slane %v204_v52, %v4570_v35 }
  0xf7   :  { %6869 = vst [vmem:[#allocation6_spill] sm:$0xff] %v4849_v26 }
  0xf8   :  { %879 = vst [vmem:[#allocation1 + $0x20] ss:$4 sm:$0xff] %v595_v25  ;;  %v667_v25 = vperm.slane %v204_v52, %v4572_v36 }
  0xf9   :  { %880 = vst [vmem:[#allocation1 + $0x21] ss:$4 sm:$0xff] %v599_v27  ;;  %v210_v27 = vpop.xlane.xlu0 %209 }
  0xfa   :  { %881 = vst [vmem:[#allocation1 + $0x22] ss:$4 sm:$0xff] %v603_v28  ;;  %v671_v28 = vperm.slane %v204_v52, %v4580_v39  ;;  %v703_v2 = vperm.slane %v210_v27, %v4580_v39 }
  0xfb   :  { %882 = vst [vmem:[#allocation1 + $0x23] ss:$4 sm:$0xff] %v607_v30  ;;  %v707_v30 = vperm.slane %v213_v19, %v4568_v34  ;;  %v4905_v31 = vpop.xlane.xlu2 %1166 }
  0xfc   :  { %v4907_v33 = vpop.xlane.xlu1 %221 }
  0xfd   :  { %v4867_v48 = vld.sshfl [vmem:[#allocation1] sm:$0xff pattern:$0x73625140] }
  0xfe   :  { %6870 = vst [vmem:[#allocation7_spill] sm:$0xff] %v4867_v48 }
  0xff   :  { %895 = vst [vmem:[#allocation1] ss:$4 sm:$0xff] %v643_v46  ;;  %v2236_v46 = vsel %vm126_vm0, %v2156_v41, 0.0  ;;  %v735_v41 = vperm.slane %v4896_v15, %v4580_v39 }
 0x100   :  { %896 = vst [vmem:[#allocation1 + $0x1] ss:$4 sm:$0xff] %v647_v49  ;;  %v2239_v49 = vsel %vm126_vm0, %v2157_v42, 0.0  ;;  %2237 = vadd.xlane.f32.xlu2 %v2236_v46 }
 0x101   :  { %897 = vst [vmem:[#allocation1 + $0x2] ss:$4 sm:$0xff] %v651_v54  ;;  %2240 = vadd.xlane.f32.xlu1 %v2239_v49  ;;  %v691_v54 = vperm.slane %v210_v27, %v4568_v34 }
 0x102   :  { %v4876_v61 = vld.sshfl [vmem:[#allocation1 + $0x20] sm:$0xff pattern:$0x73625140]  ;;  %898 = vst [vmem:[#allocation1 + $0x3] ss:$4 sm:$0xff] %v655_v56  ;;  %v695_v56 = vperm.slane %v210_v27, %v4570_v35 }
 0x103   :  { %889 = vst [vmem:[#allocation1 + $0x20] ss:$4 sm:$0xff] %v627_v50  ;;  %v2155_v50 = vld [vmem:[%s6838_s2 + $0xb8] sm:$0xff]  ;;  %v4941_v6 = vpop.xlane.xlu2 %1172 }
 0x104   :  { %890 = vst [vmem:[#allocation1 + $0x21] ss:$4 sm:$0xff] %v631_v55  ;;  %v2233_v52 = vsel %vm126_vm0, %v2155_v50, 0.0  ;;  %v4943_v7 = vpop.xlane.xlu1 %1169 }
 0x105   :  { %891 = vst [vmem:[#allocation1 + $0x22] ss:$4 sm:$0xff] %v635_v57  ;;  %2234 = vadd.xlane.f32.xlu0 %v2233_v52  ;;  %v219_v57 = vpop.xlane.xlu0 %218 }
 0x106   :  { %892 = vst [vmem:[#allocation1 + $0x23] ss:$4 sm:$0xff] %v639_v58  ;;  %v699_v58 = vperm.slane %v210_v27, %v4572_v36  ;;  %v727_v27 = vperm.slane %v4896_v15, %v4570_v35 }
 0x109   :  { %v4894_v14 = vld.sshfl [vmem:[#allocation1] sm:$0xff pattern:$0x73625140] }
 0x10a   :  { %905 = vst [vmem:[#allocation1] ss:$4 sm:$0xff] %v675_v8  ;;  %v2245_v8 = vsel %vm126_vm0, %v2159_v3, 0.0 }
 0x10b   :  { %906 = vst [vmem:[#allocation1 + $0x1] ss:$4 sm:$0xff] %v679_v10  ;;  %v2248_v10 = vsel %vm126_vm0, %v2160_v4, 0.0  ;;  %2246 = vadd.xlane.f32.xlu2 %v2245_v8  ;;  %v759_v4 = vperm.slane %v4907_v33, %v4570_v35 }
 0x10c   :  { %907 = vst [vmem:[#allocation1 + $0x2] ss:$4 sm:$0xff] %v683_v12  ;;  %v2242_v12 = vsel %vm126_vm0, %v2158_v5, 0.0  ;;  %2249 = vadd.xlane.f32.xlu1 %v2248_v10  ;;  %v4966_v46 = vpop.xlane.xlu1 %1178  ;;  %v763_v5 = vperm.slane %v4907_v33, %v4572_v36 }
 0x10d   :  { %v4899_v23 = vld.sshfl [vmem:[#allocation1 + $0x20] sm:$0xff pattern:$0x73625140]  ;;  %908 = vst [vmem:[#allocation1 + $0x3] ss:$4 sm:$0xff] %v687_v13  ;;  %v739_v13 = vperm.slane %v219_v57, %v4568_v34  ;;  %2243 = vadd.xlane.f32.xlu0 %v2242_v12 }
 0x10e   :  { %899 = vst [vmem:[#allocation1 + $0x20] ss:$4 sm:$0xff] %v659_v20  ;;  %v743_v20 = vperm.slane %v219_v57, %v4570_v35 }
 0x10f   :  { %900 = vst [vmem:[#allocation1 + $0x21] ss:$4 sm:$0xff] %v663_v24  ;;  %v723_v24 = vperm.slane %v4896_v15, %v4568_v34 }
 0x110   :  { %901 = vst [vmem:[#allocation1 + $0x22] ss:$4 sm:$0xff] %v667_v25  ;;  %v747_v25 = vperm.slane %v219_v57, %v4572_v36 }
 0x111   :  { %902 = vst [vmem:[#allocation1 + $0x23] ss:$4 sm:$0xff] %v671_v28  ;;  %v751_v28 = vperm.slane %v219_v57, %v4580_v39  ;;  %v2162_v57 = vld [vmem:[%s6838_s2 + $0xf0] sm:$0xff] }
 0x112   :  { %v2254_v8 = vsel %vm126_vm0, %v2162_v57, 0.0  ;;  %v1338_v57 = vperm.slane %v4943_v7, %v4580_v39 }
 0x113   :  { %2255 = vadd.xlane.f32.xlu2 %v2254_v8 }
 0x114   :  { %v4909_v37 = vld.sshfl [vmem:[#allocation1] sm:$0xff pattern:$0x73625140] }
 0x115   :  { %6871 = vst [vmem:[#allocation8_spill] sm:$0xff] %v4909_v37 }
 0x116   :  { %915 = vst [vmem:[#allocation1] ss:$4 sm:$0xff] %v707_v30  ;;  %v731_v30 = vperm.slane %v4896_v15, %v4572_v36 }
 0x117   :  { %916 = vst [vmem:[#allocation1 + $0x1] ss:$4 sm:$0xff] %v711_v40  ;;  %v1164_v40 = vpop.xlane.xlu0 %1163 }
 0x118   :  { %917 = vst [vmem:[#allocation1 + $0x2] ss:$4 sm:$0xff] %v715_v44  ;;  %v4927_v55 = vld.sshfl [vmem:[#allocation1 + $0x20] sm:$0xff pattern:$0x73625140]  ;;  %v4964_v44 = vpop.xlane.xlu2 %1181  ;;  %v1294_v49 = vperm.slane %v1164_v40, %v4568_v34  ;;  %v1302_v52 = vperm.slane %v1164_v40, %v4572_v36  ;;  %v1306_v15 = vperm.slane %v1164_v40, %v4580_v39 }
 0x119   :  { %6872 = vst [vmem:[#allocation9_spill] sm:$0xff] %v4927_v55 }
 0x11a   :  { %918 = vst [vmem:[#allocation1 + $0x3] ss:$4 sm:$0xff] %v719_v51  ;;  %v1298_v51 = vperm.slane %v1164_v40, %v4570_v35  ;;  %v1310_v40 = vperm.slane %v4905_v31, %v4568_v34 }
 0x11b   :  { %909 = vst [vmem:[#allocation1 + $0x20] ss:$4 sm:$0xff] %v691_v54 }
 0x11c   :  { %910 = vst [vmem:[#allocation1 + $0x21] ss:$4 sm:$0xff] %v695_v56  ;;  %v755_v56 = vperm.slane %v4907_v33, %v4568_v34 }
 0x11d   :  { %911 = vst [vmem:[#allocation1 + $0x22] ss:$4 sm:$0xff] %v699_v58  ;;  %v2163_v58 = vld [vmem:[%s6838_s2 + $0xf8] sm:$0xff] }
 0x11e   :  { %912 = vst [vmem:[#allocation1 + $0x23] ss:$4 sm:$0xff] %v703_v2  ;;  %v2161_v2 = vld [vmem:[%s6838_s2 + $0xe8] sm:$0xff]  ;;  %v2257_v10 = vsel %vm126_vm0, %v2163_v58, 0.0 }
 0x11f   :  { %v4974_v54 = vpop.xlane.xlu0 %1175  ;;  %v2251_v12 = vsel %vm126_vm0, %v2161_v2, 0.0  ;;  %2258 = vadd.xlane.f32.xlu1 %v2257_v10  ;;  %v1318_v2 = vperm.slane %v4905_v31, %v4572_v36 }
 0x120   :  { %2252 = vadd.xlane.f32.xlu0 %v2251_v12  ;;  %v1358_v10 = vperm.slane %v4974_v54, %v4568_v34 }
 0x121   :  { %v4949_v19 = vld.sshfl [vmem:[#allocation1] sm:$0xff pattern:$0x73625140] }
 0x122   :  { %6873 = vst [vmem:[#allocation10_spill] sm:$0xff] %v4949_v19 }
 0x123   :  { %925 = vst [vmem:[#allocation1] ss:$4 sm:$0xff] %v739_v13  ;;  %v767_v13 = vperm.slane %v4907_v33, %v4580_v39  ;;  %v3136_v33 = vld [vmem:[%s6839_s3 + $0x10] sm:$0xff] }
 0x124   :  { %926 = vst [vmem:[#allocation1 + $0x1] ss:$4 sm:$0xff] %v743_v20  ;;  %v4998_v20 = vpop.xlane.xlu2 %1190 }
 0x125   :  { %927 = vst [vmem:[#allocation1 + $0x2] ss:$4 sm:$0xff] %v747_v25  ;;  %v4962_v42 = vld.sshfl [vmem:[#allocation1 + $0x20] sm:$0xff pattern:$0x73625140]  ;;  %v1326_v25 = vperm.slane %v4943_v7, %v4568_v34 }
 0x126   :  { %928 = vst [vmem:[#allocation1 + $0x3] ss:$4 sm:$0xff] %v751_v28 }
 0x127   :  { %919 = vst [vmem:[#allocation1 + $0x20] ss:$4 sm:$0xff] %v723_v24  ;;  %v5000_v24 = vpop.xlane.xlu1 %1187 }
 0x128   :  { %920 = vst [vmem:[#allocation1 + $0x21] ss:$4 sm:$0xff] %v727_v27  ;;  %v1330_v27 = vperm.slane %v4943_v7, %v4570_v35 }
 0x129   :  { %921 = vst [vmem:[#allocation1 + $0x22] ss:$4 sm:$0xff] %v731_v30  ;;  %v3135_v30 = vld [vmem:[%s6839_s3 + $0x8] sm:$0xff] }
 0x12a   :  { %922 = vst [vmem:[#allocation1 + $0x23] ss:$4 sm:$0xff] %v735_v41  ;;  %v1334_v41 = vperm.slane %v4943_v7, %v4572_v36 }
 0x12c   :  { %v5036_v8 = vpop.xlane.xlu2 %1199 }
 0x12d   :  { %v4969_v50 = vld.sshfl [vmem:[#allocation1] sm:$0xff pattern:$0x73625140] }
 0x12e   :  { %1803 = vst [vmem:[#allocation1] ss:$4 sm:$0xff] %v1294_v49  ;;  %v5018_v49 = vpop.xlane.xlu0 %1184 }
 0x12f   :  { %1805 = vst [vmem:[#allocation1 + $0x1] ss:$4 sm:$0xff] %v1298_v51  ;;  %v3172_v51 = vsel %vm126_vm0, %v3136_v33, 0.0  ;;  %v5038_v7 = vpop.xlane.xlu1 %1196  ;;  %v1346_v33 = vperm.slane %v4941_v6, %v4570_v35 }
 0x130   :  { %1807 = vst [vmem:[#allocation1 + $0x2] ss:$4 sm:$0xff] %v1302_v52  ;;  %v3169_v52 = vsel %vm126_vm0, %v3135_v30, 0.0  ;;  %3173 = vadd.xlane.f32.xlu2 %v3172_v51  ;;  %v1370_v30 = vperm.slane %v4974_v54, %v4580_v39  ;;  %v1354_v51 = vperm.slane %v4941_v6, %v4580_v39 }
 0x131   :  { %v4987_v3 = vld.sshfl [vmem:[#allocation1 + $0x20] sm:$0xff pattern:$0x73625140]  ;;  %1809 = vst [vmem:[#allocation1 + $0x3] ss:$4 sm:$0xff] %v1306_v15  ;;  %3170 = vadd.xlane.f32.xlu1 %v3169_v52 }
 0x132   :  { %6874 = vst [vmem:[#allocation11_spill] sm:$0xff] %v4987_v3  ;;  %v3134_v15 = vld [vmem:[%s6839_s3] sm:$0xff] }
 0x133   :  { %929 = vst [vmem:[#allocation1 + $0x20] ss:$4 sm:$0xff] %v755_v56  ;;  %v1314_v56 = vperm.slane %v4905_v31, %v4570_v35  ;;  %v3166_v58 = vsel %vm126_vm0, %v3134_v15, 0.0 }
 0x134   :  { %930 = vst [vmem:[#allocation1 + $0x21] ss:$4 sm:$0xff] %v759_v4  ;;  %v1322_v4 = vperm.slane %v4905_v31, %v4580_v39  ;;  %3167 = vadd.xlane.f32.xlu0 %v3166_v58  ;;  %v1362_v31 = vperm.slane %v4974_v54, %v4570_v35  ;;  %v5062_v52 = vpop.xlane.xlu2 %1208 }
 0x135   :  { %931 = vst [vmem:[#allocation1 + $0x22] ss:$4 sm:$0xff] %v763_v5 }
 0x136   :  { %932 = vst [vmem:[#allocation1 + $0x23] ss:$4 sm:$0xff] %v767_v13  ;;  %v5046_v13 = vpop.xlane.xlu0 %1193 }
 0x137   :  { %v5064_v15 = vpop.xlane.xlu1 %1205 }
 0x138   :  { %v5006_v28 = vld.sshfl [vmem:[#allocation1] sm:$0xff pattern:$0x73625140] }
 0x139   :  { %6875 = vst [vmem:[#allocation12_spill] sm:$0xff] %v5006_v28  ;;  %v1466_v28 = vperm.slane %v5046_v13, %v4580_v39 }
 0x13a   :  { %1820 = vst [vmem:[#allocation1] ss:$4 sm:$0xff] %v1326_v25  ;;  %v1342_v25 = vperm.slane %v4941_v6, %v4568_v34 }
 0x13b   :  { %1821 = vst [vmem:[#allocation1 + $0x1] ss:$4 sm:$0xff] %v1330_v27  ;;  %v1366_v27 = vperm.slane %v4974_v54, %v4572_v36  ;;  %v3139_v54 = vld [vmem:[%s6839_s3 + $0x28] sm:$0xff] }
 0x13c   :  { %1822 = vst [vmem:[#allocation1 + $0x2] ss:$4 sm:$0xff] %v1334_v41  ;;  %v3181_v58 = vsel %vm126_vm0, %v3139_v54, 0.0 }
 0x13d   :  { %v5034_v5 = vld.sshfl [vmem:[#allocation1 + $0x20] sm:$0xff pattern:$0x73625140]  ;;  %1823 = vst [vmem:[#allocation1 + $0x3] ss:$4 sm:$0xff] %v1338_v57  ;;  %v3137_v57 = vld [vmem:[%s6839_s3 + $0x18] sm:$0xff]  ;;  %3182 = vadd.xlane.f32.xlu2 %v3181_v58 }
 0x13e   :  { %6876 = vst [vmem:[#allocation13_spill] sm:$0xff] %v5034_v5 }
 0x13f   :  { %1811 = vst [vmem:[#allocation1 + $0x20] ss:$4 sm:$0xff] %v1310_v40  ;;  %v1350_v40 = vperm.slane %v4941_v6, %v4572_v36  ;;  %v1390_v6 = vperm.slane %v4964_v44, %v4568_v34 }
 0x140   :  { %1813 = vst [vmem:[#allocation1 + $0x21] ss:$4 sm:$0xff] %v1314_v56  ;;  %v3138_v56 = vld [vmem:[%s6839_s3 + $0x20] sm:$0xff] }
 0x141   :  { %1815 = vst [vmem:[#allocation1 + $0x22] ss:$4 sm:$0xff] %v1318_v2  ;;  %v3178_v2 = vsel %vm126_vm0, %v3138_v56, 0.0  ;;  %v1378_v56 = vperm.slane %v4966_v46, %v4570_v35 }
 0x142   :  { %1817 = vst [vmem:[#allocation1 + $0x23] ss:$4 sm:$0xff] %v1322_v4  ;;  %v3175_v4 = vsel %vm126_vm0, %v3137_v57, 0.0  ;;  %3179 = vadd.xlane.f32.xlu1 %v3178_v2  ;;  %v5105_v57 = vpop.xlane.xlu2 %1217  ;;  %v1382_v2 = vperm.slane %v4966_v46, %v4572_v36 }
 0x143   :  { %3176 = vadd.xlane.f32.xlu0 %v3175_v4 }
 0x144   :  { %v5042_v12 = vld.sshfl [vmem:[#allocation1] sm:$0xff pattern:$0x73625140] }
 0x145   :  { %6877 = vst [vmem:[#allocation14_spill] sm:$0xff] %v5042_v12 }
 0x146   :  { %1830 = vst [vmem:[#allocation1] ss:$4 sm:$0xff] %v1358_v10  ;;  %v1394_v10 = vperm.slane %v4964_v44, %v4570_v35 }
 0x147   :  { %1831 = vst [vmem:[#allocation1 + $0x1] ss:$4 sm:$0xff] %v1362_v31  ;;  %v1398_v31 = vperm.slane %v4964_v44, %v4572_v36 }
 0x148   :  { %1832 = vst [vmem:[#allocation1 + $0x2] ss:$4 sm:$0xff] %v1366_v27  ;;  %v1402_v27 = vperm.slane %v4964_v44, %v4580_v39  ;;  %v3140_v44 = vld [vmem:[%s6839_s3 + $0x30] sm:$0xff] }
 0x149   :  { %v5058_v41 = vld.sshfl [vmem:[#allocation1 + $0x20] sm:$0xff pattern:$0x73625140]  ;;  %1833 = vst [vmem:[#allocation1 + $0x3] ss:$4 sm:$0xff] %v1370_v30  ;;  %v1374_v30 = vperm.slane %v4966_v46, %v4568_v34 }
 0x14a   :  { %1824 = vst [vmem:[#allocation1 + $0x20] ss:$4 sm:$0xff] %v1342_v25  ;;  %v5084_v25 = vpop.xlane.xlu0 %1202 }
 0x14b   :  { %1825 = vst [vmem:[#allocation1 + $0x21] ss:$4 sm:$0xff] %v1346_v33  ;;  %v1506_v3 = vperm.slane %v5084_v25, %v4570_v35 }
 0x14c   :  { %1826 = vst [vmem:[#allocation1 + $0x22] ss:$4 sm:$0xff] %v1350_v40  ;;  %v3142_v40 = vld [vmem:[%s6839_s3 + $0x40] sm:$0xff] }
 0x14d   :  { %1827 = vst [vmem:[#allocation1 + $0x23] ss:$4 sm:$0xff] %v1354_v51  ;;  %v3141_v51 = vld [vmem:[%s6839_s3 + $0x38] sm:$0xff]  ;;  %v3190_v58 = vsel %vm126_vm0, %v3142_v40, 0.0  ;;  %v1422_v40 = vperm.slane %v5000_v24, %v4568_v34 }
 0x14e   :  { %v3187_v4 = vsel %vm126_vm0, %v3141_v51, 0.0  ;;  %3191 = vadd.xlane.f32.xlu2 %v3190_v58  ;;  %v1430_v51 = vperm.slane %v5000_v24, %v4572_v36 }
 0x14f   :  { %3188 = vadd.xlane.f32.xlu1 %v3187_v4  ;;  %v1410_v4 = vperm.slane %v5018_v49, %v4570_v35 }
 0x150   :  { %v5088_v33 = vld.sshfl [vmem:[#allocation1] sm:$0xff pattern:$0x73625140] }
 0x151   :  { %6878 = vst [vmem:[#allocation15_spill] sm:$0xff] %v5088_v33 }
 0x152   :  { %1840 = vst [vmem:[#allocation1] ss:$4 sm:$0xff] %v1390_v6  ;;  %v5107_v6 = vpop.xlane.xlu1 %1214 }
 0x153   :  { %1841 = vst [vmem:[#allocation1 + $0x1] ss:$4 sm:$0xff] %v1394_v10  ;;  %v3184_v10 = vsel %vm126_vm0, %v3140_v44, 0.0  ;;  %v1406_v44 = vperm.slane %v5018_v49, %v4568_v34 }
 0x154   :  { %1842 = vst [vmem:[#allocation1 + $0x2] ss:$4 sm:$0xff] %v1398_v31  ;;  %v5101_v54 = vld.sshfl [vmem:[#allocation1 + $0x20] sm:$0xff pattern:$0x73625140]  ;;  %v1386_v31 = vperm.slane %v4966_v46, %v4580_v39  ;;  %3185 = vadd.xlane.f32.xlu0 %v3184_v10  ;;  %v1434_v46 = vperm.slane %v5000_v24, %v4580_v39  ;;  %v1414_v10 = vperm.slane %v5018_v49, %v4572_v36 }
 0x155   :  { %6879 = vst [vmem:[#allocation16_spill] sm:$0xff] %v5101_v54 }
 0x156   :  { %1843 = vst [vmem:[#allocation1 + $0x3] ss:$4 sm:$0xff] %v1402_v27  ;;  %v5116_v27 = vpop.xlane.xlu0 %1211 }
 0x157   :  { %1834 = vst [vmem:[#allocation1 + $0x20] ss:$4 sm:$0xff] %v1374_v30  ;;  %v1426_v30 = vperm.slane %v5000_v24, %v4570_v35  ;;  %v1418_v24 = vperm.slane %v5018_v49, %v4580_v39  ;;  %v1454_v49 = vperm.slane %v5046_v13, %v4568_v34 }
 0x158   :  { %1835 = vst [vmem:[#allocation1 + $0x21] ss:$4 sm:$0xff] %v1378_v56  ;;  %v5130_v56 = vpop.xlane.xlu2 %1226 }
 0x159   :  { %1836 = vst [vmem:[#allocation1 + $0x22] ss:$4 sm:$0xff] %v1382_v2 }
 0x15a   :  { %1837 = vst [vmem:[#allocation1 + $0x23] ss:$4 sm:$0xff] %v1386_v31  ;;  %v5132_v58 = vpop.xlane.xlu1 %1223 }
 0x15d   :  { %v5120_v54 = vld.sshfl [vmem:[#allocation1] sm:$0xff pattern:$0x73625140] }
 0x15e   :  { %6880 = vst [vmem:[#allocation17_spill] sm:$0xff] %v5120_v54  ;;  %v5142_v31 = vpop.xlane.xlu0 %1220  ;;  %v1462_v54 = vperm.slane %v5046_v13, %v4572_v36 }
 0x15f   :  { %1850 = vst [vmem:[#allocation1] ss:$4 sm:$0xff] %v1422_v40  ;;  %v3145_v40 = vld [vmem:[%s6839_s3 + $0x58] sm:$0xff] }
 0x160   :  { %1851 = vst [vmem:[#allocation1 + $0x1] ss:$4 sm:$0xff] %v1426_v30  ;;  %v3144_v30 = vld [vmem:[%s6839_s3 + $0x50] sm:$0xff]  ;;  %v5166_v5 = vpop.xlane.xlu2 %1235 }
 0x161   :  { %1852 = vst [vmem:[#allocation1 + $0x2] ss:$4 sm:$0xff] %v1430_v51  ;;  %v5134_v2 = vld.sshfl [vmem:[#allocation1 + $0x20] sm:$0xff pattern:$0x73625140]  ;;  %v3143_v51 = vld [vmem:[%s6839_s3 + $0x48] sm:$0xff] }
 0x162   :  { %1853 = vst [vmem:[#allocation1 + $0x3] ss:$4 sm:$0xff] %v1434_v46  ;;  %v5168_v33 = vpop.xlane.xlu1 %1232 }
 0x163   :  { %1844 = vst [vmem:[#allocation1 + $0x20] ss:$4 sm:$0xff] %v1406_v44  ;;  %v1458_v44 = vperm.slane %v5046_v13, %v4570_v35  ;;  %v1450_v13 = vperm.slane %v4998_v20, %v4580_v39 }
 0x164   :  { %1845 = vst [vmem:[#allocation1 + $0x21] ss:$4 sm:$0xff] %v1410_v4  ;;  %v3199_v4 = vsel %vm126_vm0, %v3145_v40, 0.0  ;;  %v1438_v40 = vperm.slane %v4998_v20, %v4568_v34 }
 0x165   :  { %1846 = vst [vmem:[#allocation1 + $0x22] ss:$4 sm:$0xff] %v1414_v10  ;;  %v3196_v10 = vsel %vm126_vm0, %v3144_v30, 0.0  ;;  %3200 = vadd.xlane.f32.xlu2 %v3199_v4  ;;  %v1442_v30 = vperm.slane %v4998_v20, %v4570_v35 }
 0x166   :  { %1847 = vst [vmem:[#allocation1 + $0x23] ss:$4 sm:$0xff] %v1418_v24  ;;  %v3193_v24 = vsel %vm126_vm0, %v3143_v51, 0.0  ;;  %3197 = vadd.xlane.f32.xlu1 %v3196_v10  ;;  %v5189_v4 = vpop.xlane.xlu0 %1229 }
 0x167   :  { %3194 = vadd.xlane.f32.xlu0 %v3193_v24 }
 0x169   :  { %v5155_v46 = vld.sshfl [vmem:[#allocation1] sm:$0xff pattern:$0x73625140] }
 0x16a   :  { %1860 = vst [vmem:[#allocation1] ss:$4 sm:$0xff] %v1454_v49  ;;  %v1446_v49 = vperm.slane %v4998_v20, %v4572_v36 }
 0x16b   :  { %1861 = vst [vmem:[#allocation1 + $0x1] ss:$4 sm:$0xff] %v1458_v44  ;;  %v3154_v44 = vld [vmem:[%s6839_s3 + $0xa0] sm:$0xff] }
 0x16c   :  { %1862 = vst [vmem:[#allocation1 + $0x2] ss:$4 sm:$0xff] %v1462_v54  ;;  %v3147_v54 = vld [vmem:[%s6839_s3 + $0x68] sm:$0xff]  ;;  %v3226_v10 = vsel %vm126_vm0, %v3154_v44, 0.0  ;;  %v5202_v44 = vpop.xlane.xlu2 %1244 }
 0x16d   :  { %v5174_v51 = vld.sshfl [vmem:[#allocation1 + $0x20] sm:$0xff pattern:$0x73625140]  ;;  %1863 = vst [vmem:[#allocation1 + $0x3] ss:$4 sm:$0xff] %v1466_v28  ;;  %v3205_v20 = vsel %vm126_vm0, %v3147_v54, 0.0  ;;  %3227 = vadd.xlane.f32.xlu2 %v3226_v10  ;;  %v5204_v54 = vpop.xlane.xlu1 %1241 }
 0x16e   :  { %6881 = vst [vmem:[#allocation18_spill] sm:$0xff] %v5174_v51  ;;  %v3146_v28 = vld [vmem:[%s6839_s3 + $0x60] sm:$0xff]  ;;  %3206 = vadd.xlane.f32.xlu1 %v3205_v20  ;;  %v1474_v20 = vperm.slane %v5038_v7, %v4570_v35 }
 0x16f   :  { %1854 = vst [vmem:[#allocation1 + $0x20] ss:$4 sm:$0xff] %v1438_v40  ;;  %v3202_v24 = vsel %vm126_vm0, %v3146_v28, 0.0  ;;  %v1486_v40 = vperm.slane %v5036_v8, %v4568_v34  ;;  %v1470_v28 = vperm.slane %v5038_v7, %v4568_v34 }
 0x170   :  { %1855 = vst [vmem:[#allocation1 + $0x21] ss:$4 sm:$0xff] %v1442_v30  ;;  %3203 = vadd.xlane.f32.xlu0 %v3202_v24  ;;  %v1490_v30 = vperm.slane %v5036_v8, %v4570_v35  ;;  %v1478_v24 = vperm.slane %v5038_v7, %v4572_v36 }
 0x171   :  { %1856 = vst [vmem:[#allocation1 + $0x22] ss:$4 sm:$0xff] %v1446_v49  ;;  %v1494_v49 = vperm.slane %v5036_v8, %v4572_v36 }
 0x172   :  { %1857 = vst [vmem:[#allocation1 + $0x23] ss:$4 sm:$0xff] %v1450_v13  ;;  %v1498_v13 = vperm.slane %v5036_v8, %v4580_v39  ;;  %v5218_v8 = vpop.xlane.xlu0 %1238 }
 0x174   :  { %v5198_v51 = vld.sshfl [vmem:[#allocation1] sm:$0xff pattern:$0x73625140] }
 0x175   :  { %6882 = vst [vmem:[#allocation19_spill] sm:$0xff] %v5198_v51  ;;  %v5228_v51 = vpop.xlane.xlu1 %1250 }
 0x176   :  { %1870 = vst [vmem:[#allocation1] ss:$4 sm:$0xff] %v1486_v40  ;;  %v1482_v40 = vperm.slane %v5038_v7, %v4580_v39  ;;  %v1526_v7 = vperm.slane %v5064_v15, %v4572_v36 }
 0x177   :  { %1871 = vst [vmem:[#allocation1 + $0x1] ss:$4 sm:$0xff] %v1490_v30  ;;  %v1518_v30 = vperm.slane %v5064_v15, %v4568_v34 }
 0x178   :  { %1872 = vst [vmem:[#allocation1 + $0x2] ss:$4 sm:$0xff] %v1494_v49 }
 0x179   :  { %v5210_v10 = vld.sshfl [vmem:[#allocation1 + $0x20] sm:$0xff pattern:$0x73625140]  ;;  %1873 = vst [vmem:[#allocation1 + $0x3] ss:$4 sm:$0xff] %v1498_v13  ;;  %v1522_v13 = vperm.slane %v5064_v15, %v4570_v35 }
 0x17a   :  { %6883 = vst [vmem:[#allocation20_spill] sm:$0xff] %v5210_v10  ;;  %v5226_v10 = vpop.xlane.xlu2 %1253 }
 0x17b   :  { %1864 = vst [vmem:[#allocation1 + $0x20] ss:$4 sm:$0xff] %v1470_v28  ;;  %v3165_v28 = vld [vmem:[%s6839_s3 + $0xf8] sm:$0xff] }
 0x17c   :  { %1865 = vst [vmem:[#allocation1 + $0x21] ss:$4 sm:$0xff] %v1474_v20  ;;  %v3149_v20 = vld [vmem:[%s6839_s3 + $0x78] sm:$0xff] }
 0x17d   :  { %1866 = vst [vmem:[#allocation1 + $0x22] ss:$4 sm:$0xff] %v1478_v24  ;;  %v3148_v24 = vld [vmem:[%s6839_s3 + $0x70] sm:$0xff]  ;;  %v3211_v19 = vsel %vm126_vm0, %v3149_v20, 0.0 }
 0x17e   :  { %1867 = vst [vmem:[#allocation1 + $0x23] ss:$4 sm:$0xff] %v1482_v40  ;;  %v1530_v40 = vperm.slane %v5064_v15, %v4580_v39  ;;  %v3208_v12 = vsel %vm126_vm0, %v3148_v24, 0.0  ;;  %3212 = vadd.xlane.f32.xlu1 %v3211_v19  ;;  %v1510_v15 = vperm.slane %v5084_v25, %v4572_v36  ;;  %v3150_v19 = vld [vmem:[%s6839_s3 + $0x80] sm:$0xff]  ;;  %v1554_v24 = vperm.slane %v5116_v27, %v4570_v35 }
 0x17f   :  { %3209 = vadd.xlane.f32.xlu0 %v3208_v12  ;;  %v5268_v12 = vpop.xlane.xlu1 %2168 }
 0x180   :  { %v5222_v49 = vld.sshfl [vmem:[#allocation1] sm:$0xff pattern:$0x73625140] }
 0x181   :  { %6884 = vst [vmem:[#allocation21_spill] sm:$0xff] %v5222_v49  ;;  %v3259_v49 = vsel %vm126_vm0, %v3165_v28, 0.0  ;;  %v3151_v28 = vld [vmem:[%s6839_s3 + $0x88] sm:$0xff] }
 0x182   :  { %1880 = vst [vmem:[#allocation1] ss:$4 sm:$0xff] %v1518_v30  ;;  %v1502_v30 = vperm.slane %v5084_v25, %v4568_v34  ;;  %3260 = vadd.xlane.f32.xlu2 %v3259_v49  ;;  %v1550_v49 = vperm.slane %v5116_v27, %v4568_v34  ;;  %v5266_v20 = vpop.xlane.xlu2 %2165 }
 0x183   :  { %1881 = vst [vmem:[#allocation1 + $0x1] ss:$4 sm:$0xff] %v1522_v13  ;;  %v5254_v13 = vpop.xlane.xlu0 %1247 }
 0x184   :  { %1882 = vst [vmem:[#allocation1 + $0x2] ss:$4 sm:$0xff] %v1526_v7  ;;  %v1514_v7 = vperm.slane %v5084_v25, %v4580_v39  ;;  %v3217_v25 = vsel %vm126_vm0, %v3151_v28, 0.0  ;;  %v1538_v28 = vperm.slane %v5062_v52, %v4570_v35 }
 0x185   :  { %v5248_v55 = vld.sshfl [vmem:[#allocation1 + $0x20] sm:$0xff pattern:$0x73625140]  ;;  %1883 = vst [vmem:[#allocation1 + $0x3] ss:$4 sm:$0xff] %v1530_v40  ;;  %v3214_v40 = vsel %vm126_vm0, %v3150_v19, 0.0 }
 0x186   :  { %1874 = vst [vmem:[#allocation1 + $0x20] ss:$4 sm:$0xff] %v1502_v30  ;;  %v1558_v30 = vperm.slane %v5116_v27, %v4572_v36  ;;  %3218 = vadd.xlane.f32.xlu1 %v3217_v25 }
 0x187   :  { %1875 = vst [vmem:[#allocation1 + $0x21] ss:$4 sm:$0xff] %v1506_v3  ;;  %3215 = vadd.xlane.f32.xlu0 %v3214_v40  ;;  %v1582_v40 = vperm.slane %v5105_v57, %v4568_v34 }
 0x188   :  { %1876 = vst [vmem:[#allocation1 + $0x22] ss:$4 sm:$0xff] %v1510_v15  ;;  %v1562_v15 = vperm.slane %v5116_v27, %v4580_v39  ;;  %v1546_v27 = vperm.slane %v5062_v52, %v4580_v39 }
 0x189   :  { %1877 = vst [vmem:[#allocation1 + $0x23] ss:$4 sm:$0xff] %v1514_v7  ;;  %v1534_v7 = vperm.slane %v5062_v52, %v4568_v34 }
 0x18a   :  { %v5292_v25 = vpop.xlane.xlu2 %2174 }
 0x18b   :  { %v5286_v19 = vpop.xlane.xlu0 %1256 }
 0x18c   :  { %v5271_v3 = vld.sshfl [vmem:[#allocation1] sm:$0xff pattern:$0x73625140] }
 0x18d   :  { %6885 = vst [vmem:[#allocation22_spill] sm:$0xff] %v5271_v3 }
 0x18e   :  { %1890 = vst [vmem:[#allocation1] ss:$4 sm:$0xff] %v1550_v49  ;;  %v1542_v49 = vperm.slane %v5062_v52, %v4572_v36  ;;  %v1594_v52 = vperm.slane %v5105_v57, %v4580_v39 }
 0x18f   :  { %1891 = vst [vmem:[#allocation1 + $0x1] ss:$4 sm:$0xff] %v1554_v24  ;;  %v5294_v24 = vpop.xlane.xlu1 %2177 }
 0x190   :  { %1892 = vst [vmem:[#allocation1 + $0x2] ss:$4 sm:$0xff] %v1558_v30  ;;  %v5284_v48 = vld.sshfl [vmem:[#allocation1 + $0x20] sm:$0xff pattern:$0x73625140]  ;;  %v1586_v30 = vperm.slane %v5105_v57, %v4570_v35 }
 0x191   :  { %6886 = vst [vmem:[#allocation23_spill] sm:$0xff] %v5284_v48  ;;  %v1570_v48 = vperm.slane %v5107_v6, %v4570_v35 }
 0x192   :  { %1893 = vst [vmem:[#allocation1 + $0x3] ss:$4 sm:$0xff] %v1562_v15 }
 0x193   :  { %1884 = vst [vmem:[#allocation1 + $0x20] ss:$4 sm:$0xff] %v1534_v7  ;;  %v1590_v7 = vperm.slane %v5105_v57, %v4572_v36  ;;  %v1574_v57 = vperm.slane %v5107_v6, %v4572_v36 }
 0x194   :  { %1885 = vst [vmem:[#allocation1 + $0x21] ss:$4 sm:$0xff] %v1538_v28  ;;  %v1566_v28 = vperm.slane %v5107_v6, %v4568_v34 }
 0x195   :  { %1886 = vst [vmem:[#allocation1 + $0x22] ss:$4 sm:$0xff] %v1542_v49  ;;  %v5308_v49 = vpop.xlane.xlu0 %2171 }
 0x196   :  { %1887 = vst [vmem:[#allocation1 + $0x23] ss:$4 sm:$0xff] %v1546_v27 }
 0x197   :  { %v5328_v3 = vpop.xlane.xlu1 %2186 }
 0x199   :  { %v5300_v15 = vld.sshfl [vmem:[#allocation1] sm:$0xff pattern:$0x73625140] }
 0x19a   :  { %6887 = vst [vmem:[#allocation24_spill] sm:$0xff] %v5300_v15  ;;  %v5326_v15 = vpop.xlane.xlu2 %2183 }
 0x19b   :  { %1900 = vst [vmem:[#allocation1] ss:$4 sm:$0xff] %v1582_v40  ;;  %v3153_v40 = vld [vmem:[%s6839_s3 + $0x98] sm:$0xff] }
 0x19c   :  { %1901 = vst [vmem:[#allocation1 + $0x1] ss:$4 sm:$0xff] %v1586_v30  ;;  %v3152_v30 = vld [vmem:[%s6839_s3 + $0x90] sm:$0xff] }
 0x19d   :  { %1902 = vst [vmem:[#allocation1 + $0x2] ss:$4 sm:$0xff] %v1590_v7  ;;  %v5310_v27 = vld.sshfl [vmem:[#allocation1 + $0x20] sm:$0xff pattern:$0x73625140]  ;;  %v1578_v7 = vperm.slane %v5107_v6, %v4580_v39  ;;  %v1622_v6 = vperm.slane %v5132_v58, %v4572_v36 }
 0x19e   :  { %6888 = vst [vmem:[#allocation25_spill] sm:$0xff] %v5310_v27  ;;  %v3223_v27 = vsel %vm126_vm0, %v3153_v40, 0.0  ;;  %v3155_v40 = vld [vmem:[%s6839_s3 + $0xa8] sm:$0xff] }
 0x19f   :  { %1903 = vst [vmem:[#allocation1 + $0x3] ss:$4 sm:$0xff] %v1594_v52  ;;  %v3220_v52 = vsel %vm126_vm0, %v3152_v30, 0.0  ;;  %3224 = vadd.xlane.f32.xlu1 %v3223_v27  ;;  %v3156_v27 = vld [vmem:[%s6839_s3 + $0xb0] sm:$0xff]  ;;  %v5346_v30 = vpop.xlane.xlu0 %2180 }
 0x1a0   :  { %1894 = vst [vmem:[#allocation1 + $0x20] ss:$4 sm:$0xff] %v1566_v28  ;;  %3221 = vadd.xlane.f32.xlu0 %v3220_v52  ;;  %v1614_v28 = vperm.slane %v5132_v58, %v4568_v34  ;;  %v3232_v52 = vsel %vm126_vm0, %v3156_v27, 0.0 }
 0x1a1   :  { %1895 = vst [vmem:[#allocation1 + $0x21] ss:$4 sm:$0xff] %v1570_v48  ;;  %v1618_v48 = vperm.slane %v5132_v58, %v4570_v35 }
 0x1a2   :  { %1896 = vst [vmem:[#allocation1 + $0x22] ss:$4 sm:$0xff] %v1574_v57  ;;  %v1626_v57 = vperm.slane %v5132_v58, %v4580_v39  ;;  %v1602_v58 = vperm.slane %v5142_v31, %v4570_v35  ;;  %v5361_v27 = vpop.xlane.xlu2 %2192 }
 0x1a3   :  { %1897 = vst [vmem:[#allocation1 + $0x23] ss:$4 sm:$0xff] %v1578_v7  ;;  %v4354_v7 = vmov 0  }
 0x1a4   :  { %4319 = vset.pattern.permute.xlu2 %v4354_v7  ;;  %4317 = vset.pattern.permute.xlu0 %v4354_v7 }
 0x1a5   :  { %936 = vperm.xlu2 %4319, %v4612_v63   ;;  %4318 = vset.pattern.permute.xlu1 %v4354_v7  ;;  %v5363_v63 = vpop.xlane.xlu1 %2195  ;;  %v1650_v7 = vperm.slane %v5189_v4, %v4570_v35 }
 0x1a6   :  { %v5332_v37 = vld.sshfl [vmem:[#allocation1] sm:$0xff pattern:$0x73625140] }
 0x1a7   :  { %6889 = vst [vmem:[#allocation26_spill] sm:$0xff] %v5332_v37  ;;  %v1598_v37 = vperm.slane %v5142_v31, %v4568_v34  ;;  %3233 = vadd.xlane.f32.xlu1 %v3232_v52  ;;  %v1658_v52 = vperm.slane %v5189_v4, %v4580_v39 }
 0x1a8   :  { %1910 = vst [vmem:[#allocation1] ss:$4 sm:$0xff] %v1614_v28  ;;  %v3229_v28 = vsel %vm126_vm0, %v3155_v40, 0.0  ;;  %v1646_v40 = vperm.slane %v5189_v4, %v4568_v34 }
 0x1a9   :  { %1911 = vst [vmem:[#allocation1 + $0x1] ss:$4 sm:$0xff] %v1618_v48  ;;  %3230 = vadd.xlane.f32.xlu0 %v3229_v28  ;;  %v1606_v48 = vperm.slane %v5142_v31, %v4572_v36  ;;  %v1630_v28 = vperm.slane %v5130_v56, %v4568_v34 }
 0x1aa   :  { %1912 = vst [vmem:[#allocation1 + $0x2] ss:$4 sm:$0xff] %v1622_v6  ;;  %v5353_v26 = vld.sshfl [vmem:[#allocation1 + $0x20] sm:$0xff pattern:$0x73625140]  ;;  %v1610_v6 = vperm.slane %v5142_v31, %v4580_v39  ;;  %v5374_v31 = vpop.xlane.xlu0 %2189 }
 0x1ab   :  { %1913 = vst [vmem:[#allocation1 + $0x3] ss:$4 sm:$0xff] %v1626_v57 }
 0x1ac   :  { %1904 = vst [vmem:[#allocation1 + $0x20] ss:$4 sm:$0xff] %v1598_v37  ;;  %v1654_v37 = vperm.slane %v5189_v4, %v4572_v36  ;;  %v5388_v4 = vpop.xlane.xlu2 %2201 }
 0x1ad   :  { %1905 = vst [vmem:[#allocation1 + $0x21] ss:$4 sm:$0xff] %v1602_v58  ;;  %945 = vperm.xlu2 %4319, %v4672_v47   ;;  %v1634_v58 = vperm.slane %v5130_v56, %v4570_v35  ;;  %v1638_v47 = vperm.slane %v5130_v56, %v4572_v36 }
 0x1ae   :  { %1906 = vst [vmem:[#allocation1 + $0x22] ss:$4 sm:$0xff] %v1606_v48 }
 0x1af   :  { %1907 = vst [vmem:[#allocation1 + $0x23] ss:$4 sm:$0xff] %v1610_v6  ;;  %v1642_v6 = vperm.slane %v5130_v56, %v4580_v39  ;;  %v1678_v56 = vperm.slane %v5166_v5, %v4568_v34 }
 0x1b2   :  { %v5367_v57 = vld.sshfl [vmem:[#allocation1] sm:$0xff pattern:$0x73625140] }
 0x1b3   :  { %1920 = vst [vmem:[#allocation1] ss:$4 sm:$0xff] %v1646_v40  ;;  %v5390_v40 = vpop.xlane.xlu1 %2204 }
 0x1b4   :  { %1921 = vst [vmem:[#allocation1 + $0x1] ss:$4 sm:$0xff] %v1650_v7  ;;  %v3158_v7 = vld [vmem:[%s6839_s3 + $0xc0] sm:$0xff] }
 0x1b5   :  { %1922 = vst [vmem:[#allocation1 + $0x2] ss:$4 sm:$0xff] %v1654_v37  ;;  %v3157_v37 = vld [vmem:[%s6839_s3 + $0xb8] sm:$0xff]  ;;  %948 = vperm.xlu2 %4319, %v4663_v38   ;;  %v1662_v38 = vperm.slane %v5168_v33, %v4568_v34 }
 0x1b6   :  { %v5382_v48 = vld.sshfl [vmem:[#allocation1 + $0x20] sm:$0xff pattern:$0x73625140]  ;;  %1923 = vst [vmem:[#allocation1 + $0x3] ss:$4 sm:$0xff] %v1658_v52  ;;  %v3238_v52 = vsel %vm126_vm0, %v3158_v7, 0.0  ;;  %v1690_v7 = vperm.slane %v5166_v5, %v4580_v39 }
 0x1b7   :  { %6890 = vst [vmem:[#allocation27_spill] sm:$0xff] %v5382_v48  ;;  %3239 = vadd.xlane.f32.xlu1 %v3238_v52  ;;  %v5407_v48 = vpop.xlane.xlu0 %2198  ;;  %v1666_v52 = vperm.slane %v5168_v33, %v4570_v35 }
 0x1b8   :  { %1914 = vst [vmem:[#allocation1 + $0x20] ss:$4 sm:$0xff] %v1630_v28  ;;  %v3235_v28 = vsel %vm126_vm0, %v3157_v37, 0.0 }
 0x1b9   :  { %1915 = vst [vmem:[#allocation1 + $0x21] ss:$4 sm:$0xff] %v1634_v58  ;;  %3236 = vadd.xlane.f32.xlu0 %v3235_v28  ;;  %v1682_v58 = vperm.slane %v5166_v5, %v4570_v35  ;;  %v3160_v28 = vld [vmem:[%s6839_s3 + $0xd0] sm:$0xff] }
 0x1ba   :  { %1916 = vst [vmem:[#allocation1 + $0x22] ss:$4 sm:$0xff] %v1638_v47 }
 0x1bb   :  { %1917 = vst [vmem:[#allocation1 + $0x23] ss:$4 sm:$0xff] %v1642_v6  ;;  %v1686_v6 = vperm.slane %v5166_v5, %v4572_v36  ;;  %v5424_v5 = vpop.xlane.xlu2 %2210 }
 0x1bc   :  { %6893 = vst [vmem:[#allocation30_spill] sm:$0xff] %v5424_v5 }
 0x1bd   :  { %v5405_v47 = vld.sshfl [vmem:[#allocation1] sm:$0xff pattern:$0x73625140]  ;;  %954 = vperm.xlu2 %4319, %v4690_v60   ;;  %v1722_v60 = vperm.slane %v5204_v54, %v4580_v39 }
 0x1be   :  { %6891 = vst [vmem:[#allocation28_spill] sm:$0xff] %v5405_v47 }
 0x1bf   :  { %1930 = vst [vmem:[#allocation1] ss:$4 sm:$0xff] %v1678_v56  ;;  %v1670_v56 = vperm.slane %v5168_v33, %v4572_v36 }
 0x1c0   :  { %1931 = vst [vmem:[#allocation1 + $0x1] ss:$4 sm:$0xff] %v1682_v58  ;;  %v5426_v58 = vpop.xlane.xlu1 %2213 }
 0x1c1   :  { %1932 = vst [vmem:[#allocation1 + $0x2] ss:$4 sm:$0xff] %v1686_v6  ;;  %v3244_v6 = vsel %vm126_vm0, %v3160_v28, 0.0  ;;  %v5438_v28 = vpop.xlane.xlu0 %2207 }
 0x1c2   :  { %v5415_v37 = vld.sshfl [vmem:[#allocation1 + $0x20] sm:$0xff pattern:$0x73625140]  ;;  %1933 = vst [vmem:[#allocation1 + $0x3] ss:$4 sm:$0xff] %v1690_v7  ;;  %v1674_v7 = vperm.slane %v5168_v33, %v4580_v39  ;;  %3245 = vadd.xlane.f32.xlu1 %v3244_v6  ;;  %v1718_v33 = vperm.slane %v5204_v54, %v4572_v36 }
 0x1c3   :  { %6892 = vst [vmem:[#allocation29_spill] sm:$0xff] %v5415_v37  ;;  %v3159_v37 = vld [vmem:[%s6839_s3 + $0xc8] sm:$0xff] }
 0x1c4   :  { %1924 = vst [vmem:[#allocation1 + $0x20] ss:$4 sm:$0xff] %v1662_v38  ;;  %v3241_v47 = vsel %vm126_vm0, %v3159_v37, 0.0  ;;  %v1710_v38 = vperm.slane %v5204_v54, %v4568_v34 }
 0x1c5   :  { %6894 = vst [vmem:[#allocation31_spill] sm:$0xff] %v5426_v58  ;;  %3242 = vadd.xlane.f32.xlu0 %v3241_v47  ;;  %v1714_v58 = vperm.slane %v5204_v54, %v4570_v35  ;;  %v1694_v47 = vperm.slane %v5218_v8, %v4568_v34  ;;  %963 = vperm.xlu2 %4319, %v4744_v45  }
 0x1c6   :  { %1925 = vst [vmem:[#allocation1 + $0x21] ss:$4 sm:$0xff] %v1666_v52  ;;  %v1698_v52 = vperm.slane %v5218_v8, %v4570_v35  ;;  %v1702_v54 = vperm.slane %v5218_v8, %v4572_v36 }
 0x1c7   :  { %1926 = vst [vmem:[#allocation1 + $0x22] ss:$4 sm:$0xff] %v1670_v56  ;;  %v5455_v56 = vpop.xlane.xlu2 %2219 }
 0x1c8   :  { %1927 = vst [vmem:[#allocation1 + $0x23] ss:$4 sm:$0xff] %v1674_v7  ;;  %v5457_v6 = vpop.xlane.xlu1 %2222  ;;  %v1742_v7 = vperm.slane %v5254_v13, %v4568_v34 }
 0x1c9   :  { %v5440_v5 = vld.sshfl [vmem:[#allocation1] sm:$0xff pattern:$0x73625140]  ;;  %6896 = vst [vmem:[#allocation33_spill] sm:$0xff] %v5457_v6  ;;  %v5463_v45 = vpop.xlane.xlu0 %2216 }
 0x1ca   :  { %6895 = vst [vmem:[#allocation32_spill] sm:$0xff] %v5440_v5  ;;  %v1726_v5 = vperm.slane %v5202_v44, %v4568_v34 }
 0x1cb   :  { %1940 = vst [vmem:[#allocation1] ss:$4 sm:$0xff] %v1710_v38  ;;  %v3162_v38 = vld [vmem:[%s6839_s3 + $0xe0] sm:$0xff] }
 0x1cc   :  { %1941 = vst [vmem:[#allocation1 + $0x1] ss:$4 sm:$0xff] %v1714_v58  ;;  %v1706_v58 = vperm.slane %v5218_v8, %v4580_v39  ;;  %v1746_v8 = vperm.slane %v5254_v13, %v4570_v35 }
 0x1cd   :  { %1942 = vst [vmem:[#allocation1 + $0x2] ss:$4 sm:$0xff] %v1718_v33  ;;  %v3161_v33 = vld [vmem:[%s6839_s3 + $0xd8] sm:$0xff]  ;;  %972 = vperm.xlu2 %4319, %v4750_v53  }
 0x1ce   :  { %1943 = vst [vmem:[#allocation1 + $0x3] ss:$4 sm:$0xff] %v1722_v60 }
 0x1cf   :  { %v5451_v37 = vld.sshfl [vmem:[#allocation1 + $0x20] sm:$0xff pattern:$0x73625140]  ;;  %v5486_v6 = vpop.xlane.xlu2 %2228 }
 0x1d0   :  { %1934 = vst [vmem:[#allocation1 + $0x20] ss:$4 sm:$0xff] %v1694_v47  ;;  %v1750_v47 = vperm.slane %v5254_v13, %v4572_v36  ;;  %v5488_v53 = vpop.xlane.xlu1 %2231 }
 0x1d1   :  { %1935 = vst [vmem:[#allocation1 + $0x21] ss:$4 sm:$0xff] %v1698_v52  ;;  %v3250_v52 = vsel %vm126_vm0, %v3162_v38, 0.0 }
 0x1d2   :  { %1936 = vst [vmem:[#allocation1 + $0x22] ss:$4 sm:$0xff] %v1702_v54  ;;  %v3247_v54 = vsel %vm126_vm0, %v3161_v33, 0.0  ;;  %3251 = vadd.xlane.f32.xlu1 %v3250_v52  ;;  %v1738_v33 = vperm.slane %v5202_v44, %v4580_v39  ;;  %v5504_v52 = vpop.xlane.xlu0 %2225 }
 0x1d3   :  { %1937 = vst [vmem:[#allocation1 + $0x23] ss:$4 sm:$0xff] %v1706_v58  ;;  %v1754_v58 = vperm.slane %v5254_v13, %v4580_v39  ;;  %3248 = vadd.xlane.f32.xlu0 %v3247_v54  ;;  %v1734_v13 = vperm.slane %v5202_v44, %v4572_v36 }
 0x1d5   :  { %v5473_v60 = vld.sshfl [vmem:[#allocation1] sm:$0xff pattern:$0x73625140]  ;;  %981 = vperm.xlu2 %4319, %v4804_v43  }
 0x1d6   :  { %1950 = vst [vmem:[#allocation1] ss:$4 sm:$0xff] %v1742_v7  ;;  %v1730_v7 = vperm.slane %v5202_v44, %v4570_v35  ;;  %v1774_v44 = vperm.slane %v5226_v10, %v4568_v34 }
 0x1d7   :  { %1951 = vst [vmem:[#allocation1 + $0x1] ss:$4 sm:$0xff] %v1746_v8  ;;  %v3164_v8 = vld [vmem:[%s6839_s3 + $0xf0] sm:$0xff] }
 0x1d8   :  { %1952 = vst [vmem:[#allocation1 + $0x2] ss:$4 sm:$0xff] %v1750_v47  ;;  %v3163_v47 = vld [vmem:[%s6839_s3 + $0xe8] sm:$0xff]  ;;  %v3256_v54 = vsel %vm126_vm0, %v3164_v8, 0.0  ;;  %v5519_v8 = vpop.xlane.xlu2 %2237  ;;  %v5521_v43 = vpop.xlane.xlu1 %2240 }
 0x1d9   :  { %1953 = vst [vmem:[#allocation1 + $0x3] ss:$4 sm:$0xff] %v1754_v58  ;;  %v1778_v58 = vperm.slane %v5226_v10, %v4570_v35 }
 0x1da   :  { %v5492_v38 = vld.sshfl [vmem:[#allocation1 + $0x20] sm:$0xff pattern:$0x73625140]  ;;  %3257 = vadd.xlane.f32.xlu1 %v3256_v54 }
 0x1db   :  { %1944 = vst [vmem:[#allocation1 + $0x20] ss:$4 sm:$0xff] %v1726_v5  ;;  %v3253_v5 = vsel %vm126_vm0, %v3163_v47, 0.0  ;;  %v1758_v47 = vperm.slane %v5228_v51, %v4568_v34  ;;  %vm1125_vm0 = vcmask 1041409  }
 0x1dc   :  { %1945 = vst [vmem:[#allocation1 + $0x21] ss:$4 sm:$0xff] %v1730_v7  ;;  %3254 = vadd.xlane.f32.xlu0 %v3253_v5  ;;  %v1762_v5 = vperm.slane %v5228_v51, %v4570_v35 }
 0x1dd   :  { %1946 = vst [vmem:[#allocation1 + $0x22] ss:$4 sm:$0xff] %v1734_v13  ;;  %v1782_v13 = vperm.slane %v5226_v10, %v4572_v36  ;;  %990 = vperm.xlu2 %4319, %v4822_v59  }
 0x1de   :  { %1947 = vst [vmem:[#allocation1 + $0x23] ss:$4 sm:$0xff] %v1738_v33  ;;  %v1786_v33 = vperm.slane %v5226_v10, %v4580_v39  ;;  %v1770_v10 = vperm.slane %v5228_v51, %v4580_v39 }
 0x1e0   :  { %v5513_v7 = vld.sshfl [vmem:[#allocation1] sm:$0xff pattern:$0x73625140]  ;;  %v5544_v59 = vpop.xlane.xlu2 %2246 }
 0x1e1   :  { %1960 = vst [vmem:[#allocation1] ss:$4 sm:$0xff] %v1774_v44  ;;  %v1766_v44 = vperm.slane %v5228_v51, %v4572_v36  ;;  %v5546_v51 = vpop.xlane.xlu1 %2249 }
 0x1e2   :  { %1961 = vst [vmem:[#allocation1 + $0x1] ss:$4 sm:$0xff] %v1778_v58  ;;  %v5534_v58 = vpop.xlane.xlu0 %2234 }
 0x1e3   :  { %1962 = vst [vmem:[#allocation1 + $0x2] ss:$4 sm:$0xff] %v1782_v13  ;;  %v2296_v13 = vperm.slane %v5266_v20, %v4568_v34 }
 0x1e4   :  { %1963 = vst [vmem:[#allocation1 + $0x3] ss:$4 sm:$0xff] %v1786_v33  ;;  %v2300_v33 = vperm.slane %v5266_v20, %v4570_v35 }
 0x1e5   :  { %v5525_v54 = vld.sshfl [vmem:[#allocation1 + $0x20] sm:$0xff pattern:$0x73625140]  ;;  %999 = vperm.xlu2 %4319, %v4876_v61   ;;  %v2328_v61 = vperm.slane %v5308_v49, %v4568_v34 }
 0x1e6   :  { %6897 = vst [vmem:[#allocation34_spill] sm:$0xff] %v5525_v54 }
 0x1e7   :  { %1954 = vst [vmem:[#allocation1 + $0x20] ss:$4 sm:$0xff] %v1758_v47  ;;  %v2304_v47 = vperm.slane %v5266_v20, %v4572_v36 }
 0x1e8   :  { %1955 = vst [vmem:[#allocation1 + $0x21] ss:$4 sm:$0xff] %v1762_v5  ;;  %v2308_v5 = vperm.slane %v5266_v20, %v4580_v39  ;;  %v1802_v20 = vperm.slane %v5286_v19, %v4580_v39 }
 0x1e9   :  { %1956 = vst [vmem:[#allocation1 + $0x22] ss:$4 sm:$0xff] %v1766_v44  ;;  %v1790_v44 = vperm.slane %v5286_v19, %v4568_v34 }
 0x1ea   :  { %1957 = vst [vmem:[#allocation1 + $0x23] ss:$4 sm:$0xff] %v1770_v10 }
 0x1eb   :  { %v5538_v54 = vld.sshfl [vmem:[#allocation1] sm:$0xff pattern:$0x73625140] }
 0x1ec   :  { %6898 = vst [vmem:[#allocation35_spill] sm:$0xff] %v5538_v54  ;;  %v1798_v54 = vperm.slane %v5286_v19, %v4572_v36 }
 0x1ed   :  { %2805 = vst [vmem:[#allocation1] ss:$4 sm:$0xff] %v2296_v13  ;;  %v1794_v13 = vperm.slane %v5286_v19, %v4570_v35  ;;  %1008 = vperm.xlu2 %4319, %v4894_v14   ;;  %v5573_v19 = vpop.xlane.xlu1 %2258  ;;  %v2312_v14 = vperm.slane %v5268_v12, %v4568_v34 }
 0x1ee   :  { %2807 = vst [vmem:[#allocation1 + $0x1] ss:$4 sm:$0xff] %v2300_v33  ;;  %v5561_v33 = vpop.xlane.xlu0 %2243 }
 0x1ef   :  { %2809 = vst [vmem:[#allocation1 + $0x2] ss:$4 sm:$0xff] %v2304_v47 }
 0x1f0   :  { %2811 = vst [vmem:[#allocation1 + $0x3] ss:$4 sm:$0xff] %v2308_v5  ;;  %939 = vperm.xlu0 %4317, %v4644_v21   ;;  %v2332_v5 = vperm.slane %v5308_v49, %v4570_v35  ;;  %v2340_v21 = vperm.slane %v5308_v49, %v4580_v39 }
 0x1f1   :  { %v5553_v10 = vld.sshfl [vmem:[#allocation1 + $0x20] sm:$0xff pattern:$0x73625140]  ;;  %6899 = vst [vmem:[#allocation36_spill] sm:$0xff] %v5573_v19  ;;  %v2320_v19 = vperm.slane %v5268_v12, %v4572_v36 }
 0x1f2   :  { %1964 = vst [vmem:[#allocation1 + $0x20] ss:$4 sm:$0xff] %v1790_v44  ;;  %v5571_v44 = vpop.xlane.xlu2 %2255 }
 0x1f3   :  { %1965 = vst [vmem:[#allocation1 + $0x21] ss:$4 sm:$0xff] %v1794_v13  ;;  %v2316_v13 = vperm.slane %v5268_v12, %v4570_v35  ;;  %942 = vperm.xlu1 %4318, %v4639_v16  }
 0x1f4   :  { %1966 = vst [vmem:[#allocation1 + $0x22] ss:$4 sm:$0xff] %v1798_v54  ;;  %v2336_v54 = vperm.slane %v5308_v49, %v4572_v36  ;;  %v2324_v49 = vperm.slane %v5268_v12, %v4580_v39  ;;  %v2368_v12 = vperm.slane %v5294_v24, %v4572_v36 }
 0x1f5   :  { %1967 = vst [vmem:[#allocation1 + $0x23] ss:$4 sm:$0xff] %v1802_v20  ;;  %1017 = vperm.xlu2 %4319, %v4962_v42   ;;  %v2344_v42 = vperm.slane %v5292_v25, %v4568_v34 }
 0x1f7   :  { %v5567_v47 = vld.sshfl [vmem:[#allocation1] sm:$0xff pattern:$0x73625140] }
 0x1f8   :  { %2822 = vst [vmem:[#allocation1] ss:$4 sm:$0xff] %v2328_v61  ;;  %v5588_v61 = vpop.xlane.xlu0 %2252  ;;  %960 = vperm.xlu0 %4317, %v4708_v9   ;;  %v2372_v9 = vperm.slane %v5294_v24, %v4580_v39 }
 0x1f9   :  { %2823 = vst [vmem:[#allocation1 + $0x1] ss:$4 sm:$0xff] %v2332_v5  ;;  %v2360_v5 = vperm.slane %v5294_v24, %v4568_v34 }
 0x1fa   :  { %2824 = vst [vmem:[#allocation1 + $0x2] ss:$4 sm:$0xff] %v2336_v54  ;;  %v5596_v16 = vpop.xlane.xlu2 %3173  ;;  %v5598_v54 = vpop.xlane.xlu1 %3170 }
 0x1fb   :  { %2825 = vst [vmem:[#allocation1 + $0x3] ss:$4 sm:$0xff] %v2340_v21  ;;  %v2364_v21 = vperm.slane %v5294_v24, %v4570_v35  ;;  %951 = vperm.xlu1 %4318, %v4693_v62   ;;  %v2352_v62 = vperm.slane %v5292_v25, %v4572_v36  ;;  %v2356_v24 = vperm.slane %v5292_v25, %v4580_v39 }
 0x1fc   :  { %v5583_v20 = vld.sshfl [vmem:[#allocation1 + $0x20] sm:$0xff pattern:$0x73625140] }
 0x1fd   :  { %2813 = vst [vmem:[#allocation1 + $0x20] ss:$4 sm:$0xff] %v2312_v14  ;;  %1026 = vperm.xlu2 %4319, %v4969_v50  }
 0x1fe   :  { %2815 = vst [vmem:[#allocation1 + $0x21] ss:$4 sm:$0xff] %v2316_v13  ;;  %v2348_v13 = vperm.slane %v5292_v25, %v4570_v35  ;;  %v2400_v25 = vperm.slane %v5326_v15, %v4572_v36 }
 0x1ff   :  { %2817 = vst [vmem:[#allocation1 + $0x22] ss:$4 sm:$0xff] %v2320_v19 }
 0x200   :  { %2819 = vst [vmem:[#allocation1 + $0x23] ss:$4 sm:$0xff] %v2324_v49  ;;  %969 = vperm.xlu0 %4317, %v4765_v0   ;;  %v5616_v49 = vpop.xlane.xlu0 %3167 }
 0x202   :  { %v5602_v14 = vld.sshfl [vmem:[#allocation1] sm:$0xff pattern:$0x73625140]  ;;  %v5623_v0 = vpop.xlane.xlu2 %3182 }
 0x203   :  { %2832 = vst [vmem:[#allocation1] ss:$4 sm:$0xff] %v2360_v5  ;;  %v5625_v5 = vpop.xlane.xlu1 %3179  ;;  %957 = vperm.xlu1 %4318, %v4717_v18   ;;  %v2404_v18 = vperm.slane %v5326_v15, %v4580_v39 }
 0x204   :  { %2833 = vst [vmem:[#allocation1 + $0x1] ss:$4 sm:$0xff] %v2364_v21  ;;  %v2392_v21 = vperm.slane %v5326_v15, %v4568_v34 }
 0x205   :  { %2834 = vst [vmem:[#allocation1 + $0x2] ss:$4 sm:$0xff] %v2368_v12  ;;  %v2396_v12 = vperm.slane %v5326_v15, %v4570_v35  ;;  %1974 = vperm.xlu2 %4319, %v5058_v41   ;;  %v2384_v41 = vperm.slane %v5346_v30, %v4572_v36  ;;  %v2388_v15 = vperm.slane %v5346_v30, %v4580_v39 }
 0x206   :  { %2835 = vst [vmem:[#allocation1 + $0x3] ss:$4 sm:$0xff] %v2372_v9 }
 0x207   :  { %v5612_v19 = vld.sshfl [vmem:[#allocation1 + $0x20] sm:$0xff pattern:$0x73625140] }
 0x208   :  { %2826 = vst [vmem:[#allocation1 + $0x20] ss:$4 sm:$0xff] %v2344_v42  ;;  %978 = vperm.xlu0 %4317, %v4780_v11   ;;  %v5637_v9 = vpop.xlane.xlu0 %3176  ;;  %v2376_v42 = vperm.slane %v5346_v30, %v4568_v34  ;;  %v2380_v11 = vperm.slane %v5346_v30, %v4570_v35  ;;  %v2432_v30 = vperm.slane %v5374_v31, %v4572_v36 }
 0x209   :  { %2827 = vst [vmem:[#allocation1 + $0x21] ss:$4 sm:$0xff] %v2348_v13 }
 0x20a   :  { %2828 = vst [vmem:[#allocation1 + $0x22] ss:$4 sm:$0xff] %v2352_v62  ;;  %v5648_v62 = vpop.xlane.xlu2 %3191 }
 0x20b   :  { %2829 = vst [vmem:[#allocation1 + $0x23] ss:$4 sm:$0xff] %v2356_v24  ;;  %v5650_v24 = vpop.xlane.xlu1 %3188  ;;  %966 = vperm.xlu1 %4318, %v4735_v32  }
 0x20d   :  { %v5630_v50 = vld.sshfl [vmem:[#allocation1] sm:$0xff pattern:$0x73625140]  ;;  %1986 = vperm.xlu2 %4319, %v5134_v2   ;;  %v2408_v2 = vperm.slane %v5328_v3, %v4568_v34 }
 0x20e   :  { %2842 = vst [vmem:[#allocation1] ss:$4 sm:$0xff] %v2392_v21 }
 0x20f   :  { %2843 = vst [vmem:[#allocation1 + $0x1] ss:$4 sm:$0xff] %v2396_v12  ;;  %v2424_v12 = vperm.slane %v5374_v31, %v4568_v34 }
 0x210   :  { %2844 = vst [vmem:[#allocation1 + $0x2] ss:$4 sm:$0xff] %v2400_v25  ;;  %987 = vperm.xlu0 %4317, %v4825_v1   ;;  %v5658_v21 = vpop.xlane.xlu0 %3185  ;;  %v2436_v1 = vperm.slane %v5374_v31, %v4580_v39 }
 0x211   :  { %2845 = vst [vmem:[#allocation1 + $0x3] ss:$4 sm:$0xff] %v2404_v18  ;;  %v2428_v18 = vperm.slane %v5374_v31, %v4570_v35  ;;  %v2420_v31 = vperm.slane %v5328_v3, %v4580_v39 }
 0x212   :  { %v5644_v13 = vld.sshfl [vmem:[#allocation1 + $0x20] sm:$0xff pattern:$0x73625140]  ;;  %v5669_v32 = vpop.xlane.xlu2 %3200 }
 0x213   :  { %2836 = vst [vmem:[#allocation1 + $0x20] ss:$4 sm:$0xff] %v2376_v42  ;;  %v5671_v42 = vpop.xlane.xlu1 %3197  ;;  %975 = vperm.xlu1 %4318, %v4789_v22   ;;  %v2456_v22 = vperm.slane %v5363_v63, %v4568_v34 }
 0x214   :  { %2837 = vst [vmem:[#allocation1 + $0x21] ss:$4 sm:$0xff] %v2380_v11  ;;  %v2412_v11 = vperm.slane %v5328_v3, %v4570_v35 }
 0x215   :  { %2838 = vst [vmem:[#allocation1 + $0x22] ss:$4 sm:$0xff] %v2384_v41  ;;  %1995 = vperm.xlu2 %4319, %v5155_v46   ;;  %v2468_v46 = vperm.slane %v5363_v63, %v4580_v39 }
 0x216   :  { %2839 = vst [vmem:[#allocation1 + $0x23] ss:$4 sm:$0xff] %v2388_v15  ;;  %v2416_v15 = vperm.slane %v5328_v3, %v4572_v36  ;;  %v2464_v3 = vperm.slane %v5363_v63, %v4572_v36 }
 0x217   :  { %6900 = vst [vmem:[#allocation37_spill] sm:$0xff] %v5669_v32 }
 0x218   :  { %v5663_v25 = vld.sshfl [vmem:[#allocation1] sm:$0xff pattern:$0x73625140]  ;;  %6901 = vst [vmem:[#allocation38_spill] sm:$0xff] %v5671_v42  ;;  %996 = vperm.xlu0 %4317, %v4843_v17   ;;  %v2460_v17 = vperm.slane %v5363_v63, %v4570_v35 }
 0x219   :  { %2852 = vst [vmem:[#allocation1] ss:$4 sm:$0xff] %v2424_v12  ;;  %v5687_v12 = vpop.xlane.xlu0 %3194 }
 0x21a   :  { %2853 = vst [vmem:[#allocation1 + $0x1] ss:$4 sm:$0xff] %v2428_v18  ;;  %v5690_v18 = vpop.xlane.xlu2 %3227 }
 0x21b   :  { %2854 = vst [vmem:[#allocation1 + $0x2] ss:$4 sm:$0xff] %v2432_v30  ;;  %v5692_v30 = vpop.xlane.xlu1 %3206  ;;  %984 = vperm.xlu1 %4318, %v4795_v29   ;;  %v2448_v29 = vperm.slane %v5361_v27, %v4572_v36 }
 0x21c   :  { %2855 = vst [vmem:[#allocation1 + $0x3] ss:$4 sm:$0xff] %v2436_v1 }
 0x21d   :  { %v5679_v41 = vld.sshfl [vmem:[#allocation1 + $0x20] sm:$0xff pattern:$0x73625140]  ;;  %6902 = vst [vmem:[#allocation39_spill] sm:$0xff] %v5690_v18  ;;  %2004 = vperm.xlu2 %4319, %v5248_v55   ;;  %v6907_v55 = vld [vmem:[#allocation6_spill] sm:$0xff]  ;;  %v2480_v18 = vperm.slane %v5407_v48, %v4572_v36 }
 0x21e   :  { %2846 = vst [vmem:[#allocation1 + $0x20] ss:$4 sm:$0xff] %v2408_v2  ;;  %v2440_v2 = vperm.slane %v5361_v27, %v4568_v34 }
 0x21f   :  { %2847 = vst [vmem:[#allocation1 + $0x21] ss:$4 sm:$0xff] %v2412_v11 }
 0x220   :  { %2848 = vst [vmem:[#allocation1 + $0x22] ss:$4 sm:$0xff] %v2416_v15  ;;  %1005 = vperm.xlu0 %4317, %v4899_v23   ;;  %v2452_v23 = vperm.slane %v5361_v27, %v4580_v39 }
 0x221   :  { %2849 = vst [vmem:[#allocation1 + $0x23] ss:$4 sm:$0xff] %v2420_v31  ;;  %v5708_v11 = vpop.xlane.xlu0 %3203  ;;  %v2444_v31 = vperm.slane %v5361_v27, %v4570_v35 }
 0x222   :  { %6903 = vst [vmem:[#allocation40_spill] sm:$0xff] %v5692_v30  ;;  %v5719_v63 = vpop.xlane.xlu2 %3260 }
 0x223   :  { %v5698_v1 = vld.sshfl [vmem:[#allocation1] sm:$0xff pattern:$0x73625140]  ;;  %6904 = vst [vmem:[#allocation41_spill] sm:$0xff] %v5708_v11  ;;  %993 = vperm.xlu1 %4318, %v6907_v55   ;;  %v2472_v55 = vperm.slane %v5407_v48, %v4568_v34 }
 0x224   :  { %2862 = vst [vmem:[#allocation1] ss:$4 sm:$0xff] %v2456_v22  ;;  %v5721_v22 = vpop.xlane.xlu1 %3212 }
 0x225   :  { %2863 = vst [vmem:[#allocation1 + $0x1] ss:$4 sm:$0xff] %v2460_v17  ;;  %v2488_v17 = vperm.slane %v5388_v4, %v4568_v34 }
 0x226   :  { %2864 = vst [vmem:[#allocation1 + $0x2] ss:$4 sm:$0xff] %v2464_v3  ;;  %v6908_v3 = vld [vmem:[#allocation8_spill] sm:$0xff] }
 0x227   :  { %2865 = vst [vmem:[#allocation1 + $0x3] ss:$4 sm:$0xff] %v2468_v46 }
 0x228   :  { %v5711_v15 = vld.sshfl [vmem:[#allocation1 + $0x20] sm:$0xff pattern:$0x73625140]  ;;  %6905 = vst [vmem:[#allocation42_spill] sm:$0xff] %v5719_v63  ;;  %1014 = vperm.xlu0 %4317, %v6908_v3  }
 0x229   :  { %2856 = vst [vmem:[#allocation1 + $0x20] ss:$4 sm:$0xff] %v2440_v2  ;;  %v2492_v2 = vperm.slane %v5388_v4, %v4570_v35  ;;  %v5731_v27 = vpop.xlane.xlu0 %3209 }
 0x22a   :  { %2857 = vst [vmem:[#allocation1 + $0x21] ss:$4 sm:$0xff] %v2444_v31  ;;  %v6910_v31 = vld [vmem:[#allocation22_spill] sm:$0xff]  ;;  %v5740_v3 = vpop.permute.xlu2 %936 }
 0x22b   :  { %2858 = vst [vmem:[#allocation1 + $0x22] ss:$4 sm:$0xff] %v2448_v29  ;;  %2013 = vperm.xlu2 %4319, %v6910_v31   ;;  %v2496_v29 = vperm.slane %v5388_v4, %v4572_v36  ;;  %v2476_v31 = vperm.slane %v5407_v48, %v4570_v35 }
 0x22c   :  { %2859 = vst [vmem:[#allocation1 + $0x23] ss:$4 sm:$0xff] %v2452_v23  ;;  %v2500_v23 = vperm.slane %v5388_v4, %v4580_v39  ;;  %v2484_v4 = vperm.slane %v5407_v48, %v4580_v39  ;;  %v2524_v48 = vperm.slane %v5438_v28, %v4570_v35 }
 0x22d   :  { %6906 = vst [vmem:[#allocation43_spill] sm:$0xff] %v5721_v22  ;;  %v2520_v22 = vperm.slane %v5438_v28, %v4568_v34 }
 0x22e   :  { %v5727_v46 = vld.sshfl [vmem:[#allocation1] sm:$0xff pattern:$0x73625140]  ;;  %6909 = vst [vmem:[#allocation6_spill] sm:$0xff] %v5731_v27 }
 0x22f   :  { %2872 = vst [vmem:[#allocation1] ss:$4 sm:$0xff] %v2488_v17  ;;  %v6911_v17 = vld [vmem:[#allocation7_spill] sm:$0xff] }
 0x230   :  { %2873 = vst [vmem:[#allocation1 + $0x1] ss:$4 sm:$0xff] %v2492_v2  ;;  %1002 = vperm.xlu1 %4318, %v6911_v17   ;;  %v5751_v2 = vpop.xlane.xlu1 %3218  ;;  %v6915_v17 = vld [vmem:[#allocation9_spill] sm:$0xff] }
 0x231   :  { %2874 = vst [vmem:[#allocation1 + $0x2] ss:$4 sm:$0xff] %v2496_v29  ;;  %v6913_v29 = vld [vmem:[#allocation11_spill] sm:$0xff] }
 0x232   :  { %2875 = vst [vmem:[#allocation1 + $0x3] ss:$4 sm:$0xff] %v2500_v23  ;;  %1023 = vperm.xlu0 %4317, %v6913_v29   ;;  %v5754_v23 = vpop.xlane.xlu0 %3215  ;;  %v2508_v29 = vperm.slane %v5390_v40, %v4570_v35 }
 0x233   :  { %v5742_v63 = vld.sshfl [vmem:[#allocation1 + $0x20] sm:$0xff pattern:$0x73625140]  ;;  %6912 = vst [vmem:[#allocation8_spill] sm:$0xff] %v5751_v2  ;;  %2022 = vperm.xlu2 %4319, %v5353_v26   ;;  %v2504_v26 = vperm.slane %v5390_v40, %v4568_v34 }
 0x234   :  { %2866 = vst [vmem:[#allocation1 + $0x20] ss:$4 sm:$0xff] %v2472_v55 }
 0x235   :  { %2867 = vst [vmem:[#allocation1 + $0x21] ss:$4 sm:$0xff] %v2476_v31  ;;  %v5763_v31 = vpop.permute.xlu2 %945 }
 0x236   :  { %2868 = vst [vmem:[#allocation1 + $0x22] ss:$4 sm:$0xff] %v2480_v18  ;;  %v2528_v18 = vperm.slane %v5438_v28, %v4572_v36 }
 0x237   :  { %2869 = vst [vmem:[#allocation1 + $0x23] ss:$4 sm:$0xff] %v2484_v4  ;;  %v2532_v4 = vperm.slane %v5438_v28, %v4580_v39 }
 0x238   :  { %6914 = vst [vmem:[#allocation22_spill] sm:$0xff] %v5754_v23  ;;  %1011 = vperm.xlu1 %4318, %v6915_v17   ;;  %v6916_v23 = vld [vmem:[#allocation14_spill] sm:$0xff] }
 0x239   :  { %v5759_v55 = vld.sshfl [vmem:[#allocation1] sm:$0xff pattern:$0x73625140] }
 0x23a   :  { %2882 = vst [vmem:[#allocation1] ss:$4 sm:$0xff] %v2520_v22  ;;  %1977 = vperm.xlu0 %4317, %v6916_v23   ;;  %v2512_v22 = vperm.slane %v5390_v40, %v4572_v36  ;;  %v5779_v28 = vpop.xlane.xlu0 %3221  ;;  %v6919_v23 = vld [vmem:[#allocation31_spill] sm:$0xff] }
 0x23b   :  { %2883 = vst [vmem:[#allocation1 + $0x1] ss:$4 sm:$0xff] %v2524_v48  ;;  %2031 = vperm.xlu2 %4319, %v5367_v57   ;;  %v2516_v48 = vperm.slane %v5390_v40, %v4580_v39  ;;  %v2560_v57 = vperm.slane %v6919_v23, %v4572_v36  ;;  %v6921_v40 = vld [vmem:[#allocation15_spill] sm:$0xff] }
 0x23c   :  { %2884 = vst [vmem:[#allocation1 + $0x2] ss:$4 sm:$0xff] %v2528_v18  ;;  %v5784_v18 = vpop.xlane.xlu1 %3224 }
 0x23d   :  { %2885 = vst [vmem:[#allocation1 + $0x3] ss:$4 sm:$0xff] %v2532_v4  ;;  %v5786_v17 = vpop.permute.xlu2 %948  ;;  %v2552_v4 = vperm.slane %v6919_v23, %v4568_v34 }
 0x23e   :  { %v5774_v2 = vld.sshfl [vmem:[#allocation1 + $0x20] sm:$0xff pattern:$0x73625140]  ;;  %6917 = vst [vmem:[#allocation7_spill] sm:$0xff] %v5779_v28  ;;  %v6920_v28 = vld [vmem:[#allocation10_spill] sm:$0xff] }
 0x23f   :  { %2876 = vst [vmem:[#allocation1 + $0x20] ss:$4 sm:$0xff] %v2504_v26  ;;  %v2556_v26 = vperm.slane %v6919_v23, %v4570_v35 }
 0x240   :  { %2877 = vst [vmem:[#allocation1 + $0x21] ss:$4 sm:$0xff] %v2508_v29  ;;  %1020 = vperm.xlu1 %4318, %v6920_v28   ;;  %v2564_v29 = vperm.slane %v6919_v23, %v4580_v39 }
 0x241   :  { %6918 = vst [vmem:[#allocation11_spill] sm:$0xff] %v5784_v18 }
 0x242   :  { %2878 = vst [vmem:[#allocation1 + $0x22] ss:$4 sm:$0xff] %v2512_v22  ;;  %1983 = vperm.xlu0 %4317, %v6921_v40   ;;  %v5800_v22 = vpop.xlane.xlu0 %3230  ;;  %v6926_v40 = vld [vmem:[#allocation18_spill] sm:$0xff] }
 0x243   :  { %2879 = vst [vmem:[#allocation1 + $0x23] ss:$4 sm:$0xff] %v2516_v48  ;;  %2040 = vperm.xlu2 %4319, %v5451_v37   ;;  %v6923_v48 = vld [vmem:[#allocation30_spill] sm:$0xff] }
 0x244   :  { %v5792_v27 = vld.sshfl [vmem:[#allocation1] sm:$0xff pattern:$0x73625140]  ;;  %6922 = vst [vmem:[#allocation9_spill] sm:$0xff] %v5800_v22  ;;  %v2536_v18 = vperm.slane %v6923_v48, %v4568_v34  ;;  %v2540_v28 = vperm.slane %v6923_v48, %v4570_v35  ;;  %v5811_v23 = vpop.xlane.xlu1 %3233  ;;  %v2548_v37 = vperm.slane %v6923_v48, %v4580_v39 }
 0x245   :  { %2892 = vst [vmem:[#allocation1] ss:$4 sm:$0xff] %v2552_v4  ;;  %v2544_v4 = vperm.slane %v6923_v48, %v4572_v36  ;;  %v2592_v48 = vperm.slane %v5455_v56, %v4572_v36 }
 0x246   :  { %2893 = vst [vmem:[#allocation1 + $0x1] ss:$4 sm:$0xff] %v2556_v26  ;;  %v5813_v26 = vpop.permute.xlu2 %954 }
 0x247   :  { %2894 = vst [vmem:[#allocation1 + $0x2] ss:$4 sm:$0xff] %v2560_v57  ;;  %v6925_v57 = vld [vmem:[#allocation13_spill] sm:$0xff] }
 0x248   :  { %2895 = vst [vmem:[#allocation1 + $0x3] ss:$4 sm:$0xff] %v2564_v29  ;;  %1029 = vperm.xlu1 %4318, %v6925_v57   ;;  %v2584_v29 = vperm.slane %v5455_v56, %v4568_v34  ;;  %v2572_v57 = vperm.slane %v5463_v45, %v4570_v35 }
 0x249   :  { %6924 = vst [vmem:[#allocation14_spill] sm:$0xff] %v5811_v23  ;;  %v2588_v23 = vperm.slane %v5455_v56, %v4570_v35 }
 0x24a   :  { %v5805_v30 = vld.sshfl [vmem:[#allocation1 + $0x20] sm:$0xff pattern:$0x73625140]  ;;  %1992 = vperm.xlu0 %4317, %v6926_v40   ;;  %v5821_v22 = vpop.xlane.xlu0 %3236 }
 0x24b   :  { %2886 = vst [vmem:[#allocation1 + $0x20] ss:$4 sm:$0xff] %v2536_v18  ;;  %2049 = vperm.xlu2 %4319, %v5473_v60  }
 0x24c   :  { %2887 = vst [vmem:[#allocation1 + $0x21] ss:$4 sm:$0xff] %v2540_v28  ;;  %v2596_v28 = vperm.slane %v5455_v56, %v4580_v39  ;;  %v5840_v40 = vpop.xlane.xlu1 %3239  ;;  %v6929_v56 = vld [vmem:[#allocation12_spill] sm:$0xff] }
 0x24d   :  { %2888 = vst [vmem:[#allocation1 + $0x22] ss:$4 sm:$0xff] %v2544_v4 }
 0x24e   :  { %2889 = vst [vmem:[#allocation1 + $0x23] ss:$4 sm:$0xff] %v2548_v37  ;;  %v5832_v4 = vpop.permute.xlu2 %963  ;;  %v2568_v37 = vperm.slane %v5463_v45, %v4568_v34 }
 0x24f   :  { %6927 = vst [vmem:[#allocation31_spill] sm:$0xff] %v5821_v22  ;;  %v5824_v18 = vld.sshfl [vmem:[#allocation1] sm:$0xff pattern:$0x73625140] }
 0x250   :  { %2902 = vst [vmem:[#allocation1] ss:$4 sm:$0xff] %v2584_v29  ;;  %v2576_v29 = vperm.slane %v5463_v45, %v4572_v36  ;;  %1971 = vperm.xlu1 %4318, %v6929_v56   ;;  %v2620_v56 = vperm.slane %v5504_v52, %v4570_v35 }
 0x251   :  { %2903 = vst [vmem:[#allocation1 + $0x1] ss:$4 sm:$0xff] %v2588_v23  ;;  %v2580_v23 = vperm.slane %v5463_v45, %v4580_v39  ;;  %v2624_v45 = vperm.slane %v5504_v52, %v4572_v36 }
 0x252   :  { %2904 = vst [vmem:[#allocation1 + $0x2] ss:$4 sm:$0xff] %v2592_v48  ;;  %v6930_v48 = vld [vmem:[#allocation19_spill] sm:$0xff] }
 0x253   :  { %2905 = vst [vmem:[#allocation1 + $0x3] ss:$4 sm:$0xff] %v2596_v28  ;;  %2001 = vperm.xlu0 %4317, %v6930_v48   ;;  %2058 = vperm.xlu2 %4319, %v5553_v10   ;;  %v5849_v28 = vpop.xlane.xlu0 %3242  ;;  %v2628_v10 = vperm.slane %v5504_v52, %v4580_v39 }
 0x254   :  { %6928 = vst [vmem:[#allocation10_spill] sm:$0xff] %v5840_v40  ;;  %v2616_v40 = vperm.slane %v5504_v52, %v4568_v34  ;;  %v5866_v48 = vpop.xlane.xlu1 %3245 }
 0x255   :  { %v5836_v60 = vld.sshfl [vmem:[#allocation1 + $0x20] sm:$0xff pattern:$0x73625140]  ;;  %6931 = vst [vmem:[#allocation15_spill] sm:$0xff] %v5849_v28 }
 0x256   :  { %2896 = vst [vmem:[#allocation1 + $0x20] ss:$4 sm:$0xff] %v2568_v37  ;;  %v5853_v22 = vpop.permute.xlu2 %972  ;;  %v6935_v28 = vld [vmem:[#allocation23_spill] sm:$0xff] }
 0x257   :  { %2897 = vst [vmem:[#allocation1 + $0x21] ss:$4 sm:$0xff] %v2572_v57  ;;  %v6932_v57 = vld [vmem:[#allocation16_spill] sm:$0xff] }
 0x258   :  { %2898 = vst [vmem:[#allocation1 + $0x22] ss:$4 sm:$0xff] %v2576_v29  ;;  %1980 = vperm.xlu1 %4318, %v6932_v57   ;;  %v6933_v29 = vld [vmem:[#allocation33_spill] sm:$0xff] }
 0x259   :  { %2899 = vst [vmem:[#allocation1 + $0x23] ss:$4 sm:$0xff] %v2580_v23  ;;  %v2600_v23 = vperm.slane %v6933_v29, %v4568_v34  ;;  %v2604_v11 = vperm.slane %v6933_v29, %v4570_v35  ;;  %v2608_v52 = vperm.slane %v6933_v29, %v4572_v36 }
 0x25a   :  { %v5855_v37 = vld.sshfl [vmem:[#allocation1] sm:$0xff pattern:$0x73625140]  ;;  %6934 = vst [vmem:[#allocation30_spill] sm:$0xff] %v5866_v48 }
 0x25b   :  { %2912 = vst [vmem:[#allocation1] ss:$4 sm:$0xff] %v2616_v40  ;;  %2010 = vperm.xlu0 %4317, %v6935_v28   ;;  %2976 = vperm.xlu2 %4319, %v5612_v19   ;;  %v2612_v40 = vperm.slane %v6933_v29, %v4580_v39  ;;  %v5880_v28 = vpop.xlane.xlu0 %3248  ;;  %v2652_v19 = vperm.slane %v5488_v53, %v4570_v35 }
 0x25c   :  { %2913 = vst [vmem:[#allocation1 + $0x1] ss:$4 sm:$0xff] %v2620_v56  ;;  %v2660_v29 = vperm.slane %v5488_v53, %v4580_v39 }
 0x25d   :  { %2914 = vst [vmem:[#allocation1 + $0x2] ss:$4 sm:$0xff] %v2624_v45  ;;  %v2648_v45 = vperm.slane %v5488_v53, %v4568_v34 }
 0x25e   :  { %2915 = vst [vmem:[#allocation1 + $0x3] ss:$4 sm:$0xff] %v2628_v10  ;;  %v5878_v56 = vpop.permute.xlu2 %981  ;;  %v6937_v10 = vld [vmem:[#allocation17_spill] sm:$0xff] }
 0x25f   :  { %6936 = vst [vmem:[#allocation13_spill] sm:$0xff] %v5880_v28 }
 0x260   :  { %v5871_v32 = vld.sshfl [vmem:[#allocation1 + $0x20] sm:$0xff pattern:$0x73625140]  ;;  %1989 = vperm.xlu1 %4318, %v6937_v10  }
 0x261   :  { %2906 = vst [vmem:[#allocation1 + $0x20] ss:$4 sm:$0xff] %v2600_v23  ;;  %v6938_v23 = vld [vmem:[#allocation24_spill] sm:$0xff] }
 0x262   :  { %2907 = vst [vmem:[#allocation1 + $0x21] ss:$4 sm:$0xff] %v2604_v11  ;;  %v2656_v11 = vperm.slane %v5488_v53, %v4572_v36  ;;  %v2644_v53 = vperm.slane %v5486_v6, %v4580_v39 }
 0x263   :  { %2908 = vst [vmem:[#allocation1 + $0x22] ss:$4 sm:$0xff] %v2608_v52  ;;  %2019 = vperm.xlu0 %4317, %v6938_v23   ;;  %2985 = vperm.xlu2 %4319, %v5630_v50   ;;  %v5895_v52 = vpop.xlane.xlu1 %3251  ;;  %v2636_v23 = vperm.slane %v5486_v6, %v4570_v35  ;;  %v2640_v50 = vperm.slane %v5486_v6, %v4572_v36 }
 0x264   :  { %2909 = vst [vmem:[#allocation1 + $0x23] ss:$4 sm:$0xff] %v2612_v40  ;;  %v2632_v40 = vperm.slane %v5486_v6, %v4568_v34  ;;  %v2684_v6 = vperm.slane %v5519_v8, %v4570_v35 }
 0x265   :  { %v5887_v57 = vld.sshfl [vmem:[#allocation1] sm:$0xff pattern:$0x73625140]  ;;  %6939 = vst [vmem:[#allocation18_spill] sm:$0xff] %v5895_v52 }
 0x266   :  { %2922 = vst [vmem:[#allocation1] ss:$4 sm:$0xff] %v2648_v45  ;;  %v5903_v28 = vpop.permute.xlu2 %990  ;;  %v5909_v45 = vpop.xlane.xlu0 %3254  ;;  %v6942_v52 = vld [vmem:[#allocation27_spill] sm:$0xff] }
 0x267   :  { %2923 = vst [vmem:[#allocation1 + $0x1] ss:$4 sm:$0xff] %v2652_v19  ;;  %v6941_v19 = vld [vmem:[#allocation20_spill] sm:$0xff] }
 0x268   :  { %2924 = vst [vmem:[#allocation1 + $0x2] ss:$4 sm:$0xff] %v2656_v11  ;;  %1998 = vperm.xlu1 %4318, %v6941_v19   ;;  %v1031_v11 = vlaneseq }
 0x269   :  { %2925 = vst [vmem:[#allocation1 + $0x3] ss:$4 sm:$0xff] %v2660_v29  ;;  %v2680_v29 = vperm.slane %v5519_v8, %v4568_v34 }
 0x26a   :  { %6940 = vst [vmem:[#allocation12_spill] sm:$0xff] %v5909_v45 }
 0x26b   :  { %v5899_v10 = vld.sshfl [vmem:[#allocation1 + $0x20] sm:$0xff pattern:$0x73625140]  ;;  %2028 = vperm.xlu0 %4317, %v6942_v52   ;;  %2994 = vperm.xlu2 %4319, %v5711_v15   ;;  %v2692_v52 = vperm.slane %v5519_v8, %v4580_v39 }
 0x26c   :  { %2916 = vst [vmem:[#allocation1 + $0x20] ss:$4 sm:$0xff] %v2632_v40  ;;  %v2688_v40 = vperm.slane %v5519_v8, %v4572_v36  ;;  %v2672_v8 = vperm.slane %v5534_v58, %v4572_v36 }
 0x26d   :  { %2917 = vst [vmem:[#allocation1 + $0x21] ss:$4 sm:$0xff] %v2636_v23  ;;  %v5922_v23 = vand.u32 127, %v1031_v11  ;;  %v2668_v11 = vperm.slane %v5534_v58, %v4570_v35 }
 0x26e   :  { %2918 = vst [vmem:[#allocation1 + $0x22] ss:$4 sm:$0xff] %v2640_v50  ;;  %v5924_v50 = vpop.xlane.xlu1 %3257  ;;  %v5928_v15 = vpop.permute.xlu2 %999 }
 0x26f   :  { %2919 = vst [vmem:[#allocation1 + $0x23] ss:$4 sm:$0xff] %v2644_v53  ;;  %v2664_v53 = vperm.slane %v5534_v58, %v4568_v34  ;;  %v5933_v19 = vadd.s32 4294967288, %v5922_v23 }
 0x270   :  { %v5916_v48 = vld.sshfl [vmem:[#allocation1] sm:$0xff pattern:$0x73625140]  ;;  %6944 = vst [vmem:[#allocation16_spill] sm:$0xff] %v5924_v50  ;;  %v6946_v50 = vld [vmem:[#allocation21_spill] sm:$0xff] }
 0x271   :  { %6943 = vst [vmem:[#allocation19_spill] sm:$0xff] %v5916_v48  ;;  %2007 = vperm.xlu1 %4318, %v6946_v50   ;;  %v5951_v50 = vadd.s32 4294967280, %v5922_v23 }
 0x272   :  { %2932 = vst [vmem:[#allocation1] ss:$4 sm:$0xff] %v2680_v29  ;;  %v940_v29 = vpop.permute.xlu0 %939 }
 0x273   :  { %2933 = vst [vmem:[#allocation1 + $0x1] ss:$4 sm:$0xff] %v2684_v6  ;;  %v6947_v6 = vld [vmem:[#allocation28_spill] sm:$0xff]  ;;  %3003 = vperm.xlu2 %4319, %v5727_v46   ;;  %v1035_v48 = vperm.slane %v940_v29, %v5933_v19 }
 0x274   :  { %2934 = vst [vmem:[#allocation1 + $0x2] ss:$4 sm:$0xff] %v2688_v40  ;;  %2037 = vperm.xlu0 %4317, %v6947_v6   ;;  %v2676_v40 = vperm.slane %v5534_v58, %v4580_v39  ;;  %v2712_v58 = vperm.slane %v5561_v33, %v4568_v34 }
 0x275   :  { %2935 = vst [vmem:[#allocation1 + $0x3] ss:$4 sm:$0xff] %v2692_v52  ;;  %v5947_v52 = vadd.s32 4294967272, %v5922_v23 }
 0x276   :  { %v5935_v45 = vld.sshfl [vmem:[#allocation1 + $0x20] sm:$0xff pattern:$0x73625140]  ;;  %v943_v6 = vpop.permute.xlu1 %942  ;;  %v5968_v42 = vpop.permute.xlu2 %1008 }
 0x277   :  { %6945 = vst [vmem:[#allocation33_spill] sm:$0xff] %v5935_v45  ;;  %v1039_v46 = vperm.slane %v943_v6, %v5951_v50  ;;  %v1043_v29 = vperm.slane %v5763_v31, %v5947_v52  ;;  %v6949_v6 = vld [vmem:[#allocation25_spill] sm:$0xff] }
 0x278   :  { %2926 = vst [vmem:[#allocation1 + $0x20] ss:$4 sm:$0xff] %v2664_v53  ;;  %v1033_v53 = vperm.slane %v5740_v3, %v5922_v23  ;;  %v2720_v3 = vperm.slane %v5561_v33, %v4572_v36 }
 0x279   :  { %2927 = vst [vmem:[#allocation1 + $0x21] ss:$4 sm:$0xff] %v2668_v11  ;;  %2016 = vperm.xlu1 %4318, %v6949_v6   ;;  %v2756_v6 = vperm.slane %v5546_v51, %v4580_v39 }
 0x27a   :  { %2928 = vst [vmem:[#allocation1 + $0x22] ss:$4 sm:$0xff] %v2672_v8  ;;  %v2716_v8 = vperm.slane %v5561_v33, %v4570_v35 }
 0x27b   :  { %2929 = vst [vmem:[#allocation1 + $0x23] ss:$4 sm:$0xff] %v2676_v40  ;;  %v1037_v40 = vsel %vm1036_vm1, %v1035_v48, %v1033_v53  ;;  %v5976_v48 = vpop.permute.xlu0 %960  ;;  %v2696_v53 = vperm.slane %v5521_v43, %v4568_v34  ;;  %3012 = vperm.xlu2 %4319, %v5805_v30   ;;  %v2744_v30 = vperm.slane %v5546_v51, %v4568_v34 }
 0x27c   :  { %v5958_v11 = vld.sshfl [vmem:[#allocation1] sm:$0xff pattern:$0x73625140]  ;;  %v1041_v45 = vsel %vm1040_vm2, %v1039_v46, %v1037_v40  ;;  %2046 = vperm.xlu0 %4317, %v5492_v38  }
 0x27d   :  { %6948 = vst [vmem:[#allocation23_spill] sm:$0xff] %v5958_v11  ;;  %v2724_v11 = vperm.slane %v5561_v33, %v4580_v39  ;;  %v5974_v31 = vsel %vm1044_vm3, %v1043_v29, %v1041_v45  ;;  %v2704_v33 = vperm.slane %v5521_v43, %v4572_v36  ;;  %v2708_v45 = vperm.slane %v5521_v43, %v4580_v39 }
 0x27e   :  { %2942 = vst [vmem:[#allocation1] ss:$4 sm:$0xff] %v2712_v58  ;;  %v2700_v58 = vperm.slane %v5521_v43, %v4570_v35  ;;  %v5990_v38 = vpop.permute.xlu1 %951  ;;  %v6000_v40 = vpop.permute.xlu2 %1017  ;;  %v2752_v43 = vperm.slane %v5546_v51, %v4572_v36 }
 0x27f   :  { %2943 = vst [vmem:[#allocation1 + $0x1] ss:$4 sm:$0xff] %v2716_v8  ;;  %v6950_v8 = vld [vmem:[#allocation26_spill] sm:$0xff] }
 0x280   :  { %2944 = vst [vmem:[#allocation1 + $0x2] ss:$4 sm:$0xff] %v2720_v3 }
 0x281   :  { %2945 = vst [vmem:[#allocation1 + $0x3] ss:$4 sm:$0xff] %v2724_v11  ;;  %2025 = vperm.xlu1 %4318, %v6950_v8   ;;  %v2748_v11 = vperm.slane %v5546_v51, %v4570_v35  ;;  %v2740_v51 = vperm.slane %v5544_v59, %v4580_v39  ;;  %v2776_v8 = vperm.slane %v5571_v44, %v4568_v34 }
 0x282   :  { %v5984_v46 = vld.sshfl [vmem:[#allocation1 + $0x20] sm:$0xff pattern:$0x73625140] }
 0x283   :  { %2936 = vst [vmem:[#allocation1 + $0x20] ss:$4 sm:$0xff] %v2696_v53  ;;  %3021 = vperm.xlu2 %4319, %v5824_v18   ;;  %v6005_v3 = vpop.permute.xlu0 %969  ;;  %v2732_v18 = vperm.slane %v5544_v59, %v4570_v35 }
 0x284   :  { %2937 = vst [vmem:[#allocation1 + $0x21] ss:$4 sm:$0xff] %v2700_v58  ;;  %2055 = vperm.xlu0 %4317, %v5513_v7   ;;  %v2728_v7 = vperm.slane %v5544_v59, %v4568_v34 }
 0x285   :  { %2938 = vst [vmem:[#allocation1 + $0x22] ss:$4 sm:$0xff] %v2704_v33  ;;  %v2736_v33 = vperm.slane %v5544_v59, %v4572_v36 }
 0x286   :  { %2939 = vst [vmem:[#allocation1 + $0x23] ss:$4 sm:$0xff] %v2708_v45  ;;  %v6011_v53 = vpop.permute.xlu1 %957  ;;  %v6952_v45 = vld [vmem:[#allocation29_spill] sm:$0xff] }
 0x288   :  { %v5998_v29 = vld.sshfl [vmem:[#allocation1] sm:$0xff pattern:$0x73625140] }
 0x289   :  { %6951 = vst [vmem:[#allocation17_spill] sm:$0xff] %v5998_v29  ;;  %2034 = vperm.xlu1 %4318, %v6952_v45   ;;  %v2768_v45 = vperm.slane %v5588_v61, %v4572_v36  ;;  %v6130_v29 = vadd.s32 4294967248, %v5922_v23 }
 0x28a   :  { %2952 = vst [vmem:[#allocation1] ss:$4 sm:$0xff] %v2744_v30  ;;  %v6026_v30 = vpop.permute.xlu2 %1026 }
 0x28b   :  { %2953 = vst [vmem:[#allocation1 + $0x1] ss:$4 sm:$0xff] %v2748_v11  ;;  %3024 = vperm.xlu2 %4319, %v5871_v32   ;;  %v6032_v59 = vpop.permute.xlu0 %978  ;;  %v2788_v32 = vperm.slane %v5571_v44, %v4580_v39 }
 0x28c   :  { %2954 = vst [vmem:[#allocation1 + $0x2] ss:$4 sm:$0xff] %v2752_v43  ;;  %2064 = vperm.xlu0 %4317, %v5583_v20   ;;  %v2780_v43 = vperm.slane %v5571_v44, %v4570_v35  ;;  %v2784_v20 = vperm.slane %v5571_v44, %v4572_v36  ;;  %v2772_v44 = vperm.slane %v5588_v61, %v4580_v39 }
 0x28d   :  { %v6013_v58 = vld.sshfl [vmem:[#allocation1 + $0x20] sm:$0xff pattern:$0x73625140]  ;;  %2955 = vst [vmem:[#allocation1 + $0x3] ss:$4 sm:$0xff] %v2756_v6 }
 0x28e   :  { %2946 = vst [vmem:[#allocation1 + $0x20] ss:$4 sm:$0xff] %v2728_v7  ;;  %v6034_v6 = vpop.permute.xlu1 %966  ;;  %v2760_v7 = vperm.slane %v5588_v61, %v4568_v34 }
 0x28f   :  { %2947 = vst [vmem:[#allocation1 + $0x21] ss:$4 sm:$0xff] %v2732_v18  ;;  %v6954_v18 = vld [vmem:[#allocation32_spill] sm:$0xff] }
 0x290   :  { %2948 = vst [vmem:[#allocation1 + $0x22] ss:$4 sm:$0xff] %v2736_v33 }
 0x291   :  { %2949 = vst [vmem:[#allocation1 + $0x23] ss:$4 sm:$0xff] %v2740_v51  ;;  %2043 = vperm.xlu1 %4318, %v6954_v18   ;;  %v2764_v51 = vperm.slane %v5588_v61, %v4570_v35  ;;  %v3306_v61 = vperm.slane %v5616_v49, %v4572_v36  ;;  %v3310_v18 = vperm.slane %v5616_v49, %v4580_v39 }
 0x293   :  { %3033 = vperm.xlu2 %4319, %v5887_v57   ;;  %v6957_v57 = vld [vmem:[#allocation34_spill] sm:$0xff] }
 0x294   :  { %v6028_v11 = vld.sshfl [vmem:[#allocation1] sm:$0xff pattern:$0x73625140]  ;;  %2973 = vperm.xlu0 %4317, %v5567_v47   ;;  %v988_v47 = vpop.permute.xlu0 %987 }
 0x295   :  { %6953 = vst [vmem:[#allocation24_spill] sm:$0xff] %v6028_v11  ;;  %v3314_v11 = vperm.slane %v5598_v54, %v4568_v34 }
 0x296   :  { %2962 = vst [vmem:[#allocation1] ss:$4 sm:$0xff] %v2776_v8  ;;  %v6053_v8 = vpop.permute.xlu1 %975 }
 0x297   :  { %2963 = vst [vmem:[#allocation1 + $0x1] ss:$4 sm:$0xff] %v2780_v43  ;;  %v6055_v43 = vpop.permute.xlu2 %1974 }
 0x298   :  { %2964 = vst [vmem:[#allocation1 + $0x2] ss:$4 sm:$0xff] %v2784_v20  ;;  %v6043_v33 = vld.sshfl [vmem:[#allocation1 + $0x20] sm:$0xff pattern:$0x73625140]  ;;  %v3298_v20 = vperm.slane %v5616_v49, %v4568_v34 }
 0x299   :  { %6955 = vst [vmem:[#allocation20_spill] sm:$0xff] %v6043_v33  ;;  %2052 = vperm.xlu1 %4318, %v6957_v57  }
 0x29a   :  { %2965 = vst [vmem:[#allocation1 + $0x3] ss:$4 sm:$0xff] %v2788_v32 }
 0x29b   :  { %2956 = vst [vmem:[#allocation1 + $0x20] ss:$4 sm:$0xff] %v2760_v7  ;;  %v3302_v7 = vperm.slane %v5616_v49, %v4570_v35 }
 0x29c   :  { %2957 = vst [vmem:[#allocation1 + $0x21] ss:$4 sm:$0xff] %v2764_v51  ;;  %2982 = vperm.xlu0 %4317, %v5644_v13   ;;  %v6958_v51 = vld [vmem:[#allocation36_spill] sm:$0xff] }
 0x29d   :  { %2958 = vst [vmem:[#allocation1 + $0x22] ss:$4 sm:$0xff] %v2768_v45  ;;  %v2792_v45 = vperm.slane %v6958_v51, %v4568_v34  ;;  %v2800_v57 = vperm.slane %v6958_v51, %v4572_v36  ;;  %v2804_v13 = vperm.slane %v6958_v51, %v4580_v39 }
 0x29e   :  { %2959 = vst [vmem:[#allocation1 + $0x23] ss:$4 sm:$0xff] %v2772_v44  ;;  %v2796_v44 = vperm.slane %v6958_v51, %v4570_v35  ;;  %v1095_v51 = vperm.slane %v988_v47, %v5933_v19  ;;  %v3326_v47 = vperm.slane %v5598_v54, %v4580_v39 }
 0x29f   :  { %v6079_v49 = vpop.permute.xlu2 %1986 }
 0x2a1   :  { %v6059_v32 = vld.sshfl [vmem:[#allocation1] sm:$0xff pattern:$0x73625140] }
 0x2a2   :  { %6956 = vst [vmem:[#allocation27_spill] sm:$0xff] %v6059_v32 }
 0x2a3   :  { %3807 = vst [vmem:[#allocation1] ss:$4 sm:$0xff] %v3298_v20  ;;  %v985_v20 = vpop.permute.xlu1 %984 }
 0x2a4   :  { %3809 = vst [vmem:[#allocation1 + $0x1] ss:$4 sm:$0xff] %v3302_v7  ;;  %v6960_v7 = vld [vmem:[#allocation35_spill] sm:$0xff]  ;;  %2988 = vperm.xlu0 %4317, %v5679_v41  }
 0x2a5   :  { %3811 = vst [vmem:[#allocation1 + $0x2] ss:$4 sm:$0xff] %v3306_v61  ;;  %v6073_v32 = vld.sshfl [vmem:[#allocation1 + $0x20] sm:$0xff pattern:$0x73625140]  ;;  %2061 = vperm.xlu1 %4318, %v6960_v7   ;;  %v997_v61 = vpop.permute.xlu0 %996 }
 0x2a6   :  { %6959 = vst [vmem:[#allocation21_spill] sm:$0xff] %v6073_v32  ;;  %v3330_v32 = vperm.slane %v5596_v16, %v4568_v34 }
 0x2a7   :  { %3813 = vst [vmem:[#allocation1 + $0x3] ss:$4 sm:$0xff] %v3310_v18  ;;  %v1094_v18 = vperm.slane %v985_v20, %v5922_v23  ;;  %v3322_v20 = vperm.slane %v5598_v54, %v4572_v36 }
 0x2a8   :  { %2966 = vst [vmem:[#allocation1 + $0x20] ss:$4 sm:$0xff] %v2792_v45 }
 0x2a9   :  { %2967 = vst [vmem:[#allocation1 + $0x21] ss:$4 sm:$0xff] %v2796_v44  ;;  %v6868_v44 = vmov 0.0   ;;  %v1096_v7 = vsel %vm1036_vm1, %v1095_v51, %v1094_v18  ;;  %v6112_v18 = vadd.s32 4294967256, %v5922_v23  ;;  %v6124_v51 = vadd.s32 4294967240, %v5922_v23 }
 0x2aa   :  { %2968 = vst [vmem:[#allocation1 + $0x22] ss:$4 sm:$0xff] %v2800_v57 }
 0x2ab   :  { %2969 = vst [vmem:[#allocation1 + $0x23] ss:$4 sm:$0xff] %v2804_v13  ;;  %v994_v45 = vpop.permute.xlu1 %993  ;;  %v3318_v13 = vperm.slane %v5598_v54, %v4570_v35  ;;  %v3338_v54 = vperm.slane %v5596_v16, %v4572_v36 }
 0x2ac   :  { %93 = vst [vmem:[#allocation2] sm:$0xff] %v6868_v44  ;;  %v1099_v33 = vperm.slane %v994_v45, %v5947_v52  ;;  %v6104_v44 = vadd.s32 4294967264, %v5922_v23  ;;  %2997 = vperm.xlu0 %4317, %v5698_v1   ;;  %v1051_v1 = vperm.slane %v5990_v38, %v6112_v18 }
 0x2ad   :  { %2979 = vperm.xlu1 %4318, %v5602_v14   ;;  %v6114_v14 = vpop.permute.xlu2 %1995  ;;  %v1006_v45 = vpop.permute.xlu0 %1005 }
 0x2ae   :  { %v6090_v57 = vld.sshfl [vmem:[#allocation1] sm:$0xff pattern:$0x73625140] }
 0x2af   :  { %3824 = vst [vmem:[#allocation1] ss:$4 sm:$0xff] %v3330_v32  ;;  %v3334_v32 = vperm.slane %v5596_v16, %v4570_v35 }
 0x2b0   :  { %3826 = vst [vmem:[#allocation1 + $0x2] ss:$4 sm:$0xff] %v3338_v54  ;;  %v3354_v54 = vperm.slane %v5637_v9, %v4572_v36 }
 0x2b1   :  { %3825 = vst [vmem:[#allocation1 + $0x1] ss:$4 sm:$0xff] %v3334_v32  ;;  %v1059_v32 = vperm.slane %v6011_v53, %v6124_v51  ;;  %v3358_v53 = vperm.slane %v5637_v9, %v4580_v39 }
 0x2b2   :  { %v6094_v41 = vld.sshfl [vmem:[#allocation1 + $0x20] sm:$0xff pattern:$0x73625140] }
 0x2b3   :  { %6961 = vst [vmem:[#allocation28_spill] sm:$0xff] %v6094_v41  ;;  %v1097_v41 = vperm.slane %v5903_v28, %v5951_v50 }
 0x2b4   :  { %3815 = vst [vmem:[#allocation1 + $0x20] ss:$4 sm:$0xff] %v3314_v11  ;;  %v3342_v11 = vperm.slane %v5596_v16, %v4580_v39  ;;  %v1101_v16 = vperm.slane %v997_v61, %v6104_v44  ;;  %v3346_v61 = vperm.slane %v5637_v9, %v4568_v34  ;;  %3006 = vperm.xlu0 %4317, %v5774_v2   ;;  %v6162_v2 = vadd.s32 4294967216, %v5922_v23 }
 0x2b5   :  { %3817 = vst [vmem:[#allocation1 + $0x21] ss:$4 sm:$0xff] %v3318_v13  ;;  %v1098_v28 = vsel %vm1040_vm2, %v1097_v41, %v1096_v7  ;;  %v1003_v41 = vpop.permute.xlu1 %1002  ;;  %2991 = vperm.xlu1 %4318, %v5663_v25  }
 0x2b6   :  { %3819 = vst [vmem:[#allocation1 + $0x22] ss:$4 sm:$0xff] %v3322_v20  ;;  %v1100_v13 = vsel %vm1044_vm3, %v1099_v33, %v1098_v28  ;;  %v1047_v20 = vperm.slane %v5786_v17, %v6104_v44  ;;  %v1105_v33 = vperm.slane %v1003_v41, %v6130_v29  ;;  %v6158_v28 = vadd.s32 4294967232, %v5922_v23 }
 0x2b7   :  { %3821 = vst [vmem:[#allocation1 + $0x23] ss:$4 sm:$0xff] %v3326_v47  ;;  %v1102_v7 = vsel %vm1048_vm4, %v1101_v16, %v1100_v13  ;;  %v1103_v47 = vperm.slane %v5928_v15, %v6112_v18  ;;  %v3350_v15 = vperm.slane %v5637_v9, %v4570_v35  ;;  %v6166_v13 = vadd.s32 4294967224, %v5922_v23  ;;  %v6170_v16 = vpop.permute.xlu2 %2004 }
 0x2b8   :  { %3827 = vst [vmem:[#allocation1 + $0x3] ss:$4 sm:$0xff] %v3342_v11  ;;  %v1049_v38 = vsel %vm1048_vm4, %v1047_v20, %v5974_v31  ;;  %v1055_v31 = vperm.slane %v5813_v26, %v6130_v29  ;;  %v1107_v20 = vperm.slane %v1006_v45, %v6124_v51  ;;  %v3362_v41 = vperm.slane %v5625_v5, %v4568_v34 }
 0x2b9   :  { %v1053_v17 = vsel %vm1052_vm5, %v1051_v1, %v1049_v38  ;;  %v1104_v25 = vsel %vm1052_vm5, %v1103_v47, %v1102_v7  ;;  %v1063_v38 = vperm.slane %v5976_v48, %v6158_v28  ;;  %v1015_v7 = vpop.permute.xlu0 %1014  ;;  %v3370_v45 = vperm.slane %v5625_v5, %v4572_v36 }
 0x2ba   :  { %v1057_v26 = vsel %vm1056_vm6, %v1055_v31, %v1053_v17  ;;  %v1106_v1 = vsel %vm1056_vm6, %v1105_v33, %v1104_v25  ;;  %v3366_v17 = vperm.slane %v5625_v5, %v4570_v35  ;;  %v1109_v31 = vperm.slane %v5968_v42, %v6158_v28 }
 0x2bb   :  { %v1061_v9 = vsel %vm1060_vm7, %v1059_v32, %v1057_v26  ;;  %v1108_v32 = vsel %vm1060_vm7, %v1107_v20, %v1106_v1  ;;  %v1067_v25 = vperm.slane %v5832_v4, %v6166_v13  ;;  %v6201_v26 = vadd.s32 4294967192, %v5922_v23 }
 0x2bc   :  { %v1065_v48 = vsel %vm1064_vm8, %v1063_v38, %v1061_v9  ;;  %v1110_v42 = vsel %vm1064_vm8, %v1109_v31, %v1108_v32  ;;  %3015 = vperm.xlu0 %4317, %v5792_v27   ;;  %v6205_v4 = vadd.s32 4294967200, %v5922_v23  ;;  %v1113_v1 = vperm.slane %v1015_v7, %v6162_v2 }
 0x2bd   :  { %v1012_v33 = vpop.permute.xlu1 %1011  ;;  %3000 = vperm.xlu1 %4318, %v5742_v63   ;;  %v3378_v27 = vperm.slane %v5623_v0, %v4568_v34  ;;  %v3382_v20 = vperm.slane %v5623_v0, %v4570_v35  ;;  %v3390_v31 = vperm.slane %v5623_v0, %v4580_v39 }
 0x2be   :  { %v6155_v11 = vld.sshfl [vmem:[#allocation1 + $0x20] sm:$0xff pattern:$0x73625140] }
 0x2bf   :  { %3828 = vst [vmem:[#allocation1 + $0x20] ss:$4 sm:$0xff] %v3346_v61  ;;  %v6176_v47 = vld.sshfl [vmem:[#allocation1] sm:$0xff pattern:$0x73625140]  ;;  %v1111_v61 = vperm.slane %v1012_v33, %v6166_v13  ;;  %v6225_v32 = vpop.permute.xlu2 %2013 }
 0x2c0   :  { %3829 = vst [vmem:[#allocation1 + $0x21] ss:$4 sm:$0xff] %v3350_v15  ;;  %v1071_v15 = vperm.slane %v6034_v6, %v6162_v2  ;;  %v1069_v6 = vsel %vm1068_vm9, %v1067_v25, %v1065_v48  ;;  %v6241_v25 = vadd.s32 4294967184, %v5922_v23 }
 0x2c1   :  { %3830 = vst [vmem:[#allocation1 + $0x22] ss:$4 sm:$0xff] %v3354_v54  ;;  %v3374_v54 = vperm.slane %v5625_v5, %v4580_v39  ;;  %v1112_v5 = vsel %vm1068_vm9, %v1111_v61, %v1110_v42  ;;  %v1024_v48 = vpop.permute.xlu0 %1023 }
 0x2c2   :  { %3831 = vst [vmem:[#allocation1 + $0x23] ss:$4 sm:$0xff] %v3358_v53  ;;  %v6195_v53 = vadd.s32 4294967208, %v5922_v23  ;;  %v1073_v63 = vsel %vm1072_vm10, %v1071_v15, %v1069_v6  ;;  %v1114_v33 = vsel %vm1072_vm10, %v1113_v1, %v1112_v5  ;;  %v3394_v15 = vperm.slane %v5658_v21, %v4568_v34 }
 0x2c3   :  { %3834 = vst [vmem:[#allocation1] ss:$4 sm:$0xff] %v3362_v41  ;;  %v3386_v41 = vperm.slane %v5623_v0, %v4572_v36  ;;  %v3402_v0 = vperm.slane %v5658_v21, %v4572_v36  ;;  %v6249_v5 = vadd.s32 4294967176, %v5922_v23  ;;  %v3406_v1 = vperm.slane %v5658_v21, %v4580_v39 }
 0x2c4   :  { %3835 = vst [vmem:[#allocation1 + $0x1] ss:$4 sm:$0xff] %v3366_v17  ;;  %v1075_v9 = vperm.slane %v6005_v3, %v6195_v53  ;;  %v1115_v38 = vperm.slane %v6000_v40, %v6195_v53  ;;  %v1083_v3 = vperm.slane %v6053_v8, %v6201_v26  ;;  %v1079_v40 = vperm.slane %v5853_v22, %v6205_v4 }
 0x2c5   :  { %3836 = vst [vmem:[#allocation1 + $0x2] ss:$4 sm:$0xff] %v3370_v45  ;;  %v1021_v17 = vpop.permute.xlu1 %1020  ;;  %v3398_v8 = vperm.slane %v5658_v21, %v4570_v35  ;;  %3009 = vperm.xlu1 %4318, %v5759_v55   ;;  %3027 = vperm.xlu0 %4317, %v5855_v37  }
 0x2c6   :  { %3837 = vst [vmem:[#allocation1 + $0x3] ss:$4 sm:$0xff] %v3374_v54  ;;  %v1077_v7 = vsel %vm1076_vm11, %v1075_v9, %v1073_v63  ;;  %v1117_v61 = vperm.slane %v1021_v17, %v6205_v4  ;;  %v1116_v54 = vsel %vm1076_vm11, %v1115_v38, %v1114_v33  ;;  %v1119_v63 = vperm.slane %v1024_v48, %v6201_v26  ;;  %v223_v33 = vld [vmem:[#allocation2] sm:$0x3] }
 0x2c7   :  { %v1081_v22 = vsel %vm1080_vm12, %v1079_v40, %v1077_v7  ;;  %v1121_v9 = vperm.slane %v6026_v30, %v6241_v25  ;;  %v1091_v38 = vperm.slane %v5878_v56, %v6249_v5  ;;  %v3414_v30 = vperm.slane %v5650_v24, %v4570_v35  ;;  %v6269_v7 = vpop.permute.xlu2 %2022 }
 0x2c8   :  { %v1118_v42 = vsel %vm1080_vm12, %v1117_v61, %v1116_v54  ;;  %v1085_v55 = vsel %vm1084_vm13, %v1083_v3, %v1081_v22  ;;  %v3418_v56 = vperm.slane %v5650_v24, %v4572_v36  ;;  %v2067_v22 = vperm.slane %v6055_v43, %v5933_v19 }
 0x2c9   :  { %v6220_v45 = vld.sshfl [vmem:[#allocation1 + $0x20] sm:$0xff pattern:$0x73625140]  ;;  %v1120_v37 = vsel %vm1084_vm13, %v1119_v63, %v1118_v42  ;;  %v3438_v42 = vperm.slane %v5648_v62, %v4580_v39  ;;  %v6299_v63 = vpop.permute.xlu0 %1977  ;;  %v3442_v43 = vperm.slane %v5687_v12, %v4568_v34 }
 0x2ca   :  { %3838 = vst [vmem:[#allocation1 + $0x20] ss:$4 sm:$0xff] %v3378_v27  ;;  %v1087_v27 = vperm.slane %v6032_v59, %v6241_v25  ;;  %v3410_v59 = vperm.slane %v5650_v24, %v4568_v34  ;;  %v1122_v17 = vsel %vm1088_vm14, %v1121_v9, %v1120_v37  ;;  %v3450_v37 = vperm.slane %v5687_v12, %v4572_v36 }
 0x2cb   :  { %3839 = vst [vmem:[#allocation1 + $0x21] ss:$4 sm:$0xff] %v3382_v20 }
 0x2cc   :  { %3840 = vst [vmem:[#allocation1 + $0x22] ss:$4 sm:$0xff] %v3386_v41  ;;  %v1089_v20 = vsel %vm1088_vm14, %v1087_v27, %v1085_v55 }
 0x2cd   :  { %3841 = vst [vmem:[#allocation1 + $0x23] ss:$4 sm:$0xff] %v3390_v31  ;;  %v6246_v6 = vld.sshfl [vmem:[#allocation1] sm:$0xff pattern:$0x73625140]  ;;  %v1030_v41 = vpop.permute.xlu1 %1029  ;;  %v1093_v3 = vsel %vm1092_vm15, %v1091_v38, %v1089_v20  ;;  %3018 = vperm.xlu1 %4318, %v5836_v60   ;;  %3975 = vperm.xlu0 %4317, %v6090_v57   ;;  %v3430_v60 = vperm.slane %v5648_v62, %v4570_v35 }
 0x2ce   :  { %3844 = vst [vmem:[#allocation1] ss:$4 sm:$0xff] %v3394_v15  ;;  %v1123_v21 = vperm.slane %v1030_v41, %v6249_v5  ;;  %v3422_v15 = vperm.slane %v5650_v24, %v4580_v39  ;;  %v3434_v57 = vperm.slane %v5648_v62, %v4572_v36 }
 0x2cf   :  { %3845 = vst [vmem:[#allocation1 + $0x1] ss:$4 sm:$0xff] %v3398_v8  ;;  %v3426_v8 = vperm.slane %v5648_v62, %v4568_v34  ;;  %v3446_v62 = vperm.slane %v5687_v12, %v4570_v35 }
 0x2d0   :  { %3846 = vst [vmem:[#allocation1 + $0x2] ss:$4 sm:$0xff] %v3402_v0  ;;  %v1124_v61 = vsel %vm1092_vm15, %v1123_v21, %v1122_v17 }
 0x2d1   :  { %3847 = vst [vmem:[#allocation1 + $0x3] ss:$4 sm:$0xff] %v3406_v1  ;;  %v1126_v40 = vsel %vm1125_vm0, %v1124_v61, %v1093_v3  ;;  %v6302_v1 = vpop.permute.xlu2 %2031  ;;  %v1984_v21 = vpop.permute.xlu0 %1983 }
 0x2d2   :  { %v1128_v48 = vadd.f32 %v1126_v40, %v223_v33  ;;  %v6963_v33 = vld [vmem:[#allocation37_spill] sm:$0xff] }
 0x2d3   :  { %v3474_v17 = vperm.slane %v6963_v33, %v4568_v34  ;;  %v3486_v61 = vperm.slane %v6963_v33, %v4580_v39 }
 0x2d4   :  { %v6273_v31 = vld.sshfl [vmem:[#allocation1 + $0x20] sm:$0xff pattern:$0x73625140]  ;;  %1129 = vst [vmem:[#allocation2] sm:$0x3] %v1128_v48 }
 0x2d5   :  { %3848 = vst [vmem:[#allocation1 + $0x20] ss:$4 sm:$0xff] %v3410_v59  ;;  %v1972_v0 = vpop.permute.xlu1 %1971  ;;  %3030 = vperm.xlu1 %4318, %v5899_v10   ;;  %3978 = vperm.xlu0 %4317, %v6155_v11   ;;  %v3454_v10 = vperm.slane %v5687_v12, %v4580_v39  ;;  %v6962_v11 = vld [vmem:[#allocation38_spill] sm:$0xff] }
 0x2d6   :  { %3849 = vst [vmem:[#allocation1 + $0x21] ss:$4 sm:$0xff] %v3414_v30  ;;  %v2066_v24 = vperm.slane %v1972_v0, %v5922_v23  ;;  %v3458_v9 = vperm.slane %v6962_v11, %v4568_v34  ;;  %v3462_v20 = vperm.slane %v6962_v11, %v4570_v35  ;;  %v3466_v38 = vperm.slane %v6962_v11, %v4572_v36 }
 0x2d7   :  { %3850 = vst [vmem:[#allocation1 + $0x22] ss:$4 sm:$0xff] %v3418_v56  ;;  %v3470_v12 = vperm.slane %v6962_v11, %v4580_v39  ;;  %v3478_v30 = vperm.slane %v6963_v33, %v4570_v35  ;;  %v6964_v56 = vld [vmem:[#allocation41_spill] sm:$0xff] }
 0x2d8   :  { %v6284_v54 = vld.sshfl [vmem:[#allocation1] sm:$0xff pattern:$0x73625140]  ;;  %3851 = vst [vmem:[#allocation1 + $0x23] ss:$4 sm:$0xff] %v3422_v15  ;;  %v6296_v55 = vsel %vm1036_vm1, %v2067_v22, %v2066_v24  ;;  %v3490_v40 = vperm.slane %v6964_v56, %v4568_v34  ;;  %v3494_v48 = vperm.slane %v6964_v56, %v4570_v35 }
 0x2d9   :  { %3854 = vst [vmem:[#allocation1] ss:$4 sm:$0xff] %v3426_v8  ;;  %v6325_v59 = vpop.permute.xlu2 %2040  ;;  %v3498_v8 = vperm.slane %v6964_v56, %v4572_v36  ;;  %v1993_v0 = vpop.permute.xlu0 %1992  ;;  %v6965_v22 = vld [vmem:[#allocation40_spill] sm:$0xff] }
 0x2da   :  { %3855 = vst [vmem:[#allocation1 + $0x1] ss:$4 sm:$0xff] %v3430_v60  ;;  %v3502_v60 = vperm.slane %v6964_v56, %v4580_v39  ;;  %v3506_v24 = vperm.slane %v6965_v22, %v4568_v34  ;;  %v2073_v56 = vperm.slane %v1984_v21, %v6104_v44 }
 0x2db   :  { %3856 = vst [vmem:[#allocation1 + $0x2] ss:$4 sm:$0xff] %v3434_v57 }
 0x2dc   :  { %3857 = vst [vmem:[#allocation1 + $0x3] ss:$4 sm:$0xff] %v3438_v42  ;;  %v3510_v42 = vperm.slane %v6965_v22, %v4570_v35 }
 0x2dd   :  { %3981 = vperm.xlu0 %4317, %v6176_v47   ;;  %v3482_v47 = vperm.slane %v6963_v33, %v4572_v36 }
 0x2df   :  { %v6308_v27 = vld.sshfl [vmem:[#allocation1 + $0x20] sm:$0xff pattern:$0x73625140] }
 0x2e0   :  { %3858 = vst [vmem:[#allocation1 + $0x20] ss:$4 sm:$0xff] %v3442_v43 }
 0x2e1   :  { %3859 = vst [vmem:[#allocation1 + $0x21] ss:$4 sm:$0xff] %v3446_v62  ;;  %v6347_v57 = vpop.permute.xlu2 %2049  ;;  %v3514_v62 = vperm.slane %v6965_v22, %v4572_v36  ;;  %v6369_v33 = vpop.permute.xlu0 %2001 }
 0x2e2   :  { %3860 = vst [vmem:[#allocation1 + $0x22] ss:$4 sm:$0xff] %v3450_v37  ;;  %v3518_v37 = vperm.slane %v6965_v22, %v4580_v39 }
 0x2e3   :  { %3861 = vst [vmem:[#allocation1 + $0x23] ss:$4 sm:$0xff] %v3454_v10  ;;  %v6318_v41 = vld.sshfl [vmem:[#allocation1] sm:$0xff pattern:$0x73625140]  ;;  %v6966_v10 = vld [vmem:[#allocation6_spill] sm:$0xff] }
 0x2e4   :  { %3864 = vst [vmem:[#allocation1] ss:$4 sm:$0xff] %v3458_v9  ;;  %v3522_v11 = vperm.slane %v6966_v10, %v4568_v34  ;;  %v2069_v9 = vperm.slane %v6299_v63, %v5951_v50  ;;  %v3534_v63 = vperm.slane %v6966_v10, %v4580_v39 }
 0x2e5   :  { %3865 = vst [vmem:[#allocation1 + $0x1] ss:$4 sm:$0xff] %v3462_v20  ;;  %v3526_v20 = vperm.slane %v6966_v10, %v4570_v35 }
 0x2e6   :  { %3866 = vst [vmem:[#allocation1 + $0x2] ss:$4 sm:$0xff] %v3466_v38 }
 0x2e7   :  { %3867 = vst [vmem:[#allocation1 + $0x3] ss:$4 sm:$0xff] %v3470_v12  ;;  %v3530_v12 = vperm.slane %v6966_v10, %v4572_v36  ;;  %v6970_v10 = vld [vmem:[#allocation22_spill] sm:$0xff] }
 0x2ea   :  { %v6331_v3 = vld.sshfl [vmem:[#allocation1 + $0x20] sm:$0xff pattern:$0x73625140] }
 0x2eb   :  { %3868 = vst [vmem:[#allocation1 + $0x20] ss:$4 sm:$0xff] %v3474_v17  ;;  %v1981_v17 = vpop.permute.xlu1 %1980 }
 0x2ec   :  { %3869 = vst [vmem:[#allocation1 + $0x21] ss:$4 sm:$0xff] %v3478_v30  ;;  %v2070_v30 = vsel %vm1040_vm2, %v2069_v9, %v6296_v55 }
 0x2ed   :  { %3870 = vst [vmem:[#allocation1 + $0x22] ss:$4 sm:$0xff] %v3482_v47  ;;  %v2071_v47 = vperm.slane %v1981_v17, %v5947_v52  ;;  %v2079_v17 = vperm.slane %v1993_v0, %v6124_v51  ;;  %v6972_v0 = vld [vmem:[#allocation8_spill] sm:$0xff] }
 0x2ee   :  { %3871 = vst [vmem:[#allocation1 + $0x23] ss:$4 sm:$0xff] %v3486_v61  ;;  %v6341_v15 = vld.sshfl [vmem:[#allocation1] sm:$0xff pattern:$0x73625140]  ;;  %v6376_v61 = vpop.permute.xlu2 %2058 }
 0x2ef   :  { %3874 = vst [vmem:[#allocation1] ss:$4 sm:$0xff] %v3490_v40  ;;  %v2072_v40 = vsel %vm1044_vm3, %v2071_v47, %v2070_v30 }
 0x2f0   :  { %3875 = vst [vmem:[#allocation1 + $0x1] ss:$4 sm:$0xff] %v3494_v48  ;;  %v2074_v48 = vsel %vm1048_vm4, %v2073_v56, %v2072_v40  ;;  %v3566_v56 = vperm.slane %v6970_v10, %v4580_v39 }
 0x2f1   :  { %3876 = vst [vmem:[#allocation1 + $0x2] ss:$4 sm:$0xff] %v3498_v8  ;;  %v6968_v8 = vld [vmem:[#allocation43_spill] sm:$0xff] }
 0x2f2   :  { %3877 = vst [vmem:[#allocation1 + $0x3] ss:$4 sm:$0xff] %v3502_v60  ;;  %v3538_v55 = vperm.slane %v6968_v8, %v4568_v34  ;;  %v3542_v60 = vperm.slane %v6968_v8, %v4570_v35  ;;  %v3550_v21 = vperm.slane %v6968_v8, %v4580_v39 }
 0x2f5   :  { %v6353_v43 = vld.sshfl [vmem:[#allocation1 + $0x20] sm:$0xff pattern:$0x73625140] }
 0x2f6   :  { %3878 = vst [vmem:[#allocation1 + $0x20] ss:$4 sm:$0xff] %v3506_v24  ;;  %v3546_v24 = vperm.slane %v6968_v8, %v4572_v36 }
 0x2f7   :  { %3879 = vst [vmem:[#allocation1 + $0x21] ss:$4 sm:$0xff] %v3510_v42  ;;  %v2075_v42 = vperm.slane %v6079_v49, %v6112_v18 }
 0x2f8   :  { %3880 = vst [vmem:[#allocation1 + $0x22] ss:$4 sm:$0xff] %v3514_v62  ;;  %v6393_v62 = vpop.permute.xlu0 %2010 }
 0x2f9   :  { %3881 = vst [vmem:[#allocation1 + $0x23] ss:$4 sm:$0xff] %v3518_v37  ;;  %v6365_v38 = vld.sshfl [vmem:[#allocation1] sm:$0xff pattern:$0x73625140]  ;;  %v1990_v37 = vpop.permute.xlu1 %1989  ;;  %v2076_v49 = vsel %vm1052_vm5, %v2075_v42, %v2074_v48  ;;  %v3570_v48 = vperm.slane %v6972_v0, %v4568_v34  ;;  %v3578_v42 = vperm.slane %v6972_v0, %v4572_v36 }
 0x2fa   :  { %6967 = vst [vmem:[#allocation25_spill] sm:$0xff] %v6365_v38  ;;  %v2077_v9 = vperm.slane %v1990_v37, %v6130_v29  ;;  %v3582_v37 = vperm.slane %v6972_v0, %v4580_v39 }
 0x2fb   :  { %3884 = vst [vmem:[#allocation1] ss:$4 sm:$0xff] %v3522_v11  ;;  %v3554_v11 = vperm.slane %v6970_v10, %v4568_v34 }
 0x2fc   :  { %3885 = vst [vmem:[#allocation1 + $0x1] ss:$4 sm:$0xff] %v3526_v20  ;;  %v6398_v20 = vpop.permute.xlu2 %2976  ;;  %v2078_v47 = vsel %vm1056_vm6, %v2077_v9, %v2076_v49 }
 0x2fd   :  { %3886 = vst [vmem:[#allocation1 + $0x2] ss:$4 sm:$0xff] %v3530_v12  ;;  %v3558_v12 = vperm.slane %v6970_v10, %v4570_v35  ;;  %v6412_v40 = vsel %vm1060_vm7, %v2079_v17, %v2078_v47 }
 0x2fe   :  { %3887 = vst [vmem:[#allocation1 + $0x3] ss:$4 sm:$0xff] %v3534_v63  ;;  %v3562_v63 = vperm.slane %v6970_v10, %v4572_v36  ;;  %v6974_v10 = vld [vmem:[#allocation7_spill] sm:$0xff] }
 0x2ff   :  { %v3590_v9 = vperm.slane %v6974_v10, %v4570_v35  ;;  %v3594_v17 = vperm.slane %v6974_v10, %v4572_v36  ;;  %v3598_v49 = vperm.slane %v6974_v10, %v4580_v39 }
 0x300   :  { %v6385_v22 = vld.sshfl [vmem:[#allocation1 + $0x20] sm:$0xff pattern:$0x73625140]  ;;  %v6416_v8 = vpop.permute.xlu0 %2019 }
 0x301   :  { %6969 = vst [vmem:[#allocation26_spill] sm:$0xff] %v6385_v22  ;;  %v2097_v22 = vperm.slane %v6416_v8, %v5922_v23 }
 0x302   :  { %3888 = vst [vmem:[#allocation1 + $0x20] ss:$4 sm:$0xff] %v3538_v55  ;;  %v6418_v55 = vpop.permute.xlu1 %1998 }
 0x303   :  { %3889 = vst [vmem:[#allocation1 + $0x21] ss:$4 sm:$0xff] %v3542_v60  ;;  %v3574_v60 = vperm.slane %v6972_v0, %v4570_v35  ;;  %v6975_v0 = vld [vmem:[#allocation11_spill] sm:$0xff] }
 0x304   :  { %3890 = vst [vmem:[#allocation1 + $0x22] ss:$4 sm:$0xff] %v3546_v24 }
 0x305   :  { %3891 = vst [vmem:[#allocation1 + $0x23] ss:$4 sm:$0xff] %v3550_v21  ;;  %v6404_v30 = vld.sshfl [vmem:[#allocation1] sm:$0xff pattern:$0x73625140]  ;;  %v6424_v21 = vpop.permute.xlu2 %2985 }
 0x306   :  { %6971 = vst [vmem:[#allocation29_spill] sm:$0xff] %v6404_v30 }
 0x307   :  { %3894 = vst [vmem:[#allocation1] ss:$4 sm:$0xff] %v3554_v11  ;;  %v3586_v11 = vperm.slane %v6974_v10, %v4568_v34  ;;  %v3614_v10 = vperm.slane %v6975_v0, %v4580_v39 }
 0x308   :  { %3895 = vst [vmem:[#allocation1 + $0x1] ss:$4 sm:$0xff] %v3558_v12 }
 0x309   :  { %3896 = vst [vmem:[#allocation1 + $0x2] ss:$4 sm:$0xff] %v3562_v63  ;;  %v6438_v63 = vpop.permute.xlu0 %2028 }
 0x30a   :  { %3897 = vst [vmem:[#allocation1 + $0x3] ss:$4 sm:$0xff] %v3566_v56  ;;  %v6440_v47 = vpop.permute.xlu1 %2007 }
 0x30c   :  { %v6422_v24 = vld.sshfl [vmem:[#allocation1 + $0x20] sm:$0xff pattern:$0x73625140] }
 0x30d   :  { %6973 = vst [vmem:[#allocation32_spill] sm:$0xff] %v6422_v24  ;;  %v6442_v56 = vpop.permute.xlu2 %2994 }
 0x30e   :  { %3898 = vst [vmem:[#allocation1 + $0x20] ss:$4 sm:$0xff] %v3570_v48  ;;  %v3602_v48 = vperm.slane %v6975_v0, %v4568_v34 }
 0x30f   :  { %3899 = vst [vmem:[#allocation1 + $0x21] ss:$4 sm:$0xff] %v3574_v60  ;;  %v3606_v60 = vperm.slane %v6975_v0, %v4570_v35 }
 0x310   :  { %3900 = vst [vmem:[#allocation1 + $0x22] ss:$4 sm:$0xff] %v3578_v42 }
 0x311   :  { %3901 = vst [vmem:[#allocation1 + $0x23] ss:$4 sm:$0xff] %v3582_v37  ;;  %v3902_v12 = vld.sshfl [vmem:[#allocation1] sm:$0xff pattern:$0x73625140]  ;;  %v3610_v37 = vperm.slane %v6975_v0, %v4572_v36 }
 0x312   :  { %3904 = vst [vmem:[#allocation1] ss:$4 sm:$0xff] %v3586_v11  ;;  %4023 = vperm.xlu1 %4318, %v3902_v12   ;;  %v6976_v11 = vld [vmem:[#allocation39_spill] sm:$0xff]  ;;  %v6458_v24 = vpop.permute.xlu1 %2016 }
 0x313   :  { %3905 = vst [vmem:[#allocation1 + $0x1] ss:$4 sm:$0xff] %v3590_v9  ;;  %v3618_v9 = vperm.slane %v6976_v11, %v4568_v34  ;;  %v3622_v12 = vperm.slane %v6976_v11, %v4570_v35 }
 0x314   :  { %3906 = vst [vmem:[#allocation1 + $0x2] ss:$4 sm:$0xff] %v3594_v17 }
 0x315   :  { %3907 = vst [vmem:[#allocation1 + $0x3] ss:$4 sm:$0xff] %v3598_v49  ;;  %v6456_v49 = vpop.permute.xlu0 %2037  ;;  %v6462_v0 = vpop.permute.xlu2 %3003 }
 0x316   :  { %6977 = vst [vmem:[#allocation34_spill] sm:$0xff] %v6462_v0 }
 0x318   :  { %v3903_v42 = vld.sshfl [vmem:[#allocation1 + $0x20] sm:$0xff pattern:$0x73625140] }
 0x319   :  { %4026 = vperm.xlu2 %4319, %v3903_v42   ;;  %3908 = vst [vmem:[#allocation1 + $0x20] ss:$4 sm:$0xff] %v3602_v48  ;;  %v3626_v48 = vperm.slane %v6976_v11, %v4572_v36  ;;  %v6978_v42 = vld [vmem:[#allocation9_spill] sm:$0xff] }
 0x31a   :  { %3909 = vst [vmem:[#allocation1 + $0x21] ss:$4 sm:$0xff] %v3606_v60  ;;  %v3630_v60 = vperm.slane %v6976_v11, %v4580_v39  ;;  %v2026_v11 = vpop.permute.xlu1 %2025 }
 0x31b   :  { %3910 = vst [vmem:[#allocation1 + $0x22] ss:$4 sm:$0xff] %v3610_v37  ;;  %v3634_v37 = vperm.slane %v6978_v42, %v4568_v34  ;;  %v2100_v38 = vperm.slane %v2026_v11, %v5951_v50  ;;  %v2102_v11 = vperm.slane %v6438_v63, %v5947_v52 }
 0x31c   :  { %3911 = vst [vmem:[#allocation1 + $0x23] ss:$4 sm:$0xff] %v3614_v10  ;;  %v3912_v17 = vld.sshfl [vmem:[#allocation1] sm:$0xff pattern:$0x73625140]  ;;  %v3638_v10 = vperm.slane %v6978_v42, %v4570_v35 }
 0x31d   :  { %3914 = vst [vmem:[#allocation1] ss:$4 sm:$0xff] %v3618_v9  ;;  %4029 = vperm.xlu1 %4318, %v3912_v17   ;;  %v3642_v9 = vperm.slane %v6978_v42, %v4572_v36  ;;  %v6473_v17 = vpop.permute.xlu0 %2046 }
 0x31e   :  { %3915 = vst [vmem:[#allocation1 + $0x1] ss:$4 sm:$0xff] %v3622_v12  ;;  %v3646_v12 = vperm.slane %v6978_v42, %v4580_v39 }
 0x31f   :  { %3916 = vst [vmem:[#allocation1 + $0x2] ss:$4 sm:$0xff] %v3626_v48  ;;  %v6980_v48 = vld [vmem:[#allocation14_spill] sm:$0xff] }
 0x320   :  { %3917 = vst [vmem:[#allocation1 + $0x3] ss:$4 sm:$0xff] %v3630_v60  ;;  %v3650_v60 = vperm.slane %v6980_v48, %v4568_v34  ;;  %v3658_v42 = vperm.slane %v6980_v48, %v4572_v36 }
 0x321   :  { %3984 = vperm.xlu2 %4319, %v6220_v45   ;;  %v6478_v45 = vpop.permute.xlu2 %3012 }
 0x322   :  { %6979 = vst [vmem:[#allocation36_spill] sm:$0xff] %v6478_v45 }
 0x323   :  { %v3913_v30 = vld.sshfl [vmem:[#allocation1 + $0x20] sm:$0xff pattern:$0x73625140] }
 0x324   :  { %3918 = vst [vmem:[#allocation1 + $0x20] ss:$4 sm:$0xff] %v3634_v37  ;;  %4032 = vperm.xlu0 %4317, %v3913_v30   ;;  %v3654_v30 = vperm.slane %v6980_v48, %v4570_v35 }
 0x325   :  { %3919 = vst [vmem:[#allocation1 + $0x21] ss:$4 sm:$0xff] %v3638_v10  ;;  %3987 = vperm.xlu1 %4318, %v6246_v6   ;;  %v2098_v6 = vperm.slane %v6269_v7, %v5933_v19  ;;  %v3662_v10 = vperm.slane %v6980_v48, %v4580_v39  ;;  %v6498_v45 = vpop.permute.xlu0 %2055  ;;  %v2035_v7 = vpop.permute.xlu1 %2034 }
 0x326   :  { %3920 = vst [vmem:[#allocation1 + $0x22] ss:$4 sm:$0xff] %v3642_v9 }
 0x327   :  { %v3922_v37 = vld.sshfl [vmem:[#allocation1] sm:$0xff pattern:$0x73625140]  ;;  %3921 = vst [vmem:[#allocation1 + $0x23] ss:$4 sm:$0xff] %v3646_v12  ;;  %v2099_v8 = vsel %vm1036_vm1, %v2098_v6, %v2097_v22  ;;  %v6981_v12 = vld [vmem:[#allocation33_spill] sm:$0xff] }
 0x328   :  { %3924 = vst [vmem:[#allocation1] ss:$4 sm:$0xff] %v3650_v60  ;;  %v2101_v9 = vsel %vm1040_vm2, %v2100_v38, %v2099_v8  ;;  %v6982_v60 = vld [vmem:[#allocation31_spill] sm:$0xff] }
 0x329   :  { %4035 = vperm.xlu2 %4319, %v3922_v37   ;;  %3925 = vst [vmem:[#allocation1 + $0x1] ss:$4 sm:$0xff] %v3654_v30  ;;  %v3666_v0 = vperm.slane %v6982_v60, %v4568_v34  ;;  %v3022_v48 = vpop.permute.xlu2 %3021  ;;  %v3670_v22 = vperm.slane %v6982_v60, %v4570_v35  ;;  %v2103_v38 = vsel %vm1044_vm3, %v2102_v11, %v2101_v9 }
 0x32a   :  { %3926 = vst [vmem:[#allocation1 + $0x2] ss:$4 sm:$0xff] %v3658_v42  ;;  %v2106_v37 = vperm.slane %v2035_v7, %v6112_v18  ;;  %v3674_v63 = vperm.slane %v6982_v60, %v4572_v36  ;;  %v2104_v42 = vperm.slane %v6302_v1, %v6104_v44  ;;  %v3678_v6 = vperm.slane %v6982_v60, %v4580_v39  ;;  %v6984_v60 = vld [vmem:[#allocation19_spill] sm:$0xff] }
 0x32b   :  { %3927 = vst [vmem:[#allocation1 + $0x3] ss:$4 sm:$0xff] %v3662_v10 }
 0x32c   :  { %3036 = vperm.xlu0 %4317, %v6981_v12   ;;  %v2105_v8 = vsel %vm1048_vm4, %v2104_v42, %v2103_v38  ;;  %v2083_v38 = vperm.slane %v6418_v55, %v6166_v13  ;;  %v2081_v42 = vperm.slane %v6114_v14, %v6158_v28  ;;  %v6985_v55 = vld [vmem:[#allocation15_spill] sm:$0xff] }
 0x32d   :  { %3990 = vperm.xlu1 %4318, %v6273_v31   ;;  %v6983_v31 = vld [vmem:[#allocation10_spill] sm:$0xff]  ;;  %v2107_v12 = vsel %vm1052_vm5, %v2106_v37, %v2105_v8  ;;  %v3698_v8 = vperm.slane %v6985_v55, %v4568_v34  ;;  %v3702_v14 = vperm.slane %v6985_v55, %v4570_v35 }
 0x32e   :  { %v3923_v30 = vld.sshfl [vmem:[#allocation1 + $0x20] sm:$0xff pattern:$0x73625140]  ;;  %v3682_v10 = vperm.slane %v6983_v31, %v4568_v34  ;;  %v3686_v9 = vperm.slane %v6983_v31, %v4570_v35  ;;  %v3690_v1 = vperm.slane %v6983_v31, %v4572_v36  ;;  %v3694_v7 = vperm.slane %v6983_v31, %v4580_v39 }
 0x32f   :  { %3928 = vst [vmem:[#allocation1 + $0x20] ss:$4 sm:$0xff] %v3666_v0  ;;  %v2108_v0 = vperm.slane %v6456_v49, %v6130_v29  ;;  %v3099_v31 = vperm.slane %v3022_v48, %v5922_v23 }
 0x330   :  { %3929 = vst [vmem:[#allocation1 + $0x21] ss:$4 sm:$0xff] %v3670_v22  ;;  %v6526_v22 = vpop.permute.xlu0 %2064 }
 0x331   :  { %4038 = vperm.xlu2 %4319, %v3923_v30   ;;  %3930 = vst [vmem:[#allocation1 + $0x22] ss:$4 sm:$0xff] %v3674_v63  ;;  %v2044_v30 = vpop.permute.xlu1 %2043  ;;  %v2109_v37 = vsel %vm1056_vm6, %v2108_v0, %v2107_v12  ;;  %v3025_v49 = vpop.permute.xlu2 %3024  ;;  %v3706_v0 = vperm.slane %v6985_v55, %v4572_v36 }
 0x332   :  { %3931 = vst [vmem:[#allocation1 + $0x23] ss:$4 sm:$0xff] %v3678_v6  ;;  %v3932_v11 = vld.sshfl [vmem:[#allocation1] sm:$0xff pattern:$0x73625140]  ;;  %v2112_v63 = vperm.slane %v2044_v30, %v6158_v28  ;;  %v2110_v6 = vperm.slane %v6325_v59, %v6124_v51 }
 0x333   :  { %3934 = vst [vmem:[#allocation1] ss:$4 sm:$0xff] %v3682_v10  ;;  %v3100_v10 = vperm.slane %v3025_v49, %v5933_v19 }
 0x334   :  { %3935 = vst [vmem:[#allocation1 + $0x1] ss:$4 sm:$0xff] %v3686_v9  ;;  %3039 = vperm.xlu0 %4317, %v6984_v60   ;;  %v2111_v9 = vsel %vm1060_vm7, %v2110_v6, %v2109_v37  ;;  %v6986_v60 = vld [vmem:[#allocation30_spill] sm:$0xff]  ;;  %v2116_v37 = vperm.slane %v6347_v57, %v6162_v2  ;;  %v2089_v6 = vperm.slane %v6440_v47, %v6205_v4 }
 0x335   :  { %3936 = vst [vmem:[#allocation1 + $0x2] ss:$4 sm:$0xff] %v3690_v1  ;;  %3993 = vperm.xlu1 %4318, %v6284_v54   ;;  %v2082_v54 = vsel %vm1064_vm8, %v2081_v42, %v6412_v40  ;;  %v6545_v12 = vsel %vm1036_vm1, %v3100_v10, %v3099_v31  ;;  %v2113_v1 = vsel %vm1064_vm8, %v2112_v63, %v2111_v9 }
 0x336   :  { %3937 = vst [vmem:[#allocation1 + $0x3] ss:$4 sm:$0xff] %v3694_v7  ;;  %v2084_v59 = vsel %vm1068_vm9, %v2083_v38, %v2082_v54  ;;  %v2085_v40 = vperm.slane %v6369_v33, %v6162_v2  ;;  %v2114_v7 = vperm.slane %v6473_v17, %v6166_v13  ;;  %v3714_v30 = vperm.slane %v6986_v60, %v4568_v34 }
 0x337   :  { %v3718_v38 = vperm.slane %v6986_v60, %v4570_v35  ;;  %v3069_v33 = vperm.slane %v6398_v20, %v5933_v19  ;;  %v3722_v10 = vperm.slane %v6986_v60, %v4572_v36 }
 0x338   :  { %v2086_v63 = vsel %vm1072_vm10, %v2085_v40, %v2084_v59  ;;  %v2115_v17 = vsel %vm1068_vm9, %v2114_v7, %v2113_v1  ;;  %v2974_v49 = vpop.permute.xlu0 %2973  ;;  %v6987_v59 = vld [vmem:[#allocation13_spill] sm:$0xff]  ;;  %v2122_v7 = vperm.slane %v6376_v61, %v6201_v26 }
 0x339   :  { %4041 = vperm.xlu2 %4319, %v3932_v11   ;;  %v3933_v48 = vld.sshfl [vmem:[#allocation1 + $0x20] sm:$0xff pattern:$0x73625140]  ;;  %v3710_v11 = vperm.slane %v6985_v55, %v4580_v39  ;;  %v2053_v42 = vpop.permute.xlu1 %2052  ;;  %v3068_v57 = vperm.slane %v2974_v49, %v5922_v23  ;;  %v3726_v55 = vperm.slane %v6986_v60, %v4580_v39  ;;  %v3730_v1 = vperm.slane %v6987_v59, %v4568_v34 }
 0x33a   :  { %3938 = vst [vmem:[#allocation1 + $0x20] ss:$4 sm:$0xff] %v3698_v8  ;;  %v2118_v20 = vperm.slane %v2053_v42, %v6195_v53  ;;  %v2117_v8 = vsel %vm1072_vm10, %v2116_v37, %v2115_v17  ;;  %v3734_v40 = vperm.slane %v6987_v59, %v4570_v35  ;;  %v2095_v60 = vperm.slane %v6458_v24, %v6249_v5  ;;  %v6989_v17 = vld [vmem:[#allocation18_spill] sm:$0xff] }
 0x33b   :  { %3939 = vst [vmem:[#allocation1 + $0x21] ss:$4 sm:$0xff] %v3702_v14  ;;  %v3070_v47 = vsel %vm1036_vm1, %v3069_v33, %v3068_v57  ;;  %v2091_v14 = vperm.slane %v6393_v62, %v6201_v26  ;;  %v2093_v37 = vperm.slane %v6225_v32, %v6241_v25  ;;  %v3742_v33 = vperm.slane %v6987_v59, %v4580_v39  ;;  %v1258_v32 = vld [vmem:[#allocation2 + $0x2] sm:$0x3] }
 0x33c   :  { %3940 = vst [vmem:[#allocation1 + $0x22] ss:$4 sm:$0xff] %v3706_v0  ;;  %3042 = vperm.xlu0 %4317, %v5984_v46   ;;  %v2087_v46 = vperm.slane %v6170_v16, %v6195_v53  ;;  %v2119_v54 = vsel %vm1076_vm11, %v2118_v20, %v2117_v8  ;;  %v2120_v16 = vperm.slane %v6498_v45, %v6205_v4 }
 0x33d   :  { %3941 = vst [vmem:[#allocation1 + $0x23] ss:$4 sm:$0xff] %v3710_v11  ;;  %v3942_v31 = vld.sshfl [vmem:[#allocation1] sm:$0xff pattern:$0x73625140]  ;;  %3996 = vperm.xlu1 %4318, %v6308_v27   ;;  %v3738_v11 = vperm.slane %v6987_v59, %v4572_v36  ;;  %v2126_v24 = vperm.slane %v6526_v22, %v6249_v5  ;;  %v3746_v49 = vperm.slane %v6989_v17, %v4568_v34 }
 0x33e   :  { %3944 = vst [vmem:[#allocation1] ss:$4 sm:$0xff] %v3714_v30  ;;  %v2088_v27 = vsel %vm1076_vm11, %v2087_v46, %v2086_v63  ;;  %v2121_v0 = vsel %vm1080_vm12, %v2120_v16, %v2119_v54  ;;  %v6988_v30 = vld [vmem:[#allocation23_spill] sm:$0xff] }
 0x33f   :  { %3945 = vst [vmem:[#allocation1 + $0x1] ss:$4 sm:$0xff] %v3718_v38  ;;  %v2090_v9 = vsel %vm1080_vm12, %v2089_v6, %v2088_v27  ;;  %v2123_v63 = vsel %vm1084_vm13, %v2122_v7, %v2121_v0  ;;  %v3750_v6 = vperm.slane %v6989_v17, %v4570_v35  ;;  %v6991_v7 = vld [vmem:[#allocation16_spill] sm:$0xff] }
 0x340   :  { %3946 = vst [vmem:[#allocation1 + $0x2] ss:$4 sm:$0xff] %v3722_v10  ;;  %v2983_v62 = vpop.permute.xlu0 %2982  ;;  %v3754_v10 = vperm.slane %v6989_v17, %v4572_v36 }
 0x341   :  { %4044 = vperm.xlu2 %4319, %v3933_v48   ;;  %3947 = vst [vmem:[#allocation1 + $0x3] ss:$4 sm:$0xff] %v3726_v55  ;;  %v2092_v48 = vsel %vm1084_vm13, %v2091_v14, %v2090_v9  ;;  %v2062_v38 = vpop.permute.xlu1 %2061  ;;  %v3758_v55 = vperm.slane %v6989_v17, %v4580_v39  ;;  %v3073_v14 = vperm.slane %v2983_v62, %v5947_v52 }
 0x342   :  { %v2124_v61 = vperm.slane %v2062_v38, %v6241_v25  ;;  %v2094_v42 = vsel %vm1088_vm14, %v2093_v37, %v2092_v48  ;;  %v3778_v48 = vperm.slane %v6991_v7, %v4568_v34  ;;  %v3786_v38 = vperm.slane %v6991_v7, %v4572_v36 }
 0x343   :  { %v2096_v57 = vsel %vm1092_vm15, %v2095_v60, %v2094_v42  ;;  %v3075_v60 = vperm.slane %v6424_v21, %v6104_v44  ;;  %v3790_v21 = vperm.slane %v6991_v7, %v4580_v39  ;;  %v6993_v42 = vld [vmem:[#allocation42_spill] sm:$0xff] }
 0x344   :  { %v3943_v45 = vld.sshfl [vmem:[#allocation1 + $0x20] sm:$0xff pattern:$0x73625140]  ;;  %3045 = vperm.xlu0 %4317, %v6988_v30  }
 0x345   :  { %3948 = vst [vmem:[#allocation1 + $0x20] ss:$4 sm:$0xff] %v3730_v1  ;;  %3999 = vperm.xlu1 %4318, %v6318_v41   ;;  %v2125_v41 = vsel %vm1088_vm14, %v2124_v61, %v2123_v63  ;;  %v3081_v63 = vperm.slane %v6442_v56, %v6124_v51  ;;  %v3806_v56 = vperm.slane %v6993_v42, %v4580_v39 }
 0x346   :  { %3949 = vst [vmem:[#allocation1 + $0x21] ss:$4 sm:$0xff] %v3734_v40  ;;  %v2127_v22 = vsel %vm1092_vm15, %v2126_v24, %v2125_v41 }
 0x347   :  { %3950 = vst [vmem:[#allocation1 + $0x22] ss:$4 sm:$0xff] %v3738_v11  ;;  %v2128_v46 = vsel %vm1125_vm0, %v2127_v22, %v2096_v57  ;;  %v6992_v11 = vld [vmem:[#allocation17_spill] sm:$0xff]  ;;  %v3802_v57 = vperm.slane %v6993_v42, %v4572_v36  ;;  %v6994_v22 = vld [vmem:[#allocation20_spill] sm:$0xff] }
 0x348   :  { %3951 = vst [vmem:[#allocation1 + $0x23] ss:$4 sm:$0xff] %v3742_v33  ;;  %v3952_v20 = vld.sshfl [vmem:[#allocation1] sm:$0xff pattern:$0x73625140]  ;;  %v2130_v8 = vadd.f32 %v2128_v46, %v1258_v32  ;;  %v2989_v27 = vpop.permute.xlu0 %2988  ;;  %v3794_v32 = vperm.slane %v6993_v42, %v4568_v34 }
 0x349   :  { %4047 = vperm.xlu2 %4319, %v3942_v31   ;;  %3954 = vst [vmem:[#allocation1] ss:$4 sm:$0xff] %v3746_v49  ;;  %v2980_v54 = vpop.permute.xlu1 %2979  ;;  %v6990_v31 = vld [vmem:[#allocation12_spill] sm:$0xff]  ;;  %v3077_v62 = vperm.slane %v2989_v27, %v6112_v18 }
 0x34a   :  { %3955 = vst [vmem:[#allocation1 + $0x1] ss:$4 sm:$0xff] %v3750_v6  ;;  %v3071_v9 = vperm.slane %v2980_v54, %v5951_v50  ;;  %v3762_v16 = vperm.slane %v6990_v31, %v4568_v34  ;;  %v3766_v59 = vperm.slane %v6990_v31, %v4570_v35  ;;  %v3774_v40 = vperm.slane %v6990_v31, %v4580_v39  ;;  %v6996_v27 = vld [vmem:[#allocation24_spill] sm:$0xff] }
 0x34b   :  { %3956 = vst [vmem:[#allocation1 + $0x2] ss:$4 sm:$0xff] %v3754_v10 }
 0x34c   :  { %3957 = vst [vmem:[#allocation1 + $0x3] ss:$4 sm:$0xff] %v3758_v55  ;;  %3048 = vperm.xlu0 %4317, %v6013_v58   ;;  %v3072_v0 = vsel %vm1040_vm2, %v3071_v9, %v3070_v47  ;;  %v3770_v58 = vperm.slane %v6990_v31, %v4572_v36  ;;  %v3782_v47 = vperm.slane %v6991_v7, %v4570_v35 }
 0x34d   :  { %4002 = vperm.xlu1 %4318, %v6331_v3   ;;  %2131 = vst [vmem:[#allocation2 + $0x2] sm:$0x3] %v2130_v8  ;;  %v3074_v3 = vsel %vm1044_vm3, %v3073_v14, %v3072_v0  ;;  %v6998_v14 = vld [vmem:[#allocation36_spill] sm:$0xff] }
 0x34e   :  { %v3076_v61 = vsel %vm1048_vm4, %v3075_v60, %v3074_v3  ;;  %v3034_v3 = vpop.permute.xlu2 %3033 }
 0x34f   :  { %v3953_v1 = vld.sshfl [vmem:[#allocation1 + $0x20] sm:$0xff pattern:$0x73625140]  ;;  %v3078_v33 = vsel %vm1052_vm5, %v3077_v62, %v3076_v61 }
 0x350   :  { %3958 = vst [vmem:[#allocation1 + $0x20] ss:$4 sm:$0xff] %v3762_v16 }
 0x351   :  { %4050 = vperm.xlu2 %4319, %v3943_v45   ;;  %3959 = vst [vmem:[#allocation1 + $0x21] ss:$4 sm:$0xff] %v3766_v59  ;;  %v2998_v45 = vpop.permute.xlu0 %2997  ;;  %v2992_v37 = vpop.permute.xlu1 %2991  ;;  %v3093_v59 = vperm.slane %v6998_v14, %v6201_v26 }
 0x352   :  { %3960 = vst [vmem:[#allocation1 + $0x22] ss:$4 sm:$0xff] %v3770_v58  ;;  %v3079_v24 = vperm.slane %v2992_v37, %v6130_v29  ;;  %v3083_v6 = vperm.slane %v2998_v45, %v6158_v28  ;;  %v7001_v37 = vld [vmem:[#allocation27_spill] sm:$0xff] }
 0x353   :  { %3961 = vst [vmem:[#allocation1 + $0x23] ss:$4 sm:$0xff] %v3774_v40  ;;  %v3962_v30 = vld.sshfl [vmem:[#allocation1] sm:$0xff pattern:$0x73625140]  ;;  %v6999_v40 = vld [vmem:[#allocation21_spill] sm:$0xff] }
 0x354   :  { %3051 = vperm.xlu0 %4317, %v6992_v11   ;;  %3964 = vst [vmem:[#allocation1] ss:$4 sm:$0xff] %v3778_v48  ;;  %v3080_v17 = vsel %vm1056_vm6, %v3079_v24, %v3078_v33  ;;  %v7002_v33 = vld [vmem:[#allocation29_spill] sm:$0xff] }
 0x355   :  { %3965 = vst [vmem:[#allocation1 + $0x1] ss:$4 sm:$0xff] %v3782_v47  ;;  %4005 = vperm.xlu1 %4318, %v6341_v15   ;;  %v3082_v49 = vsel %vm1060_vm7, %v3081_v63, %v3080_v17  ;;  %v3798_v15 = vperm.slane %v6993_v42, %v4570_v35  ;;  %v7000_v47 = vld [vmem:[#allocation26_spill] sm:$0xff]  ;;  %v7003_v42 = vld [vmem:[#allocation28_spill] sm:$0xff] }
 0x356   :  { %3966 = vst [vmem:[#allocation1 + $0x2] ss:$4 sm:$0xff] %v3786_v38  ;;  %v3084_v34 = vsel %vm1064_vm8, %v3083_v6, %v3082_v49 }
 0x357   :  { %3967 = vst [vmem:[#allocation1 + $0x3] ss:$4 sm:$0xff] %v3790_v21 }
 0x359   :  { %4053 = vperm.xlu2 %4319, %v3952_v20   ;;  %v3007_v10 = vpop.permute.xlu0 %3006  ;;  %v3001_v46 = vpop.permute.xlu1 %3000  ;;  %v6995_v20 = vld [vmem:[#allocation34_spill] sm:$0xff] }
 0x35a   :  { %v3963_v41 = vld.sshfl [vmem:[#allocation1 + $0x20] sm:$0xff pattern:$0x73625140]  ;;  %v3085_v35 = vperm.slane %v3001_v46, %v6166_v13  ;;  %v3087_v55 = vperm.slane %v6995_v20, %v6162_v2  ;;  %v3089_v8 = vperm.slane %v3007_v10, %v6195_v53 }
 0x35b   :  { %3968 = vst [vmem:[#allocation1 + $0x20] ss:$4 sm:$0xff] %v3794_v32 }
 0x35c   :  { %3054 = vperm.xlu0 %4317, %v6994_v22   ;;  %3969 = vst [vmem:[#allocation1 + $0x21] ss:$4 sm:$0xff] %v3798_v15  ;;  %v3086_v36 = vsel %vm1068_vm9, %v3085_v35, %v3084_v34  ;;  %v7004_v15 = vld [vmem:[#allocation32_spill] sm:$0xff] }
 0x35d   :  { %3970 = vst [vmem:[#allocation1 + $0x22] ss:$4 sm:$0xff] %v3802_v57  ;;  %4008 = vperm.xlu1 %4318, %v6353_v43   ;;  %v3088_v39 = vsel %vm1072_vm10, %v3087_v55, %v3086_v36  ;;  %v6997_v43 = vld [vmem:[#allocation25_spill] sm:$0xff] }
 0x35e   :  { %3971 = vst [vmem:[#allocation1 + $0x23] ss:$4 sm:$0xff] %v3806_v56  ;;  %v3090_v31 = vsel %vm1076_vm11, %v3089_v8, %v3088_v39  ;;  %v3972_v17 = vld.sshfl [vmem:[#allocation1] sm:$0xff pattern:$0x73625140]  ;;  %v3106_v39 = vperm.slane %v3034_v3, %v6104_v44 }
 0x361   :  { %4056 = vperm.xlu2 %4319, %v3953_v1   ;;  %v3016_v54 = vpop.permute.xlu0 %3015  ;;  %v3010_v9 = vpop.permute.xlu1 %3009 }
 0x362   :  { %v3091_v16 = vperm.slane %v3010_v9, %v6205_v4  ;;  %v3095_v1 = vperm.slane %v3016_v54, %v6241_v25 }
 0x364   :  { %3057 = vperm.xlu0 %4317, %v6996_v27   ;;  %v3092_v0 = vsel %vm1080_vm12, %v3091_v16, %v3090_v31 }
 0x365   :  { %4011 = vperm.xlu1 %4318, %v6997_v43   ;;  %v3094_v58 = vsel %vm1084_vm13, %v3093_v59, %v3092_v0  ;;  %v3973_v57 = vld.sshfl [vmem:[#allocation1 + $0x20] sm:$0xff pattern:$0x73625140] }
 0x366   :  { %v3096_v60 = vsel %vm1088_vm14, %v3095_v1, %v3094_v58 }
 0x369   :  { %4059 = vperm.xlu2 %4319, %v3962_v30   ;;  %v3028_v7 = vpop.permute.xlu0 %3027  ;;  %v3019_v48 = vpop.permute.xlu1 %3018 }
 0x36a   :  { %v3102_v62 = vperm.slane %v3028_v7, %v5951_v50  ;;  %v3097_v38 = vperm.slane %v3019_v48, %v6249_v5 }
 0x36c   :  { %3060 = vperm.xlu0 %4317, %v6999_v40   ;;  %v3103_v11 = vsel %vm1040_vm2, %v3102_v62, %v6545_v12  ;;  %v6694_v30 = vsel %vm1092_vm15, %v3097_v38, %v3096_v60 }
 0x36d   :  { %4014 = vperm.xlu1 %4318, %v7000_v47  }
 0x371   :  { %4062 = vperm.xlu2 %4319, %v3963_v41   ;;  %v3976_v61 = vpop.permute.xlu0 %3975  ;;  %v3031_v21 = vpop.permute.xlu1 %3030 }
 0x372   :  { %v3104_v24 = vperm.slane %v3031_v21, %v5947_v52  ;;  %v4070_v32 = vperm.slane %v3976_v61, %v5922_v23 }
 0x373   :  { %v4027_v45 = vpop.permute.xlu2 %4026 }
 0x374   :  { %3063 = vperm.xlu0 %4317, %v7001_v37   ;;  %v3105_v63 = vsel %vm1044_vm3, %v3104_v24, %v3103_v11  ;;  %v4102_v46 = vperm.slane %v4027_v45, %v5933_v19 }
 0x375   :  { %4017 = vperm.xlu1 %4318, %v7002_v33   ;;  %v3107_v54 = vsel %vm1048_vm4, %v3106_v39, %v3105_v63 }
 0x379   :  { %4065 = vperm.xlu2 %4319, %v3972_v17   ;;  %v3979_v12 = vpop.permute.xlu0 %3978 }
 0x37a   :  { %v4071_v41 = vperm.slane %v3979_v12, %v5933_v19 }
 0x37b   :  { %v3985_v49 = vpop.permute.xlu2 %3984 }
 0x37c   :  { %3066 = vperm.xlu0 %4317, %v7003_v42   ;;  %v4072_v6 = vsel %vm1036_vm1, %v4071_v41, %v4070_v32  ;;  %v4075_v8 = vperm.slane %v3985_v49, %v5947_v52 }
 0x37d   :  { %4020 = vperm.xlu1 %4318, %v7004_v15  }
 0x381   :  { %4068 = vperm.xlu2 %4319, %v3973_v57   ;;  %v3982_v10 = vpop.permute.xlu0 %3981 }
 0x382   :  { %v4073_v35 = vperm.slane %v3982_v10, %v5951_v50 }
 0x383   :  { %v4036_v56 = vpop.permute.xlu2 %4035 }
 0x384   :  { %v4024_v22 = vpop.permute.xlu1 %4023  ;;  %v4074_v55 = vsel %vm1040_vm2, %v4073_v35, %v4072_v6  ;;  %v4108_v0 = vperm.slane %v4036_v56, %v6104_v44  ;;  %v4140_v35 = vld [vmem:[%s6840_s4] sm:$0xff] }
 0x385   :  { %v4101_v34 = vperm.slane %v4024_v22, %v5922_v23  ;;  %v4076_v27 = vsel %vm1044_vm3, %v4075_v8, %v4074_v55  ;;  %v4142_v55 = vld [vmem:[%s6840_s4 + $0x10] sm:$0xff]  ;;  %4169 = vmatpush.xpose.msra.mxu0 %v4140_v35  ;;  %v4143_v8 = vld [vmem:[%s6840_s4 + $0x18] sm:$0xff] }
 0x386   :  { %4209 = vmatpush.xpose.msra.mxu2 %v4142_v55  ;;  %4229 = vmatpush.xpose.msra.mxu3 %v4143_v8  ;;  %v2260_v55 = vld [vmem:[#allocation2 + $0x4] sm:$0x3] }
 0x387   :  { %v4103_v20 = vsel %vm1036_vm1, %v4102_v46, %v4101_v34  ;;  %vm4263_vm1 = vcmp.ge.s32.totalorder %v5922_v23, 2 }
 0x38b   :  { %v4039_v36 = vpop.permute.xlu2 %4038 }
 0x38c   :  { %v4110_v1 = vperm.slane %v4039_v36, %v6112_v18 }
 0x38f   :  { %v4030_v9 = vpop.permute.xlu1 %4029 }
 0x390   :  { %v4104_v19 = vperm.slane %v4030_v9, %v5951_v50 }
 0x392   :  { %v4105_v31 = vsel %vm1040_vm2, %v4104_v19, %v4103_v20  ;;  %v4141_v20 = vld [vmem:[%s6840_s4 + $0x8] sm:$0xff]  ;;  %s4357_s4 = smov [#allocation3]  }
 0x393   :  { %v4042_v43 = vpop.permute.xlu2 %4041  ;;  %4189 = vmatpush.xpose.msra.mxu1 %v4141_v20  ;;  %s4274_s15 = sshll.u32 %s4357_s4, 4  ;;  %s4275_s15 = int_to_ptr.vmem [resolvable:$true] %s4274_s15 }
 0x394   :  { %v4112_v10 = vperm.slane %v4042_v43, %v6130_v29 }
 0x396   :  { %v4033_v16 = vpop.permute.xlu0 %4032 }
 0x397   :  { %v4106_v14 = vperm.slane %v4033_v16, %v5947_v52  ;;  %v3988_v59 = vpop.permute.xlu1 %3987 }
 0x398   :  { %v4077_v58 = vperm.slane %v3988_v59, %v6104_v44 }
 0x399   :  { %v4107_v3 = vsel %vm1044_vm3, %v4106_v14, %v4105_v31 }
 0x39a   :  { %v4109_v40 = vsel %vm1048_vm4, %v4108_v0, %v4107_v3  ;;  %v4078_v7 = vsel %vm1048_vm4, %v4077_v58, %v4076_v27 }
 0x39b   :  { %v4045_v50 = vpop.permute.xlu2 %4044  ;;  %v4111_v48 = vsel %vm1052_vm5, %v4110_v1, %v4109_v40 }
 0x39c   :  { %v4113_v46 = vsel %vm1056_vm6, %v4112_v10, %v4111_v48  ;;  %v4114_v36 = vperm.slane %v4045_v50, %v6124_v51 }
 0x39e   :  { %v3037_v60 = vpop.permute.xlu0 %3036  ;;  %v4115_v27 = vsel %vm1060_vm7, %v4114_v36, %v4113_v46 }
 0x39f   :  { %v3108_v47 = vperm.slane %v3037_v60, %v6112_v18  ;;  %v3991_v52 = vpop.permute.xlu1 %3990 }
 0x3a0   :  { %v4079_v62 = vperm.slane %v3991_v52, %v6112_v18 }
 0x3a1   :  { %v3109_v38 = vsel %vm1052_vm5, %v3108_v47, %v3107_v54 }
 0x3a2   :  { %v4080_v44 = vsel %vm1052_vm5, %v4079_v62, %v4078_v7  ;;  %vm4267_vm5 = vcmask 58368  }
 0x3a3   :  { %v4048_v11 = vpop.permute.xlu2 %4047 }
 0x3a4   :  { %v4116_v9 = vperm.slane %v4048_v11, %v6158_v28 }
 0x3a6   :  { %v3040_v45 = vpop.permute.xlu0 %3039  ;;  %v4117_v43 = vsel %vm1064_vm8, %v4116_v9, %v4115_v27 }
 0x3a7   :  { %v3994_v37 = vpop.permute.xlu1 %3993  ;;  %v3110_v19 = vperm.slane %v3040_v45, %v6130_v29 }
 0x3a8   :  { %v4081_v31 = vperm.slane %v3994_v37, %v6130_v29 }
 0x3a9   :  { %v3111_v29 = vsel %vm1056_vm6, %v3110_v19, %v3109_v38 }
 0x3aa   :  { %v4082_v50 = vsel %vm1056_vm6, %v4081_v31, %v4080_v44 }
 0x3ab   :  { %v4051_v21 = vpop.permute.xlu2 %4050 }
 0x3ac   :  { %v4118_v0 = vperm.slane %v4051_v21, %v6166_v13 }
 0x3ae   :  { %v3043_v61 = vpop.permute.xlu0 %3042  ;;  %v4119_v7 = vsel %vm1068_vm9, %v4118_v0, %v4117_v43 }
 0x3af   :  { %v3997_v33 = vpop.permute.xlu1 %3996  ;;  %v3112_v14 = vperm.slane %v3043_v61, %v6124_v51 }
 0x3b0   :  { %v4083_v59 = vperm.slane %v3997_v33, %v6124_v51 }
 0x3b1   :  { %v3113_v47 = vsel %vm1060_vm7, %v3112_v14, %v3111_v29 }
 0x3b2   :  { %v4084_v52 = vsel %vm1060_vm7, %v4083_v59, %v4082_v50 }
 0x3b3   :  { %v4054_v17 = vpop.permute.xlu2 %4053 }
 0x3b4   :  { %v4120_v16 = vperm.slane %v4054_v17, %v6162_v2 }
 0x3b6   :  { %v3046_v24 = vpop.permute.xlu0 %3045  ;;  %v4121_v51 = vsel %vm1072_vm10, %v4120_v16, %v4119_v7 }
 0x3b7   :  { %v4000_v63 = vpop.permute.xlu1 %3999  ;;  %v3114_v58 = vperm.slane %v3046_v24, %v6158_v28 }
 0x3b8   :  { %v4085_v1 = vperm.slane %v4000_v63, %v6158_v28 }
 0x3b9   :  { %v3115_v62 = vsel %vm1064_vm8, %v3114_v58, %v3113_v47 }
 0x3ba   :  { %v4086_v11 = vsel %vm1064_vm8, %v4085_v1, %v4084_v52 }
 0x3bb   :  { %v6728_v12 = vpop.permute.xlu2 %4056 }
 0x3be   :  { %v3049_v49 = vpop.permute.xlu0 %3048 }
 0x3bf   :  { %v4003_v42 = vpop.permute.xlu1 %4002  ;;  %v3116_v3 = vperm.slane %v3049_v49, %v6166_v13 }
 0x3c0   :  { %v4087_v48 = vperm.slane %v4003_v42, %v6166_v13  ;;  %v4122_v13 = vperm.slane %v6728_v12, %v6195_v53 }
 0x3c1   :  { %v3117_v45 = vsel %vm1068_vm9, %v3116_v3, %v3115_v62 }
 0x3c2   :  { %v4088_v33 = vsel %vm1068_vm9, %v4087_v48, %v4086_v11 }
 0x3c3   :  { %v6732_v18 = vpop.permute.xlu2 %4059 }
 0x3c4   :  { %v4124_v21 = vperm.slane %v6732_v18, %v6205_v4  ;;  %v4123_v18 = vsel %vm1076_vm11, %v4122_v13, %v4121_v51 }
 0x3c6   :  { %v3052_v32 = vpop.permute.xlu0 %3051 }
 0x3c7   :  { %v6730_v15 = vpop.permute.xlu1 %4005  ;;  %v3118_v28 = vperm.slane %v3052_v32, %v6162_v2 }
 0x3c8   :  { %v4089_v38 = vperm.slane %v6730_v15, %v6162_v2 }
 0x3ca   :  { %v4090_v32 = vsel %vm1072_vm10, %v4089_v38, %v4088_v33  ;;  %v4253_v38 = vand.u32 1, %v5922_v23 }
 0x3cb   :  { %v6738_v56 = vpop.permute.xlu2 %4062 }
 0x3cc   :  { %v4126_v17 = vperm.slane %v6738_v56, %v6201_v26  ;;  %vm4261_vm2 = vcmp.eq.s32.totalorder %v4253_v38, 0 }
 0x3ce   :  { %v3055_v41 = vpop.permute.xlu0 %3054 }
 0x3cf   :  { %v6734_v6 = vpop.permute.xlu1 %4008  ;;  %v3120_v44 = vperm.slane %v3055_v41, %v6195_v53 }
 0x3d0   :  { %v4091_v37 = vperm.slane %v6734_v6, %v6195_v53  ;;  %v3119_v53 = vsel %vm1072_vm10, %v3118_v28, %v3117_v45 }
 0x3d1   :  { %v3121_v15 = vsel %vm1076_vm11, %v3120_v44, %v3119_v53 }
 0x3d2   :  { %v4092_v6 = vsel %vm1076_vm11, %v4091_v37, %v4090_v32 }
 0x3d3   :  { %v4066_v54 = vpop.permute.xlu2 %4065 }
 0x3d4   :  { %v4128_v12 = vperm.slane %v4066_v54, %v6241_v25  ;;  %v3262_v54 = vld [vmem:[#allocation2 + $0x6] sm:$0x3] }
 0x3d6   :  { %v6736_v57 = vpop.permute.xlu0 %3057 }
 0x3d7   :  { %v6740_v22 = vpop.permute.xlu1 %4011  ;;  %v3122_v61 = vperm.slane %v6736_v57, %v6205_v4 }
 0x3d8   :  { %v4093_v2 = vperm.slane %v6740_v22, %v6205_v4 }
 0x3d9   :  { %v3123_v57 = vsel %vm1080_vm12, %v3122_v61, %v3121_v15  ;;  %v7005_v61 = vmov 0.0  }
 0x3da   :  { %v4094_v22 = vsel %vm1080_vm12, %v4093_v2, %v4092_v6  ;;  %v4356_v2 = vmov 192.0  }
 0x3db   :  { %v4069_v24 = vpop.permute.xlu2 %4068 }
 0x3dc   :  { %v4130_v41 = vperm.slane %v4069_v24, %v6249_v5 }
 0x3de   :  { %v6744_v34 = vpop.permute.xlu0 %3060 }
 0x3df   :  { %v6756_v39 = vpop.permute.xlu1 %4014  ;;  %v3124_v63 = vperm.slane %v6744_v34, %v6201_v26 }
 0x3e0   :  { %v4095_v49 = vperm.slane %v6756_v39, %v6201_v26  ;;  %v4125_v26 = vsel %vm1080_vm12, %v4124_v21, %v4123_v18  ;;  %v4264_v21 = vsel %vm4263_vm1, 0.5, %v7005_v61 }
 0x3e1   :  { %v3125_v10 = vsel %vm1084_vm13, %v3124_v63, %v3123_v57  ;;  %v4262_v63 = vsel %vm4261_vm2, 640.0, %v4356_v2 }
 0x3e2   :  { %v4096_v35 = vsel %vm1084_vm13, %v4095_v49, %v4094_v22 }
 0x3e6   :  { %v3064_v40 = vpop.permute.xlu0 %3063 }
 0x3e7   :  { %v4018_v60 = vpop.permute.xlu1 %4017  ;;  %v3126_v42 = vperm.slane %v3064_v40, %v6241_v25 }
 0x3e8   :  { %v4097_v4 = vperm.slane %v4018_v60, %v6241_v25  ;;  %v4127_v25 = vsel %vm1084_vm13, %v4126_v17, %v4125_v26 }
 0x3e9   :  { %v3127_v20 = vsel %vm1088_vm14, %v3126_v42, %v3125_v10  ;;  %v4129_v39 = vsel %vm1088_vm14, %v4128_v12, %v4127_v25 }
 0x3ea   :  { %v4098_v8 = vsel %vm1088_vm14, %v4097_v4, %v4096_v35  ;;  %v4131_v9 = vsel %vm1092_vm15, %v4130_v41, %v4129_v39 }
 0x3ee   :  { %v3067_v56 = vpop.permute.xlu0 %3066 }
 0x3ef   :  { %v3128_v46 = vperm.slane %v3067_v56, %v6249_v5  ;;  %v4021_v34 = vpop.permute.xlu1 %4020 }
 0x3f0   :  { %v4099_v36 = vperm.slane %v4021_v34, %v6249_v5 }
 0x3f1   :  { %v3129_v27 = vsel %vm1092_vm15, %v3128_v46, %v3127_v20 }
 0x3f2   :  { %v3130_v19 = vsel %vm1125_vm0, %v3129_v27, %v6694_v30  ;;  %v4100_v31 = vsel %vm1092_vm15, %v4099_v36, %v4098_v8 }
 0x3f3   :  { %v3132_v43 = vadd.f32 %v3130_v19, %v2260_v55  ;;  %v4132_v16 = vsel %vm1125_vm0, %v4131_v9, %v4100_v31 }
 0x3f4   :  { %v4134_v14 = vadd.f32 %v4132_v16, %v3262_v54 }
 0x3f5   :  { %3133 = vst [vmem:[#allocation2 + $0x4] sm:$0x3] %v3132_v43 }
 0x3f6   :  { %4135 = vst [vmem:[#allocation2 + $0x6] sm:$0x3] %v4134_v14 }
 0x3fd   :  { %v4139_v5 = vld [vmem:[#allocation2] sm:$0xff] }
 0x3fe   :  { %4145 = vst [vmem:[#allocation1] ss:$4 sm:$0xff] %v4139_v5 }
 0x405   :  { %v4146_v59 = vld.sshfl [vmem:[#allocation1] sm:$0xff pattern:$0x73625140]  ;;  %v4147_v0 = vld.sshfl [vmem:[#allocation1 + $0x8] sm:$0xff pattern:$0x73625140] }
 0x406   :  { %4170 = vmatmul.f32.vlgmr.msra.gmra.mxu0 %v4146_v59  ;;  %4190 = vmatmul.f32.vlgmr.msra.gmra.mxu1 %v4147_v0  ;;  %v4148_v58 = vld.sshfl [vmem:[#allocation1 + $0x10] sm:$0xff pattern:$0x73625140]  ;;  %v4149_v1 = vld.sshfl [vmem:[#allocation1 + $0x18] sm:$0xff pattern:$0x73625140] }
 0x407   :  { %4210 = vmatmul.f32.vlgmr.msra.gmra.mxu2 %v4148_v58  ;;  %4230 = vmatmul.f32.vlgmr.msra.gmra.mxu3 %v4149_v1 }
 0x483   :  { %v4171_v3 = vpop.f32.mrf.mxu0  ;;  %v4191_v30 = vpop.f32.mrf.mxu1 }
 0x484   :  { %v4192_v40 = vadd.f32 %v4191_v30, %v4171_v3 }
 0x48a   :  { %v4211_v7 = vpop.f32.mrf.mxu2  ;;  %v4231_v50 = vpop.f32.mrf.mxu3 }
 0x48b   :  { %v4212_v29 = vadd.f32 %v4211_v7, %v4192_v40 }
 0x48d   :  { %v4232_v48 = vadd.f32 %v4231_v50, %v4212_v29 }
 0x48f   :  { %v4234_v60 = vmul.f32 0.015625, %v4232_v48 }
 0x491   :  { %v4236_v51 = vmin.f32 %v4234_v60, 20.0  ;;  %vm4235_vm4 = vcmp.gt.f32.partialorder %v4234_v60, 20.0 }
 0x493   :  { %v4237_v47 = vmul.f32 1.442695, %v4236_v51 }
 0x495   :  { %4320 = vpow2.f32 %v4237_v47 }
 0x49b   :  { %v4321_v52 = vpop.eup %4320 }
 0x49c   :  { %v4239_v28 = vadd.f32 1.0, %v4321_v52  ;;  %v4242_v62 = vmul.f32 -0.5, %v4321_v52  ;;  %v4245_v44 = vand.u32 2147483647, %v4321_v52 }
 0x49e   :  { %4322 = vlog2.f32 %v4239_v28  ;;  %v4243_v11 = vadd.f32 1.0, %v4242_v62  ;;  %vm4246_vm3 = vcmp.lt.f32.partialorder %v4245_v44, 0.0004427343 }
 0x4a0   :  { %v4244_v37 = vmul.f32 %v4321_v52, %v4243_v11 }
 0x4a4   :  { %v4323_v13 = vpop.eup %4322 }
 0x4a5   :  { %v4241_v45 = vmul.f32 0.6931472, %v4323_v13 }
 0x4a7   :  { %v4247_v33 = vsel %vm4246_vm3, %v4244_v37, %v4241_v45 }
 0x4a8   :  { %v4248_v24 = vsel %vm4235_vm4, %v4234_v60, %v4247_v33 }
 0x4a9   :  { %v4265_v17 = vadd.f32 %v4264_v21, %v4248_v24 }
 0x4ab   :  { %v4266_v23 = vmul.f32 %v4265_v17, %v4262_v63 }
 0x4ad   :  { %4268 = vst.msk [vmem:[#allocation3] sm:$0x3] %vm4267_vm5, %v4266_v23 }
 0x4ae   :  { %4279 = dma.vmem_to_hbm [thread:$0]  %s4275_s15, 32, %s4277_s18, [#allocation4]  }
 0x4af   :  { %4348 = dma.done.wait [#allocation4], 32  }
 0x4b0   :  { %4349 = vsyncadd [#allocation4], 4294967264 }
 0x4b1   :  { %4284 = vsyncpa [#allocation4], 1 }

</bundles_post_ra>
